<compile_context>
chip_gen: v6e
topology: v6e:2x2x1
jax: 0.10.0
libtpu: 0.0.40
codegen_flags: <defaults>
</compile_context>

<pallas_src>
import math
import functools

import jax
import jax.numpy as jnp
from jax.experimental import pallas as pl
from jax.experimental.pallas import tpu as pltpu

_HP = 128  # per-head q/k/v padding width = one lane tile


# ----------------------------------------------------------------------------
# Pallas kernel: positional-encoding add + one full TransformerEncoderLayer
# (post-norm, ReLU FFN) for a (bt, D, T) batch tile, read & written in the
# module's native (batch, channel, time) layout.
# ----------------------------------------------------------------------------
def _eeg_attention_kernel(
    x_ref,       # (bt, D, T)        input tile (f32, native layout)
    pe_ref,      # (D, T)            positional encoding, pre-transposed (f32)
    wqkv_ref,    # (D, nhead*3*HP)   head-major lane-padded in_proj W^T (bf16)
    bqkv_ref,    # (1, nhead*3*HP)   head-major lane-padded in_proj bias (f32)
    wo_ref,      # (nhead, HP, D)    per-head out_proj slabs (bf16)
    w1_ref,      # (D, FF)           linear1.weight^T (bf16)
    bf1_ref,     # (1, FF)           linear1.bias (f32)
    w2t_ref,     # (FF, HP)          linear2.weight^T lane-padded D->HP (bf16)
    vec_ref,     # (8, HP)           packed D-length bias / LN vectors (f32)
    o_ref,       # (bt, D, T)        output tile (native layout)
    *,
    d_model: int,
    nhead: int,
    eps: float,
):
    D = d_model
    hd = D // nhead
    scale = 1.0 / math.sqrt(hd)
    bt, _, T = x_ref.shape
    rows = bt * T
    w_dtype = wqkv_ref.dtype

    # ---- packed small parameters (kept in f32) ----
    vec = vec_ref[...]
    bo, g1, be1 = vec[0:1, :D], vec[1:2, :D], vec[2:3, :D]
    bf2, g2, be2 = vec[3:4, :D], vec[4:5, :D], vec[5:6, :D]

    # ---- PE add in native (D, T) layout, then fold the activation transpose
    #      into the kernel and flatten batch into the matmul M dimension.
    x_dt = x_ref[...].astype(jnp.float32) + pe_ref[...][None, :, :]
    x = jnp.concatenate([x_dt[b].T for b in range(bt)], axis=0)   # (rows, D)

    # ---- fused QKV projection (MXU, bf16 x bf16 -> f32 accumulation).
    # Weight is head-major with each (head, q/k/v) block zero-padded to a full
    # 128-lane tile, so every per-head slice below is lane-tile aligned and
    # the zero padding cancels exactly in every matmul.
    qkv = jnp.dot(x.astype(w_dtype), wqkv_ref[...],
                  preferred_element_type=jnp.float32) + bqkv_ref[...]

    # ---- per-head attention; out-projection accumulated per head ----
    attn = jnp.zeros((rows, D), jnp.float32)
    for h in range(nhead):                     # static loop over heads
        base = 3 * _HP * h
        qh = qkv[:, base:base + _HP].reshape(bt, T, _HP)
        kh = qkv[:, base + _HP:base + 2 * _HP].reshape(bt, T, _HP)
        vh = qkv[:, base + 2 * _HP:base + 3 * _HP].reshape(bt, T, _HP)
        s = jnp.einsum("bqd,bkd->bqk", qh, kh,
                       preferred_element_type=jnp.float32) * scale
        s = s - jnp.max(s, axis=-1, keepdims=True)
        p = jnp.exp(s)
        p = p * pl.reciprocal(jnp.sum(p, axis=-1, keepdims=True), approx=True)
        oh = jnp.einsum("bqk,bkd->bqd", p, vh,
                        preferred_element_type=jnp.float32).reshape(rows, _HP)
        attn = attn + jnp.dot(oh.astype(w_dtype), wo_ref[h],
                              preferred_element_type=jnp.float32)
    attn = attn + bo

    # ---- residual + LayerNorm 1 (f32) ----
    y = x + attn
    mu = jnp.mean(y, axis=-1, keepdims=True)
    var = jnp.mean((y - mu) ** 2, axis=-1, keepdims=True)
    y = (y - mu) * jax.lax.rsqrt(var + eps) * g1 + be1

    # ---- feed-forward: linear -> ReLU -> linear (w2^T pre-transposed,
    #      lane-padded to HP columns; plain jnp.dot, slice off the padding) ----
    h1 = jnp.dot(y.astype(w_dtype), w1_ref[...],
                 preferred_element_type=jnp.float32) + bf1_ref[...]
    h1 = jnp.maximum(h1, 0.0)
    ffo = jnp.dot(h1.astype(w_dtype), w2t_ref[...],
                  preferred_element_type=jnp.float32)[:, :D] + bf2

    # ---- residual + LayerNorm 2 (f32) ----
    z = y + ffo
    mu2 = jnp.mean(z, axis=-1, keepdims=True)
    var2 = jnp.mean((z - mu2) ** 2, axis=-1, keepdims=True)
    z = (z - mu2) * jax.lax.rsqrt(var2 + eps) * g2 + be2

    # ---- write back in native (D, T) layout (no wrapper post-transpose) ----
    for b in range(bt):
        o_ref[b] = z[b * T:(b + 1) * T, :].T.astype(o_ref.dtype)


# ----------------------------------------------------------------------------
# One-time parameter prep: kernel-preferred layouts + bf16 weights.
# (Hoisted out of the per-call path on purpose.)
# ----------------------------------------------------------------------------
def prepare_params(params, nhead, weight_dtype=jnp.bfloat16):
    D = params["wo"].shape[0]
    FF = params["w1"].shape[0]
    assert D % nhead == 0
    hd = D // nhead

    # Head-major, lane-padded QKV projection (W^T) and bias.
    wqkv, bqkv = params["wqkv"], params["bqkv"]
    wqkv_hm = jnp.zeros((D, nhead * 3 * _HP), jnp.float32)
    bqkv_hm = jnp.zeros((1, nhead * 3 * _HP), jnp.float32)
    for h in range(nhead):
        for t in range(3):                       # q, k, v
            src_lo = t * D + h * hd
            dst_lo = (3 * h + t) * _HP
            wqkv_hm = wqkv_hm.at[:, dst_lo:dst_lo + hd].set(
                wqkv[src_lo:src_lo + hd, :].T)
            bqkv_hm = bqkv_hm.at[0, dst_lo:dst_lo + hd].set(
                bqkv[src_lo:src_lo + hd])

    # Per-head out-projection slabs, padded head dim -> HP sublanes of zeros.
    wo_t = params["wo"].T                        # (D, D)
    wo_hm = jnp.zeros((nhead, _HP, D), jnp.float32)
    for h in range(nhead):
        wo_hm = wo_hm.at[h, :hd, :].set(wo_t[h * hd:(h + 1) * hd, :])

    # linear2 weight, pre-transposed and lane-padded (FF, HP).
    w2t_pad = jnp.zeros((FF, _HP), jnp.float32).at[:, :D].set(params["w2"].T)

    # Seven D-length vectors packed into one small (8, HP) f32 slab.
    vec = jnp.zeros((8, _HP), jnp.float32)
    for i, name in enumerate(("bo", "g1", "be1", "bf2", "g2", "be2")):
        vec = vec.at[i, :D].set(params[name])

    return dict(
        pe_dt=params["pe"].T.astype(jnp.float32),            # (D, T)
        wqkv_hm=wqkv_hm.astype(weight_dtype),                 # (D, nhead*3*HP)
        bqkv_hm=bqkv_hm,                                      # (1, nhead*3*HP)
        wo_hm=wo_hm.astype(weight_dtype),                     # (nhead, HP, D)
        w1_t=params["w1"].T.astype(weight_dtype),             # (D, FF)
        bf1=params["bf1"].reshape(1, FF).astype(jnp.float32), # (1, FF)
        w2t_pad=w2t_pad.astype(weight_dtype),                 # (FF, HP)
        vec=vec,                                              # (8, HP)
    )


def _pick_block_b(batch, seq_len, rows_min=128, bt_cap=8):
    """One grid step unless each step still gets >= rows_min rows.

    v5e/v6e have a single TensorCore, so extra grid steps are pure per-step
    overhead; on v7x, splitting only pays when per-core work exceeds launch
    overhead (~128 rows). bt is capped so the in-kernel per-batch transpose
    unroll stays tiny.
    """
    best = 1
    for d in range(1, batch + 1):
        if batch % d != 0 or d > bt_cap:
            continue
        best = d
        if d * seq_len >= rows_min and batch // d >= 2:
            break
    return best


# ----------------------------------------------------------------------------
# Wrapper: a bare pallas_call — no activation transposes outside the kernel.
# ----------------------------------------------------------------------------
def eeg_attention_forward(src, prepped, nhead, *, block_b=None):
    """src: (B, C, T) with C == d_model.  Returns (B, C, T)."""
    B, D, T = src.shape
    FF = prepped["w1_t"].shape[1]
    NHP = prepped["wqkv_hm"].shape[1]

    bt = block_b if block_b is not None else _pick_block_b(B, T)
    assert B % bt == 0, (B, bt)

    const = lambda b: (0, 0)
    const3 = lambda b: (0, 0, 0)
    kernel = functools.partial(
        _eeg_attention_kernel, d_model=D, nhead=nhead, eps=1e-5)

    return pl.pallas_call(
        kernel,
        out_shape=jax.ShapeDtypeStruct((B, D, T), src.dtype),
        grid=(B // bt,),
        in_specs=[
            pl.BlockSpec((bt, D, T), lambda b: (b, 0, 0)),    # x tile (native)
            pl.BlockSpec((D, T), const),                      # pe^T
            pl.BlockSpec((D, NHP), const),                    # wqkv head-major
            pl.BlockSpec((1, NHP), const),                    # bqkv head-major
            pl.BlockSpec((nhead, _HP, D), const3),            # wo per-head
            pl.BlockSpec((D, FF), const),                     # w1^T
            pl.BlockSpec((1, FF), const),                     # bf1
            pl.BlockSpec((FF, _HP), const),                   # w2^T padded
            pl.BlockSpec((8, _HP), const),                    # packed vectors
        ],
        out_specs=pl.BlockSpec((bt, D, T), lambda b: (b, 0, 0)),
        compiler_params=pltpu.CompilerParams(
            dimension_semantics=("parallel",)),
    )(src, prepped["pe_dt"], prepped["wqkv_hm"], prepped["bqkv_hm"],
      prepped["wo_hm"], prepped["w1_t"], prepped["bf1"],
      prepped["w2t_pad"], prepped["vec"])


# ----------------------------------------------------------------------------
# Parameter construction (deterministic) + pure-JAX f32 reference
# ----------------------------------------------------------------------------
def positional_encoding(seq_len, d_model):
    # Exact replica of the PyTorch PositionalEncoding buffer (odd d_model).
    position = jnp.arange(seq_len, dtype=jnp.float32)[:, None]
    div_term = jnp.exp(
        jnp.arange(0, d_model + 1, 2, dtype=jnp.float32)
        * (-math.log(10000.0) / d_model))
    pe = jnp.zeros((seq_len, d_model), jnp.float32)
    pe = pe.at[:, 0::2].set(jnp.sin(position * div_term[: d_model // 2 + 1]))
    pe = pe.at[:, 1::2].set(jnp.cos(position * div_term[: d_model // 2]))
    return pe


def make_params(key, d_model, nhead, ff, seq_len):
    ks = jax.random.split(key, 8)
    u = lambda k, shape, fan_in: jax.random.uniform(
        k, shape, jnp.float32, -1.0 / math.sqrt(fan_in), 1.0 / math.sqrt(fan_in))
    D = d_model
    return dict(
        pe=positional_encoding(seq_len, D),
        wqkv=u(ks[0], (3 * D, D), D),
        bqkv=u(ks[1], (3 * D,), D),
        wo=u(ks[2], (D, D), D),
        bo=u(ks[3], (D,), D),
        g1=jnp.ones((D,), jnp.float32),
        be1=jnp.zeros((D,), jnp.float32),
        w1=u(ks[4], (ff, D), D),
        bf1=u(ks[5], (ff,), D),
        w2=u(ks[6], (D, ff), ff),
        bf2=u(ks[7], (D,), ff),
        g2=jnp.ones((D,), jnp.float32),
        be2=jnp.zeros((D,), jnp.float32),
    )


def _layer_norm(x, g, b, eps=1e-5):
    mu = jnp.mean(x, axis=-1, keepdims=True)
    var = jnp.mean((x - mu) ** 2, axis=-1, keepdims=True)
    return (x - mu) / jnp.sqrt(var + eps) * g + b


def reference_forward(src, P, nhead):
    B, D, T = src.shape
    hd = D // nhead
    x = jnp.transpose(src, (0, 2, 1)) + P["pe"][None]        # (B, T, D)
    qkv = x @ P["wqkv"].T + P["bqkv"]
    q, k, v = qkv[..., :D], qkv[..., D:2 * D], qkv[..., 2 * D:]
    split = lambda a: a.reshape(B, T, nhead, hd).transpose(0, 2, 1, 3)
    qh, kh, vh = split(q), split(k), split(v)
    s = jnp.einsum("bhqd,bhkd->bhqk", qh, kh) / math.sqrt(hd)
    p = jax.nn.softmax(s, axis=-1)
    o = jnp.einsum("bhqk,bhkd->bhqd", p, vh).transpose(0, 2, 1, 3).reshape(B, T, D)
    attn = o @ P["wo"].T + P["bo"]
    y = _layer_norm(x + attn, P["g1"], P["be1"])
    h1 = jax.nn.relu(y @ P["w1"].T + P["bf1"])
    z = _layer_norm(y + h1 @ P["w2"].T + P["bf2"], P["g2"], P["be2"])
    return jnp.transpose(z, (0, 2, 1))


if __name__ == "__main__":
    # Small shapes consistent with EEGAttention(channel=d_model, nhead):
    # src is (batch, channel, time).  d_model must be odd for the reference
    # PositionalEncoding indexing to be well-defined; dim_feedforward is the
    # nn.TransformerEncoderLayer default (2048).
    B, D, T, NHEAD, FF = 2, 33, 16, 3, 2048

    key = jax.random.PRNGKey(0)
    k_src, k_par = jax.random.split(key)
    src = jax.random.normal(k_src, (B, D, T), jnp.float32)
    params = make_params(k_par, D, NHEAD, FF, T)

    prepped = prepare_params(params, NHEAD)       # one-time layout + bf16 prep
    fwd = jax.jit(functools.partial(eeg_attention_forward, nhead=NHEAD))
    out = jax.block_until_ready(fwd(src, prepped))
    assert out.shape == (B, D, T), out.shape

    ref = reference_forward(src, params, NHEAD)   # full-f32 PyTorch semantics
    err = float(jnp.max(jnp.abs(out - ref)))
    if err < 5e-2:
        print("KERNEL_OK")
    else:
        print(f"MISMATCH max_abs_err={err}")
</pallas_src>

<mosaic_0001>
module attributes {stable_mosaic.version = 11 : i64} {
  func.func @_eeg_attention_kernel(%arg0: i32, %arg1: memref<2x33x16xf32, #tpu.memory_space<vmem>>, %arg2: memref<33x16xf32, #tpu.memory_space<vmem>>, %arg3: memref<33x1152xbf16, #tpu.memory_space<vmem>>, %arg4: memref<1x1152xf32, #tpu.memory_space<vmem>>, %arg5: memref<3x128x33xbf16, #tpu.memory_space<vmem>>, %arg6: memref<33x2048xbf16, #tpu.memory_space<vmem>>, %arg7: memref<1x2048xf32, #tpu.memory_space<vmem>>, %arg8: memref<2048x128xbf16, #tpu.memory_space<vmem>>, %arg9: memref<8x128xf32, #tpu.memory_space<vmem>>, %arg10: memref<2x33x16xf32, #tpu.memory_space<vmem>>) attributes {dimension_semantics = [#tpu.dimension_semantics<parallel>], iteration_bounds = array<i64: 1>, scalar_prefetch = 0 : i64, scratch_operands = 0 : i64, tpu.core_type = #tpu.core_type<tc>, window_params = [{transform_indices = @transform_0, window_bounds = array<i64: 2, 33, 16>}, {pipeline_mode = #tpu.pipeline_mode<synchronous>, transform_indices = @transform_1, window_bounds = array<i64: 33, 16>}, {pipeline_mode = #tpu.pipeline_mode<synchronous>, transform_indices = @transform_2, window_bounds = array<i64: 33, 1152>}, {pipeline_mode = #tpu.pipeline_mode<synchronous>, transform_indices = @transform_3, window_bounds = array<i64: 1, 1152>}, {pipeline_mode = #tpu.pipeline_mode<synchronous>, transform_indices = @transform_4, window_bounds = array<i64: 3, 128, 33>}, {pipeline_mode = #tpu.pipeline_mode<synchronous>, transform_indices = @transform_5, window_bounds = array<i64: 33, 2048>}, {pipeline_mode = #tpu.pipeline_mode<synchronous>, transform_indices = @transform_6, window_bounds = array<i64: 1, 2048>}, {pipeline_mode = #tpu.pipeline_mode<synchronous>, transform_indices = @transform_7, window_bounds = array<i64: 2048, 128>}, {pipeline_mode = #tpu.pipeline_mode<synchronous>, transform_indices = @transform_8, window_bounds = array<i64: 8, 128>}, {transform_indices = @transform_9, window_bounds = array<i64: 2, 33, 16>}]} {
    %c0 = arith.constant 0 : index
    %c0_0 = arith.constant 0 : index
    %0 = vector.load %arg9[%c0, %c0_0] : memref<8x128xf32, #tpu.memory_space<vmem>>, vector<8x128xf32>
    %1 = vector.extract_strided_slice %0 {offsets = [0, 0], sizes = [1, 33], strides = [1, 1]} : vector<8x128xf32> to vector<1x33xf32>
    %2 = vector.extract_strided_slice %0 {offsets = [1, 0], sizes = [1, 33], strides = [1, 1]} : vector<8x128xf32> to vector<1x33xf32>
    %3 = vector.extract_strided_slice %0 {offsets = [2, 0], sizes = [1, 33], strides = [1, 1]} : vector<8x128xf32> to vector<1x33xf32>
    %4 = vector.extract_strided_slice %0 {offsets = [3, 0], sizes = [1, 33], strides = [1, 1]} : vector<8x128xf32> to vector<1x33xf32>
    %5 = vector.extract_strided_slice %0 {offsets = [4, 0], sizes = [1, 33], strides = [1, 1]} : vector<8x128xf32> to vector<1x33xf32>
    %6 = vector.extract_strided_slice %0 {offsets = [5, 0], sizes = [1, 33], strides = [1, 1]} : vector<8x128xf32> to vector<1x33xf32>
    %c0_1 = arith.constant 0 : index
    %c0_2 = arith.constant 0 : index
    %c0_3 = arith.constant 0 : index
    %7 = vector.load %arg1[%c0_1, %c0_2, %c0_3] : memref<2x33x16xf32, #tpu.memory_space<vmem>>, vector<2x33x16xf32>
    %c0_4 = arith.constant 0 : index
    %c0_5 = arith.constant 0 : index
    %8 = vector.load %arg2[%c0_4, %c0_5] : memref<33x16xf32, #tpu.memory_space<vmem>>, vector<33x16xf32>
    %9 = vector.shape_cast %8 : vector<33x16xf32> to vector<1x33x16xf32>
    %10 = vector.broadcast %9 : vector<1x33x16xf32> to vector<2x33x16xf32>
    %11 = arith.addf %7, %10 : vector<2x33x16xf32>
    %12 = vector.extract_strided_slice %11 {offsets = [0, 0, 0], sizes = [1, 33, 16], strides = [1, 1, 1]} : vector<2x33x16xf32> to vector<1x33x16xf32>
    %13 = vector.shape_cast %12 : vector<1x33x16xf32> to vector<33x16xf32>
    %14 = tpu.transpose %13, [1, 0] : vector<33x16xf32> -> vector<16x33xf32>
    %15 = vector.extract_strided_slice %11 {offsets = [1, 0, 0], sizes = [1, 33, 16], strides = [1, 1, 1]} : vector<2x33x16xf32> to vector<1x33x16xf32>
    %16 = vector.shape_cast %15 : vector<1x33x16xf32> to vector<33x16xf32>
    %17 = tpu.transpose %16, [1, 0] : vector<33x16xf32> -> vector<16x33xf32>
    %18 = tpu.concatenate %14, %17 in 0 : vector<16x33xf32>, vector<16x33xf32> -> vector<32x33xf32>
    %19 = arith.truncf %18 : vector<32x33xf32> to vector<32x33xbf16>
    %c0_6 = arith.constant 0 : index
    %c0_7 = arith.constant 0 : index
    %20 = vector.load %arg3[%c0_6, %c0_7] : memref<33x1152xbf16, #tpu.memory_space<vmem>>, vector<33x1152xbf16>
    %cst = arith.constant dense<0.000000e+00> : vector<32x1152xf32>
    %21 = tpu.matmul %19, %20, %cst {dimension_numbers = #tpu.dot_dimension_numbers<[1], [0], [0], [1], [0, 0, 1, 1], [], []>} : vector<32x33xbf16>, vector<33x1152xbf16>, vector<32x1152xf32> -> vector<32x1152xf32>
    %c0_8 = arith.constant 0 : index
    %c0_9 = arith.constant 0 : index
    %22 = vector.load %arg4[%c0_8, %c0_9] : memref<1x1152xf32, #tpu.memory_space<vmem>>, vector<1x1152xf32>
    %23 = vector.broadcast %22 : vector<1x1152xf32> to vector<32x1152xf32>
    %24 = arith.addf %21, %23 : vector<32x1152xf32>
    %cst_10 = arith.constant 0.000000e+00 : f32
    %25 = vector.broadcast %cst_10 : f32 to vector<32x33xf32>
    %26 = vector.extract_strided_slice %24 {offsets = [0, 0], sizes = [32, 128], strides = [1, 1]} : vector<32x1152xf32> to vector<32x128xf32>
    %27 = vector.shape_cast %26 : vector<32x128xf32> to vector<2x16x128xf32>
    %28 = vector.extract_strided_slice %24 {offsets = [0, 128], sizes = [32, 128], strides = [1, 1]} : vector<32x1152xf32> to vector<32x128xf32>
    %29 = vector.shape_cast %28 : vector<32x128xf32> to vector<2x16x128xf32>
    %30 = vector.extract_strided_slice %24 {offsets = [0, 256], sizes = [32, 128], strides = [1, 1]} : vector<32x1152xf32> to vector<32x128xf32>
    %31 = vector.shape_cast %30 : vector<32x128xf32> to vector<2x16x128xf32>
    "tpu.trace_start"() <{level = 10 : i32, message = "bqd,bkd->bqk"}> : () -> ()
    %cst_11 = arith.constant dense<0.000000e+00> : vector<2x16x16xf32>
    %32 = tpu.matmul %27, %29, %cst_11 {dimension_numbers = #tpu.dot_dimension_numbers<[2], [2], [1], [1], [0, 0, 0, 1, 1, 1], [0], [0]>} : vector<2x16x128xf32>, vector<2x16x128xf32>, vector<2x16x16xf32> -> vector<2x16x16xf32>
    "tpu.trace_stop"() : () -> ()
    %cst_12 = arith.constant 0.301511347 : f32
    %33 = vector.broadcast %cst_12 : f32 to vector<2x16x16xf32>
    %34 = arith.mulf %32, %33 : vector<2x16x16xf32>
    %cst_13 = arith.constant dense<0xFF800000> : vector<2x16xf32>
    %35 = vector.multi_reduction <maximumf>, %34, %cst_13 [2] : vector<2x16x16xf32> to vector<2x16xf32>
    %36 = vector.shape_cast %35 : vector<2x16xf32> to vector<2x16x1xf32>
    %37 = vector.broadcast %36 : vector<2x16x1xf32> to vector<2x16x16xf32>
    %38 = arith.subf %34, %37 : vector<2x16x16xf32>
    %39 = math.exp %38 : vector<2x16x16xf32>
    %cst_14 = arith.constant dense<0.000000e+00> : vector<2x16xf32>
    %40 = vector.multi_reduction <add>, %39, %cst_14 [2] : vector<2x16x16xf32> to vector<2x16xf32>
    %41 = vector.shape_cast %40 : vector<2x16xf32> to vector<2x16x1xf32>
    %42 = tpu.reciprocal %41 {approx = true} : vector<2x16x1xf32> -> vector<2x16x1xf32>
    %43 = vector.broadcast %42 : vector<2x16x1xf32> to vector<2x16x16xf32>
    %44 = arith.mulf %39, %43 : vector<2x16x16xf32>
    "tpu.trace_start"() <{level = 10 : i32, message = "bqk,bkd->bqd"}> : () -> ()
    %cst_15 = arith.constant dense<0.000000e+00> : vector<2x16x128xf32>
    %45 = tpu.matmul %44, %31, %cst_15 {dimension_numbers = #tpu.dot_dimension_numbers<[2], [1], [1], [2], [0, 0, 0, 1, 1, 2], [0], [0]>} : vector<2x16x16xf32>, vector<2x16x128xf32>, vector<2x16x128xf32> -> vector<2x16x128xf32>
    "tpu.trace_stop"() : () -> ()
    %46 = vector.shape_cast %45 : vector<2x16x128xf32> to vector<32x128xf32>
    %47 = arith.truncf %46 : vector<32x128xf32> to vector<32x128xbf16>
    %c0_16 = arith.constant 0 : index
    %c0_17 = arith.constant 0 : index
    %c0_18 = arith.constant 0 : index
    %48 = vector.load %arg5[%c0_16, %c0_17, %c0_18] : memref<3x128x33xbf16, #tpu.memory_space<vmem>>, vector<1x128x33xbf16>
    %49 = vector.shape_cast %48 : vector<1x128x33xbf16> to vector<128x33xbf16>
    %cst_19 = arith.constant dense<0.000000e+00> : vector<32x33xf32>
    %50 = tpu.matmul %47, %49, %cst_19 {dimension_numbers = #tpu.dot_dimension_numbers<[1], [0], [0], [1], [0, 0, 1, 1], [], []>} : vector<32x128xbf16>, vector<128x33xbf16>, vector<32x33xf32> -> vector<32x33xf32>
    %51 = arith.addf %25, %50 : vector<32x33xf32>
    %52 = vector.extract_strided_slice %24 {offsets = [0, 384], sizes = [32, 128], strides = [1, 1]} : vector<32x1152xf32> to vector<32x128xf32>
    %53 = vector.shape_cast %52 : vector<32x128xf32> to vector<2x16x128xf32>
    %54 = vector.extract_strided_slice %24 {offsets = [0, 512], sizes = [32, 128], strides = [1, 1]} : vector<32x1152xf32> to vector<32x128xf32>
    %55 = vector.shape_cast %54 : vector<32x128xf32> to vector<2x16x128xf32>
    %56 = vector.extract_strided_slice %24 {offsets = [0, 640], sizes = [32, 128], strides = [1, 1]} : vector<32x1152xf32> to vector<32x128xf32>
    %57 = vector.shape_cast %56 : vector<32x128xf32> to vector<2x16x128xf32>
    "tpu.trace_start"() <{level = 10 : i32, message = "bqd,bkd->bqk"}> : () -> ()
    %cst_20 = arith.constant dense<0.000000e+00> : vector<2x16x16xf32>
    %58 = tpu.matmul %53, %55, %cst_20 {dimension_numbers = #tpu.dot_dimension_numbers<[2], [2], [1], [1], [0, 0, 0, 1, 1, 1], [0], [0]>} : vector<2x16x128xf32>, vector<2x16x128xf32>, vector<2x16x16xf32> -> vector<2x16x16xf32>
    "tpu.trace_stop"() : () -> ()
    %cst_21 = arith.constant 0.301511347 : f32
    %59 = vector.broadcast %cst_21 : f32 to vector<2x16x16xf32>
    %60 = arith.mulf %58, %59 : vector<2x16x16xf32>
    %cst_22 = arith.constant dense<0xFF800000> : vector<2x16xf32>
    %61 = vector.multi_reduction <maximumf>, %60, %cst_22 [2] : vector<2x16x16xf32> to vector<2x16xf32>
    %62 = vector.shape_cast %61 : vector<2x16xf32> to vector<2x16x1xf32>
    %63 = vector.broadcast %62 : vector<2x16x1xf32> to vector<2x16x16xf32>
    %64 = arith.subf %60, %63 : vector<2x16x16xf32>
    %65 = math.exp %64 : vector<2x16x16xf32>
    %cst_23 = arith.constant dense<0.000000e+00> : vector<2x16xf32>
    %66 = vector.multi_reduction <add>, %65, %cst_23 [2] : vector<2x16x16xf32> to vector<2x16xf32>
    %67 = vector.shape_cast %66 : vector<2x16xf32> to vector<2x16x1xf32>
    %68 = tpu.reciprocal %67 {approx = true} : vector<2x16x1xf32> -> vector<2x16x1xf32>
    %69 = vector.broadcast %68 : vector<2x16x1xf32> to vector<2x16x16xf32>
    %70 = arith.mulf %65, %69 : vector<2x16x16xf32>
    "tpu.trace_start"() <{level = 10 : i32, message = "bqk,bkd->bqd"}> : () -> ()
    %cst_24 = arith.constant dense<0.000000e+00> : vector<2x16x128xf32>
    %71 = tpu.matmul %70, %57, %cst_24 {dimension_numbers = #tpu.dot_dimension_numbers<[2], [1], [1], [2], [0, 0, 0, 1, 1, 2], [0], [0]>} : vector<2x16x16xf32>, vector<2x16x128xf32>, vector<2x16x128xf32> -> vector<2x16x128xf32>
    "tpu.trace_stop"() : () -> ()
    %72 = vector.shape_cast %71 : vector<2x16x128xf32> to vector<32x128xf32>
    %73 = arith.truncf %72 : vector<32x128xf32> to vector<32x128xbf16>
    %c1 = arith.constant 1 : index
    %c0_25 = arith.constant 0 : index
    %c0_26 = arith.constant 0 : index
    %74 = vector.load %arg5[%c1, %c0_25, %c0_26] : memref<3x128x33xbf16, #tpu.memory_space<vmem>>, vector<1x128x33xbf16>
    %75 = vector.shape_cast %74 : vector<1x128x33xbf16> to vector<128x33xbf16>
    %cst_27 = arith.constant dense<0.000000e+00> : vector<32x33xf32>
    %76 = tpu.matmul %73, %75, %cst_27 {dimension_numbers = #tpu.dot_dimension_numbers<[1], [0], [0], [1], [0, 0, 1, 1], [], []>} : vector<32x128xbf16>, vector<128x33xbf16>, vector<32x33xf32> -> vector<32x33xf32>
    %77 = arith.addf %51, %76 : vector<32x33xf32>
    %78 = vector.extract_strided_slice %24 {offsets = [0, 768], sizes = [32, 128], strides = [1, 1]} : vector<32x1152xf32> to vector<32x128xf32>
    %79 = vector.shape_cast %78 : vector<32x128xf32> to vector<2x16x128xf32>
    %80 = vector.extract_strided_slice %24 {offsets = [0, 896], sizes = [32, 128], strides = [1, 1]} : vector<32x1152xf32> to vector<32x128xf32>
    %81 = vector.shape_cast %80 : vector<32x128xf32> to vector<2x16x128xf32>
    %82 = vector.extract_strided_slice %24 {offsets = [0, 1024], sizes = [32, 128], strides = [1, 1]} : vector<32x1152xf32> to vector<32x128xf32>
    %83 = vector.shape_cast %82 : vector<32x128xf32> to vector<2x16x128xf32>
    "tpu.trace_start"() <{level = 10 : i32, message = "bqd,bkd->bqk"}> : () -> ()
    %cst_28 = arith.constant dense<0.000000e+00> : vector<2x16x16xf32>
    %84 = tpu.matmul %79, %81, %cst_28 {dimension_numbers = #tpu.dot_dimension_numbers<[2], [2], [1], [1], [0, 0, 0, 1, 1, 1], [0], [0]>} : vector<2x16x128xf32>, vector<2x16x128xf32>, vector<2x16x16xf32> -> vector<2x16x16xf32>
    "tpu.trace_stop"() : () -> ()
    %cst_29 = arith.constant 0.301511347 : f32
    %85 = vector.broadcast %cst_29 : f32 to vector<2x16x16xf32>
    %86 = arith.mulf %84, %85 : vector<2x16x16xf32>
    %cst_30 = arith.constant dense<0xFF800000> : vector<2x16xf32>
    %87 = vector.multi_reduction <maximumf>, %86, %cst_30 [2] : vector<2x16x16xf32> to vector<2x16xf32>
    %88 = vector.shape_cast %87 : vector<2x16xf32> to vector<2x16x1xf32>
    %89 = vector.broadcast %88 : vector<2x16x1xf32> to vector<2x16x16xf32>
    %90 = arith.subf %86, %89 : vector<2x16x16xf32>
    %91 = math.exp %90 : vector<2x16x16xf32>
    %cst_31 = arith.constant dense<0.000000e+00> : vector<2x16xf32>
    %92 = vector.multi_reduction <add>, %91, %cst_31 [2] : vector<2x16x16xf32> to vector<2x16xf32>
    %93 = vector.shape_cast %92 : vector<2x16xf32> to vector<2x16x1xf32>
    %94 = tpu.reciprocal %93 {approx = true} : vector<2x16x1xf32> -> vector<2x16x1xf32>
    %95 = vector.broadcast %94 : vector<2x16x1xf32> to vector<2x16x16xf32>
    %96 = arith.mulf %91, %95 : vector<2x16x16xf32>
    "tpu.trace_start"() <{level = 10 : i32, message = "bqk,bkd->bqd"}> : () -> ()
    %cst_32 = arith.constant dense<0.000000e+00> : vector<2x16x128xf32>
    %97 = tpu.matmul %96, %83, %cst_32 {dimension_numbers = #tpu.dot_dimension_numbers<[2], [1], [1], [2], [0, 0, 0, 1, 1, 2], [0], [0]>} : vector<2x16x16xf32>, vector<2x16x128xf32>, vector<2x16x128xf32> -> vector<2x16x128xf32>
    "tpu.trace_stop"() : () -> ()
    %98 = vector.shape_cast %97 : vector<2x16x128xf32> to vector<32x128xf32>
    %99 = arith.truncf %98 : vector<32x128xf32> to vector<32x128xbf16>
    %c2 = arith.constant 2 : index
    %c0_33 = arith.constant 0 : index
    %c0_34 = arith.constant 0 : index
    %100 = vector.load %arg5[%c2, %c0_33, %c0_34] : memref<3x128x33xbf16, #tpu.memory_space<vmem>>, vector<1x128x33xbf16>
    %101 = vector.shape_cast %100 : vector<1x128x33xbf16> to vector<128x33xbf16>
    %cst_35 = arith.constant dense<0.000000e+00> : vector<32x33xf32>
    %102 = tpu.matmul %99, %101, %cst_35 {dimension_numbers = #tpu.dot_dimension_numbers<[1], [0], [0], [1], [0, 0, 1, 1], [], []>} : vector<32x128xbf16>, vector<128x33xbf16>, vector<32x33xf32> -> vector<32x33xf32>
    %103 = arith.addf %77, %102 : vector<32x33xf32>
    %104 = vector.broadcast %1 : vector<1x33xf32> to vector<32x33xf32>
    %105 = arith.addf %103, %104 : vector<32x33xf32>
    %106 = arith.addf %18, %105 : vector<32x33xf32>
    %cst_36 = arith.constant dense<0.000000e+00> : vector<32xf32>
    %107 = vector.multi_reduction <add>, %106, %cst_36 [1] : vector<32x33xf32> to vector<32xf32>
    %108 = vector.shape_cast %107 : vector<32xf32> to vector<32x1xf32>
    %cst_37 = arith.constant 3.300000e+01 : f32
    %109 = vector.broadcast %cst_37 : f32 to vector<32x1xf32>
    %110 = arith.divf %108, %109 : vector<32x1xf32>
    %111 = vector.broadcast %110 : vector<32x1xf32> to vector<32x33xf32>
    %112 = arith.subf %106, %111 : vector<32x33xf32>
    %113 = arith.mulf %112, %112 : vector<32x33xf32>
    %cst_38 = arith.constant dense<0.000000e+00> : vector<32xf32>
    %114 = vector.multi_reduction <add>, %113, %cst_38 [1] : vector<32x33xf32> to vector<32xf32>
    %115 = vector.shape_cast %114 : vector<32xf32> to vector<32x1xf32>
    %cst_39 = arith.constant 3.300000e+01 : f32
    %116 = vector.broadcast %cst_39 : f32 to vector<32x1xf32>
    %117 = arith.divf %115, %116 : vector<32x1xf32>
    %118 = vector.broadcast %110 : vector<32x1xf32> to vector<32x33xf32>
    %119 = arith.subf %106, %118 : vector<32x33xf32>
    %cst_40 = arith.constant 9.99999974E-6 : f32
    %120 = vector.broadcast %cst_40 : f32 to vector<32x1xf32>
    %121 = arith.addf %117, %120 : vector<32x1xf32>
    %122 = math.rsqrt %121 : vector<32x1xf32>
    %123 = vector.broadcast %122 : vector<32x1xf32> to vector<32x33xf32>
    %124 = arith.mulf %119, %123 : vector<32x33xf32>
    %125 = vector.broadcast %2 : vector<1x33xf32> to vector<32x33xf32>
    %126 = arith.mulf %124, %125 : vector<32x33xf32>
    %127 = vector.broadcast %3 : vector<1x33xf32> to vector<32x33xf32>
    %128 = arith.addf %126, %127 : vector<32x33xf32>
    %129 = arith.truncf %128 : vector<32x33xf32> to vector<32x33xbf16>
    %c0_41 = arith.constant 0 : index
    %c0_42 = arith.constant 0 : index
    %130 = vector.load %arg6[%c0_41, %c0_42] : memref<33x2048xbf16, #tpu.memory_space<vmem>>, vector<33x2048xbf16>
    %cst_43 = arith.constant dense<0.000000e+00> : vector<32x2048xf32>
    %131 = tpu.matmul %129, %130, %cst_43 {dimension_numbers = #tpu.dot_dimension_numbers<[1], [0], [0], [1], [0, 0, 1, 1], [], []>} : vector<32x33xbf16>, vector<33x2048xbf16>, vector<32x2048xf32> -> vector<32x2048xf32>
    %c0_44 = arith.constant 0 : index
    %c0_45 = arith.constant 0 : index
    %132 = vector.load %arg7[%c0_44, %c0_45] : memref<1x2048xf32, #tpu.memory_space<vmem>>, vector<1x2048xf32>
    %133 = vector.broadcast %132 : vector<1x2048xf32> to vector<32x2048xf32>
    %134 = arith.addf %131, %133 : vector<32x2048xf32>
    %cst_46 = arith.constant 0.000000e+00 : f32
    %135 = vector.broadcast %cst_46 : f32 to vector<32x2048xf32>
    %136 = arith.maximumf %134, %135 : vector<32x2048xf32>
    %137 = arith.truncf %136 : vector<32x2048xf32> to vector<32x2048xbf16>
    %c0_47 = arith.constant 0 : index
    %c0_48 = arith.constant 0 : index
    %138 = vector.load %arg8[%c0_47, %c0_48] : memref<2048x128xbf16, #tpu.memory_space<vmem>>, vector<2048x128xbf16>
    %cst_49 = arith.constant dense<0.000000e+00> : vector<32x128xf32>
    %139 = tpu.matmul %137, %138, %cst_49 {dimension_numbers = #tpu.dot_dimension_numbers<[1], [0], [0], [1], [0, 0, 1, 1], [], []>} : vector<32x2048xbf16>, vector<2048x128xbf16>, vector<32x128xf32> -> vector<32x128xf32>
    %140 = vector.extract_strided_slice %139 {offsets = [0, 0], sizes = [32, 33], strides = [1, 1]} : vector<32x128xf32> to vector<32x33xf32>
    %141 = vector.broadcast %4 : vector<1x33xf32> to vector<32x33xf32>
    %142 = arith.addf %140, %141 : vector<32x33xf32>
    %143 = arith.addf %128, %142 : vector<32x33xf32>
    %cst_50 = arith.constant dense<0.000000e+00> : vector<32xf32>
    %144 = vector.multi_reduction <add>, %143, %cst_50 [1] : vector<32x33xf32> to vector<32xf32>
    %145 = vector.shape_cast %144 : vector<32xf32> to vector<32x1xf32>
    %cst_51 = arith.constant 3.300000e+01 : f32
    %146 = vector.broadcast %cst_51 : f32 to vector<32x1xf32>
    %147 = arith.divf %145, %146 : vector<32x1xf32>
    %148 = vector.broadcast %147 : vector<32x1xf32> to vector<32x33xf32>
    %149 = arith.subf %143, %148 : vector<32x33xf32>
    %150 = arith.mulf %149, %149 : vector<32x33xf32>
    %cst_52 = arith.constant dense<0.000000e+00> : vector<32xf32>
    %151 = vector.multi_reduction <add>, %150, %cst_52 [1] : vector<32x33xf32> to vector<32xf32>
    %152 = vector.shape_cast %151 : vector<32xf32> to vector<32x1xf32>
    %cst_53 = arith.constant 3.300000e+01 : f32
    %153 = vector.broadcast %cst_53 : f32 to vector<32x1xf32>
    %154 = arith.divf %152, %153 : vector<32x1xf32>
    %155 = vector.broadcast %147 : vector<32x1xf32> to vector<32x33xf32>
    %156 = arith.subf %143, %155 : vector<32x33xf32>
    %cst_54 = arith.constant 9.99999974E-6 : f32
    %157 = vector.broadcast %cst_54 : f32 to vector<32x1xf32>
    %158 = arith.addf %154, %157 : vector<32x1xf32>
    %159 = math.rsqrt %158 : vector<32x1xf32>
    %160 = vector.broadcast %159 : vector<32x1xf32> to vector<32x33xf32>
    %161 = arith.mulf %156, %160 : vector<32x33xf32>
    %162 = vector.broadcast %5 : vector<1x33xf32> to vector<32x33xf32>
    %163 = arith.mulf %161, %162 : vector<32x33xf32>
    %164 = vector.broadcast %6 : vector<1x33xf32> to vector<32x33xf32>
    %165 = arith.addf %163, %164 : vector<32x33xf32>
    %166 = vector.extract_strided_slice %165 {offsets = [0, 0], sizes = [16, 33], strides = [1, 1]} : vector<32x33xf32> to vector<16x33xf32>
    %167 = tpu.transpose %166, [1, 0] : vector<16x33xf32> -> vector<33x16xf32>
    %c0_55 = arith.constant 0 : index
    %c0_56 = arith.constant 0 : index
    %c0_57 = arith.constant 0 : index
    %168 = vector.load %arg10[%c0_55, %c0_56, %c0_57] : memref<2x33x16xf32, #tpu.memory_space<vmem>>, vector<1x33x16xf32>
    %169 = vector.shape_cast %168 : vector<1x33x16xf32> to vector<33x16xf32>
    %170 = vector.shape_cast %167 : vector<33x16xf32> to vector<1x33x16xf32>
    tpu.vector_store %arg10[%c0_55, %c0_56, %c0_57], %170 {strides = array<i32>} : memref<2x33x16xf32, #tpu.memory_space<vmem>>, vector<1x33x16xf32>,
    %171 = vector.extract_strided_slice %165 {offsets = [16, 0], sizes = [16, 33], strides = [1, 1]} : vector<32x33xf32> to vector<16x33xf32>
    %172 = tpu.transpose %171, [1, 0] : vector<16x33xf32> -> vector<33x16xf32>
    %c1_58 = arith.constant 1 : index
    %c0_59 = arith.constant 0 : index
    %c0_60 = arith.constant 0 : index
    %173 = vector.load %arg10[%c1_58, %c0_59, %c0_60] : memref<2x33x16xf32, #tpu.memory_space<vmem>>, vector<1x33x16xf32>
    %174 = vector.shape_cast %173 : vector<1x33x16xf32> to vector<33x16xf32>
    %175 = vector.shape_cast %172 : vector<33x16xf32> to vector<1x33x16xf32>
    tpu.vector_store %arg10[%c1_58, %c0_59, %c0_60], %175 {strides = array<i32>} : memref<2x33x16xf32, #tpu.memory_space<vmem>>, vector<1x33x16xf32>,
    return
  }
  func.func @transform_0(%arg0: i32) -> (i32, i32, i32) {
    %c0_i32 = arith.constant 0 : i32
    %c0_i32_0 = arith.constant 0 : i32
    %c0_i32_1 = arith.constant 0 : i32
    return %arg0, %c0_i32, %c0_i32_0 : i32, i32, i32
  }
  func.func @transform_1(%arg0: i32) -> (i32, i32) {
    %c0_i32 = arith.constant 0 : i32
    %c0_i32_0 = arith.constant 0 : i32
    %c0_i32_1 = arith.constant 0 : i32
    return %c0_i32, %c0_i32_0 : i32, i32
  }
  func.func @transform_2(%arg0: i32) -> (i32, i32) {
    %c0_i32 = arith.constant 0 : i32
    %c0_i32_0 = arith.constant 0 : i32
    %c0_i32_1 = arith.constant 0 : i32
    return %c0_i32, %c0_i32_0 : i32, i32
  }
  func.func @transform_3(%arg0: i32) -> (i32, i32) {
    %c0_i32 = arith.constant 0 : i32
    %c0_i32_0 = arith.constant 0 : i32
    %c0_i32_1 = arith.constant 0 : i32
    return %c0_i32, %c0_i32_0 : i32, i32
  }
  func.func @transform_4(%arg0: i32) -> (i32, i32, i32) {
    %c0_i32 = arith.constant 0 : i32
    %c0_i32_0 = arith.constant 0 : i32
    %c0_i32_1 = arith.constant 0 : i32
    %c0_i32_2 = arith.constant 0 : i32
    return %c0_i32, %c0_i32_0, %c0_i32_1 : i32, i32, i32
  }
  func.func @transform_5(%arg0: i32) -> (i32, i32) {
    %c0_i32 = arith.constant 0 : i32
    %c0_i32_0 = arith.constant 0 : i32
    %c0_i32_1 = arith.constant 0 : i32
    return %c0_i32, %c0_i32_0 : i32, i32
  }
  func.func @transform_6(%arg0: i32) -> (i32, i32) {
    %c0_i32 = arith.constant 0 : i32
    %c0_i32_0 = arith.constant 0 : i32
    %c0_i32_1 = arith.constant 0 : i32
    return %c0_i32, %c0_i32_0 : i32, i32
  }
  func.func @transform_7(%arg0: i32) -> (i32, i32) {
    %c0_i32 = arith.constant 0 : i32
    %c0_i32_0 = arith.constant 0 : i32
    %c0_i32_1 = arith.constant 0 : i32
    return %c0_i32, %c0_i32_0 : i32, i32
  }
  func.func @transform_8(%arg0: i32) -> (i32, i32) {
    %c0_i32 = arith.constant 0 : i32
    %c0_i32_0 = arith.constant 0 : i32
    %c0_i32_1 = arith.constant 0 : i32
    return %c0_i32, %c0_i32_0 : i32, i32
  }
  func.func @transform_9(%arg0: i32) -> (i32, i32, i32) {
    %c0_i32 = arith.constant 0 : i32
    %c0_i32_0 = arith.constant 0 : i32
    %c0_i32_1 = arith.constant 0 : i32
    return %arg0, %c0_i32, %c0_i32_0 : i32, i32, i32
  }
}

</mosaic_0001>

<bundles_post_ra>
// kernel: eeg_attention_forward.1
= control target key start
LH: loop header
LB: loop body
LE: loop exit
PB: predicated region body
PF: predicated region fallthrough
CT: control target
= control target key end

     0   :  { %14 = vsyncpa [#allocation3], 0  ;;  %s6636_s0 = inlined_call_operand.vmem [shape: f32[2,33,16], index: 0, kind: input, shape index: {}]   ;;  %s6637_s1 = inlined_call_operand.vmem [shape: f32[33,16], index: 1, kind: input, shape index: {}]   ;;  %s6638_s2 = inlined_call_operand.hbm [shape: bf16[33,1152], index: 2, kind: input, shape index: {}]   ;;  %s6639_s3 = inlined_call_operand.vmem [shape: f32[1,1152], index: 3, kind: input, shape index: {}]   ;;  %s6640_s4 = inlined_call_operand.vmem [shape: bf16[3,128,33], index: 4, kind: input, shape index: {}]   ;;  %s6641_s5 = inlined_call_operand.vmem [shape: bf16[33,2048], index: 5, kind: input, shape index: {}]   ;;  %s6642_s6 = inlined_call_operand.vmem [shape: f32[1,2048], index: 6, kind: input, shape index: {}]   ;;  %s6643_s7 = inlined_call_operand.hbm [shape: bf16[2048,128], index: 7, kind: input, shape index: {}]   ;;  %s6644_s8 = inlined_call_operand.vmem [shape: f32[8,128], index: 8, kind: input, shape index: {}]   ;;  %s6645_s9 = inlined_call_operand.vmem [shape: f32[2,33,16], index: 9, kind: output, shape index: {}]  }
   0x1   :  { %15 = vsyncpa [#allocation5], 0  ;;  %s5715_s30 = smov [#allocation2]  }
   0x2   :  { %s25_s10 = sshll.u32 %s5715_s30, 4  ;;  %s26_s10 = int_to_ptr.vmem [resolvable:$true] %s25_s10 }
   0x3   :  { %s5679_s11 = scalar_lea.vmem %s26_s10, 2880  ;;  %p5684_p1 = scmp.lt.s32.totalorder %s26_s10, %s26_s10 }
   0x4   :  { %p5680_p0 = scmp.ne.s32.totalorder %s26_s10, %s5679_s11  ;;  %p5685_p2 = scmp.lt.s32.totalorder %s5679_s11, %s5679_s11 }
   0x6   :  { %p5686_p3 = por %p5685_p2, %p5684_p1 }
   0x8   :  { %p5687_p4 = pnand %p5686_p3, %p5680_p0 }
   0xa   :  { %5690 = shalt.err (!%p5687_p4)
}
   0xb   :  { %s5716_s12 = smov 576   ;;  %s5717_s13 = smov 36  }
   0xc   :  { %31 = dma.hbm_to_vmem [thread:$0]  %s6638_s2, 2880, %s26_s10, [#allocation3], %s5716_s12, %s5716_s12, %s5717_s13  }
   0xd   :  { %s5718_s16 = smov [#allocation4]  }
   0xe   :  { %s45_s17 = sshll.u32 %s5718_s16, 4  ;;  %s46_s17 = int_to_ptr.vmem [resolvable:$true] %s45_s17 }
   0xf   :  { %s5699_s18 = scalar_lea.vmem %s46_s17, 16384  ;;  %p5704_p6 = scmp.lt.s32.totalorder %s46_s17, %s46_s17 }
  0x10   :  { %p5700_p5 = scmp.ne.s32.totalorder %s46_s17, %s5699_s18  ;;  %p5705_p7 = scmp.lt.s32.totalorder %s5699_s18, %s5699_s18 }
  0x12   :  { %p5706_p8 = por %p5705_p7, %p5704_p6 }
  0x14   :  { %p5707_p9 = pnand %p5706_p8, %p5700_p5 }
  0x16   :  { %5710 = shalt.err (!%p5707_p9)
}
  0x17   :  { %s5719_s19 = smov 64   ;;  %s5720_s20 = smov 4  }
  0x18   :  { %51 = dma.hbm_to_vmem [thread:$0]  %s6643_s7, 16384, %s46_s17, [#allocation5], %s5719_s19, %s5719_s19, %s5720_s20  }
  0x19   :  { %5711 = dma.done.wait [#allocation3], 2880  }
  0x1a   :  { %5712 = vsyncadd [#allocation3], 4294964416 }
  0x1b   :  { %5713 = dma.done.wait [#allocation5], 16384  }
  0x1c   :  { %5714 = vsyncadd [#allocation5], 4294950912  ;;  %v5721_v0 = vmov 0   ;;  %v62_v1 = vld [vmem:[%s6636_s0] sm:$0xff]  ;;  %v63_v3 = vld [vmem:[%s6636_s0 + $0x8] sm:$0xff]  ;;  %vm349_vm0 = vcmask 1040384  }
  0x1d   :  { %411 = vmatprep.mubr.bf16.mxu0 %v5721_v0  ;;  %464 = vmatprep.mubr.bf16.mxu1 %v5721_v0  ;;  %v72_v2 = vld [vmem:[%s6637_s1] sm:$0xff]  ;;  %v73_v5 = vld [vmem:[%s6637_s1 + $0x8] sm:$0xff]  ;;  %v68_v8 = vld [vmem:[%s6636_s0 + $0x30] sm:$0xff]  ;;  %v5808_v15 = vsel %vm349_vm0, 65535, %v5721_v0  ;;  %vm342_vm1 = vcmask 269312   ;;  %vm794_vm2 = vcmask 130048  }
  0x1e   :  { %v77_v4 = vadd.f32 %v72_v2, %v62_v1  ;;  %v67_v6 = vld [vmem:[%s6636_s0 + $0x28] sm:$0xff]  ;;  %v78_v9 = vadd.f32 %v73_v5, %v63_v3  ;;  %v64_v10 = vld [vmem:[%s6636_s0 + $0x10] sm:$0xff]  ;;  %v83_v12 = vadd.f32 %v73_v5, %v68_v8  ;;  %v69_v13 = vld [vmem:[%s6636_s0 + $0x38] sm:$0xff]  ;;  %vm4585_vm3 = vcmask 122880  }
  0x1f   :  { %v82_v7 = vadd.f32 %v72_v2, %v67_v6  ;;  %v74_v11 = vld [vmem:[%s6637_s1 + $0x10] sm:$0xff]  ;;  %v174_v16 = vld [vmem:[#allocation2 + $0x98] sm:$0x11]  ;;  %v70_v25 = vld [vmem:[%s6636_s0 + $0x40] sm:$0xff] }
  0x20   :  { %87 = vxpose.xlu0.b32.start [1/5] (short) (narrow) %v77_v4, 16  ;;  %v173_v14 = vld [vmem:[#allocation2 + $0x90] sm:$0x11]  ;;  %v65_v17 = vld [vmem:[%s6636_s0 + $0x18] sm:$0xff]  ;;  %v4653_v19 = vcombine.high %v174_v16, %v174_v16  ;;  %v4652_v21 = vcombine.low %v174_v16, %v174_v16  ;;  %v79_v22 = vadd.f32 %v74_v11, %v64_v10  ;;  %v84_v24 = vadd.f32 %v74_v11, %v69_v13  ;;  %v66_v32 = vld [vmem:[%s6636_s0 + $0x20] sm:$0x1] }
  0x21   :  { %119 = vxpose.xlu1.b32.start [1/5] (short) (narrow) %v82_v7, 16  ;;  %v4651_v18 = vcombine.high %v173_v14, %v173_v14  ;;  %v4650_v20 = vcombine.low %v173_v14, %v173_v14  ;;  %v75_v23 = vld [vmem:[%s6637_s1 + $0x18] sm:$0xff]  ;;  %v5407_v30 = vld [vmem:[#allocation2 + $0x4c] ss:$36 sps:$4 sm:$0xff]   ;;  %v76_v33 = vld [vmem:[%s6637_s1 + $0x20] sm:$0x1]  ;;  %v182_v10 = vlaneseq }
  0x22   :  { %v362_v27 = vand.u32 %v4653_v19, %v5808_v15  ;;  %v359_v29 = vand.u32 %v4652_v21, %v5808_v15  ;;  %v5409_v31 = vld [vmem:[#allocation2 + $0x54] ss:$36 sps:$4 sm:$0xff]   ;;  %v5411_v34 = vld [vmem:[#allocation2 + $0x48] ss:$36 sps:$4 sm:$0xff]   ;;  %v80_v35 = vadd.f32 %v75_v23, %v65_v17  ;;  %v175_v37 = vld [vmem:[#allocation2 + $0xa0] sm:$0x11]  ;;  %v85_v39 = vadd.f32 %v75_v23, %v70_v25 }
  0x23   :  { %v356_v26 = vand.u32 %v4651_v18, %v5808_v15  ;;  %v353_v28 = vand.u32 %v4650_v20, %v5808_v15  ;;  %v71_v36 = vld [vmem:[%s6636_s0 + $0x48] sm:$0x1]  ;;  %v5412_v40 = vld [vmem:[#allocation2 + $0x50] ss:$36 sps:$4 sm:$0xff]   ;;  %v4655_v43 = vcombine.high %v175_v37, %v175_v37  ;;  %v81_v45 = vadd.f32 %v76_v33, %v66_v32  ;;  %v5417_v46 = vld [vmem:[#allocation2] ss:$36 sps:$4 sm:$0xff]  }
  0x24   :  { %88 = vxpose.xlu0.b32.cont [2/5] (short) (narrow) %v78_v9, 16  ;;  %442 = vmatprep.subr.bf16.mxu1 %v362_v27  ;;  %v176_v38 = vld [vmem:[#allocation2 + $0xa8] sm:$0x11]  ;;  %v86_v47 = vadd.f32 %v76_v33, %v71_v36  ;;  %v4654_v52 = vcombine.low %v175_v37, %v175_v37  ;;  %v5425_v59 = vld [vmem:[#allocation2 + $0x5c] ss:$36 sps:$4 sm:$0xff]   ;;  %v5865_v11 = vshrl.u32 %v182_v10, 7 }
  0x25   :  { %120 = vxpose.xlu1.b32.cont [2/5] (short) (narrow) %v83_v12, 16  ;;  %389 = vmatprep.subr.bf16.mxu0 %v356_v26  ;;  %v5413_v41 = vld [vmem:[#allocation2 + $0x4] ss:$36 sps:$4 sm:$0xff]   ;;  %v5415_v42 = vld [vmem:[#allocation2 + $0xc] ss:$36 sps:$4 sm:$0xff]   ;;  %v4657_v44 = vcombine.high %v176_v38, %v176_v38  ;;  %v368_v49 = vand.u32 %v4655_v43, %v5808_v15  ;;  %v4656_v53 = vcombine.low %v176_v38, %v176_v38 }
  0x26   :  { %390 = vmatpush1.bf16.msra.mxu0 %v353_v28  ;;  %443 = vmatpush1.bf16.msra.mxu1 %v359_v29  ;;  %v5418_v48 = vld [vmem:[#allocation2 + $0x8] ss:$36 sps:$4 sm:$0xff]   ;;  %v365_v56 = vand.u32 %v4654_v52, %v5808_v15  ;;  %v5423_v61 = vld [vmem:[#allocation2 + $0x58] ss:$36 sps:$4 sm:$0xff]   ;;  %v5426_v62 = vld [vmem:[#allocation2 + $0x60] ss:$36 sps:$4 sm:$0xff]  }
  0x27   :  { %391 = vmatprep.subr.bf16.mxu0 %v5407_v30  ;;  %444 = vmatprep.subr.bf16.mxu1 %v5409_v31  ;;  %v374_v50 = vand.u32 %v4657_v44, %v5808_v15  ;;  %v371_v57 = vand.u32 %v4656_v53, %v5808_v15  ;;  %v5428_v60 = vld [vmem:[#allocation2 + $0x64] ss:$36 sps:$4 sm:$0xff]   ;;  %v5431_v63 = vld [vmem:[#allocation2 + $0x14] ss:$36 sps:$4 sm:$0xff]   ;;  %v5434_v1 = vld [vmem:[#allocation2 + $0x1c] ss:$36 sps:$4 sm:$0xff]  }
  0x28   :  { %89 = vxpose.xlu0.b32.cont [3/5] (short) (narrow) %v79_v22, 16  ;;  %v5435_v3 = vld [vmem:[#allocation2 + $0xb0] ss:$0 sps:$4 sm:$0x11]   ;;  %v5432_v5 = vld [vmem:[#allocation2 + $0x18] ss:$36 sps:$4 sm:$0xff]  }
  0x29   :  { %121 = vxpose.xlu1.b32.cont [3/5] (short) (narrow) %v84_v24, 16  ;;  %v5429_v4 = vld [vmem:[#allocation2 + $0x10] ss:$36 sps:$4 sm:$0xff]   ;;  %v377_v7 = vand.u32 %v5435_v3, %v5808_v15  ;;  %v5436_v8 = vld [vmem:[#allocation2 + $0x68] ss:$36 sps:$4 sm:$0xff]   ;;  %v5868_v12 = vsub.s32 0, %v5865_v11 }
  0x2a   :  { %392 = vmatpush1.bf16.msra.mxu0 %v5411_v34  ;;  %445 = vmatpush1.bf16.msra.mxu1 %v5412_v40  ;;  %v5437_v9 = vld [vmem:[#allocation2 + $0x20] ss:$36 sps:$4 sm:$0xff]   ;;  %v5881_v19 = vsub.s32 1, %v5865_v11  ;;  %v5886_v22 = vsub.s32 2, %v5865_v11  ;;  %v5889_v23 = vsub.s32 3, %v5865_v11  ;;  %v5905_v37 = vsub.s32 6, %v5865_v11 }
  0x2b   :  { %393 = vmatprep.subr.bf16.mxu0 %v5413_v41  ;;  %446 = vmatprep.subr.bf16.mxu1 %v5415_v42  ;;  %v5873_v13 = vld [vmem:[%s6639_s3] sm:$0xff]  ;;  %v5911_v41 = vsub.s32 7, %v5865_v11 }
  0x2c   :  { %90 = vxpose.xlu0.b32.cont [4/5] (short) (narrow) %v80_v35, 16  ;;  %v5877_v14 = vrot.slane %v5873_v13, %v5868_v12  ;;  %6653 = vst [vmem:[#allocation8_spill] sm:$0xff] %v5889_v23  ;;  %v189_v26 = vrot.slane %v5873_v13, %v5881_v19  ;;  %v193_v29 = vrot.slane %v5873_v13, %v5886_v22 }
  0x2d   :  { %122 = vxpose.xlu1.b32.cont [4/5] (short) (narrow) %v85_v39, 16  ;;  %v5899_v31 = vrot.slane %v5873_v13, %v5889_v23  ;;  %v5926_v53 = vrot.slane %v5873_v13, %v5911_v41 }
  0x2e   :  { %394 = vmatpush1.bf16.msra.mxu0 %v5417_v46  ;;  %447 = vmatpush1.bf16.msra.mxu1 %v5418_v48  ;;  %v5918_v48 = vsub.s32 4, %v5865_v11 }
  0x2f   :  { %495 = vmatprep.subr.bf16.mxu0 %v368_v49  ;;  %548 = vmatprep.subr.bf16.mxu1 %v374_v50 }
  0x30   :  { %91 = vxpose.xlu0.b32.end [5/5] (short) (narrow) %v81_v45, 16  ;;  %v5915_v45 = vrot.slane %v5873_v13, %v5905_v37  ;;  %6654 = vst [vmem:[#allocation9_spill] sm:$0xff] %v5918_v48 }
  0x31   :  { %123 = vxpose.xlu1.b32.end [5/5] (short) (narrow) %v86_v47, 16 }
  0x9c   :  { %v5834_v51 = vpop.trf.xlu0 }
  0x9d   :  { %v5838_v55 = vpop.trf.xlu1 }
  0xa0   :  { %v5836_v54 = vpop.trf.xlu0 }
  0xa1   :  { %v151_v58 = vpack.c.bf16 %v5836_v54, %v5834_v51  ;;  %v5848_v2 = vpop.trf.xlu1 }
  0xa2   :  { %v152_v6 = vpack.c.bf16 %v5848_v2, %v5838_v55 }
  0xa3   :  { %4659 = vmatmul.mubr.msk.bf16.vlgmr.msra.gmra.mxu0 %vm342_vm1, %v151_v58  ;;  %4661 = vmatmul.mubr.msk.bf16.vlgmr.msra.gmra.mxu1 %vm342_vm1, %v151_v58 }
  0xa4   :  { %496 = vmatpush1.bf16.msra.mxu0 %v365_v56  ;;  %549 = vmatpush1.bf16.msra.mxu1 %v371_v57 }
  0xa5   :  { %421 = vmatprep.mubr.bf16.mxu0 %v5721_v0  ;;  %474 = vmatprep.mubr.bf16.mxu1 %v5721_v0 }
  0xa6   :  { %497 = vmatprep.subr.bf16.mxu0 %v5425_v59  ;;  %550 = vmatprep.subr.bf16.mxu1 %v5428_v60 }
  0xa8   :  { %498 = vmatpush1.bf16.msra.mxu0 %v5423_v61  ;;  %551 = vmatpush1.bf16.msra.mxu1 %v5426_v62 }
  0xa9   :  { %499 = vmatprep.subr.bf16.mxu0 %v5431_v63  ;;  %552 = vmatprep.subr.bf16.mxu1 %v5434_v1  ;;  %v201_v1 = vrot.slane %v5873_v13, %v5918_v48 }
  0xab   :  { %4660 = vmatmul.mubr.msk.bf16.gmra.mxu0 %vm342_vm1, %v152_v6  ;;  %4662 = vmatmul.mubr.msk.bf16.gmra.mxu1 %vm342_vm1, %v152_v6 }
  0xac   :  { %500 = vmatpush1.bf16.msra.mxu0 %v5429_v4  ;;  %553 = vmatpush1.bf16.msra.mxu1 %v5432_v5 }
  0xad   :  { %517 = vmatprep.mubr.bf16.mxu0 %v5721_v0  ;;  %570 = vmatprep.mubr.bf16.mxu1 %v5721_v0 }
  0xae   :  { %5241 = vmatprep.subr.bf16.mxu0 %v377_v7 }
  0xb3   :  { %4663 = vmatmul.mubr.msk.bf16.vlgmr.msra.gmra.mxu0 %vm342_vm1, %v151_v58  ;;  %4665 = vmatmul.mubr.msk.bf16.vlgmr.msra.gmra.mxu1 %vm342_vm1, %v151_v58 }
  0xb4   :  { %5242 = vmatpush3.bf16.msra.mxu0 %v377_v7  ;;  %527 = vmatprep.mubr.bf16.mxu0 %v5721_v0 }
  0xb5   :  { %580 = vmatprep.mubr.bf16.mxu1 %v5721_v0  ;;  %5243 = vmatprep.subr.bf16.mxu0 %v5436_v8 }
  0xb8   :  { %5244 = vmatpush3.bf16.msra.mxu0 %v5436_v8 }
  0xb9   :  { %5245 = vmatprep.subr.bf16.mxu0 %v5437_v9 }
  0xbb   :  { %4664 = vmatmul.mubr.msk.bf16.gmra.mxu0 %vm342_vm1, %v152_v6  ;;  %4666 = vmatmul.mubr.msk.bf16.gmra.mxu1 %vm342_vm1, %v152_v6 }
  0xbc   :  { %5247 = vmatprep.mubr.msk.bf16.mxu0 %vm342_vm1, %v151_v58  ;;  %5246 = vmatpush3.bf16.msra.mxu0 %v5437_v9 }
  0xc3   :  { %5248 = vmatmul.mubr.msk.bf16.vlgmr.msra.gmra.mxu0 %vm342_vm1, %v152_v6  ;;  %v5939_v6 = vsub.s32 5, %v5865_v11 }
  0xc5   :  { %6655 = vst [vmem:[#allocation10_spill] sm:$0xff] %v5939_v6 }
 0x163   :  { %v413_v16 = vpop.f32.mrf.mxu0  ;;  %v466_v17 = vpop.f32.mrf.mxu1 }
 0x164   :  { %v414_v18 = vadd.f32 %v413_v16, %v5877_v14  ;;  %v467_v58 = vadd.f32 %v466_v17, %v193_v29 }
 0x165   :  { %v415_v20 = vpop.f32.mrf.mxu0  ;;  %v5883_v21 = vpop.f32.mrf.mxu1 }
 0x166   :  { %5255 = vmatprep.mubr.f32.mxu1 %v414_v18  ;;  %v416_v34 = vadd.f32 %v415_v20, %v189_v26  ;;  %v469_v17 = vadd.f32 %v5883_v21, %v5899_v31 }
 0x167   :  { %v417_v24 = vpop.f32.mrf.mxu0  ;;  %v470_v25 = vpop.f32.mrf.mxu1 }
 0x168   :  { %v471_v44 = vadd.f32 %v470_v25, %v193_v29  ;;  %v418_v49 = vadd.f32 %v417_v24, %v5877_v14  ;;  %v205_v24 = vrot.slane %v5873_v13, %v5939_v6 }
 0x169   :  { %v419_v27 = vpop.f32.mrf.mxu0  ;;  %v5893_v28 = vpop.f32.mrf.mxu1 }
 0x16a   :  { %v420_v30 = vadd.f32 %v419_v27, %v189_v26  ;;  %v473_v13 = vadd.f32 %v5893_v28, %v5899_v31 }
 0x16b   :  { %v423_v32 = vpop.f32.mrf.mxu0  ;;  %v476_v33 = vpop.f32.mrf.mxu1 }
 0x16c   :  { %v424_v35 = vadd.f32 %v423_v32, %v5877_v14  ;;  %v5902_v36 = vadd.f32 %v476_v33, %v193_v29  ;;  %5251 = vmatprep.subr.mxu1 %v420_v30 }
 0x16d   :  { %v425_v38 = vpop.f32.mrf.mxu0  ;;  %v478_v39 = vpop.f32.mrf.mxu1  ;;  %5252 = vmatpush3.xpose.msra.mxu1 %v420_v30 }
 0x16e   :  { %v5908_v40 = vadd.f32 %v478_v39, %v5899_v31  ;;  %5253 = vmatprep.subr.mxu1 %v416_v34  ;;  %5262 = vmatprep.mubr.f32.mxu0 %v424_v35  ;;  %v426_v59 = vadd.f32 %v425_v38, %v189_v26  ;;  %v5972_v39 = vld [vmem:[%s6639_s3 + $0x8] ss:$0 sm:$0xff] }
 0x16f   :  { %v427_v42 = vpop.f32.mrf.mxu0  ;;  %v480_v43 = vpop.f32.mrf.mxu1 }
 0x170   :  { %v5931_v63 = vadd.f32 %v480_v43, %v193_v29  ;;  %v428_v16 = vadd.f32 %v427_v42, %v5877_v14 }
 0x171   :  { %v429_v46 = vpop.f32.mrf.mxu0  ;;  %v482_v47 = vpop.f32.mrf.mxu1  ;;  %5254 = vmatpush3.xpose.msra.mxu1 %v416_v34 }
 0x172   :  { %v430_v50 = vadd.f32 %v429_v46, %v189_v26  ;;  %v5922_v52 = vadd.f32 %v482_v47, %v5899_v31  ;;  %5265 = vmatprep.subr.mxu1 %v471_v44 }
 0x173   :  { %v519_v56 = vpop.f32.mrf.mxu0  ;;  %v572_v57 = vpop.f32.mrf.mxu1 }
 0x174   :  { %v5929_v60 = vadd.f32 %v572_v57, %v5915_v45  ;;  %5256 = vmatmul.mubr.f32.vlgmr.msra.gmra.mxu1 %v418_v49  ;;  %5258 = vmatprep.subr.mxu0 %v430_v50  ;;  %v520_v11 = vadd.f32 %v519_v56, %v201_v1 }
 0x175   :  { %v521_v61 = vpop.f32.mrf.mxu0  ;;  %v574_v62 = vpop.f32.mrf.mxu1  ;;  %5259 = vmatpush3.xpose.msra.mxu0 %v430_v50  ;;  %5266 = vmatpush3.msra.mxu1 %v471_v44 }
 0x176   :  { %v5936_v3 = vadd.f32 %v574_v62, %v5926_v53  ;;  %5260 = vmatprep.subr.mxu0 %v426_v59  ;;  %5267 = vmatprep.subr.mxu1 %v467_v58  ;;  %v522_v38 = vadd.f32 %v521_v61, %v205_v24 }
 0x177   :  { %v523_v4 = vpop.f32.mrf.mxu0  ;;  %v576_v5 = vpop.f32.mrf.mxu1  ;;  %5268 = vmatpush3.msra.mxu1 %v467_v58 }
 0x178   :  { %v524_v7 = vadd.f32 %v523_v4, %v201_v1  ;;  %v5942_v8 = vadd.f32 %v576_v5, %v5915_v45  ;;  %5272 = vmatprep.subr.mxu1 %v5931_v63 }
 0x179   :  { %v525_v9 = vpop.f32.mrf.mxu0  ;;  %v5945_v10 = vpop.f32.mrf.mxu1  ;;  %5261 = vmatpush3.xpose.msra.mxu0 %v426_v59 }
 0x17a   :  { %5279 = vmatprep.subr.mxu0 %v524_v7  ;;  %v526_v30 = vadd.f32 %v525_v9, %v205_v24 }
 0x17b   :  { %v529_v18 = vpop.f32.mrf.mxu0  ;;  %v5950_v20 = vpop.f32.mrf.mxu1 }
 0x17c   :  { %v5954_v25 = vadd.f32 %v529_v18, %v201_v1  ;;  %5263 = vmatmul.mubr.f32.vlgmr.msra.gmra.mxu0 %v428_v16 }
 0x17d   :  { %v531_v26 = vpop.f32.mrf.mxu0  ;;  %v584_v27 = vpop.f32.mrf.mxu1  ;;  %5280 = vmatpush3.xpose.msra.mxu0 %v524_v7  ;;  %5283 = vmatprep.mubr.f32.mxu0 %v469_v17 }
 0x17e   :  { %v5956_v29 = vadd.f32 %v531_v26, %v205_v24  ;;  %v5959_v14 = vadd.f32 %v584_v27, %v5926_v53  ;;  %5281 = vmatprep.subr.mxu0 %v520_v11 }
 0x17f   :  { %v533_v21 = vpop.f32.mrf.mxu0  ;;  %v5977_v28 = vpop.f32.mrf.mxu1 }
 0x180   :  { %v5961_v32 = vadd.f32 %v533_v21, %v201_v1 }
 0x181   :  { %v535_v33 = vpop.f32.mrf.mxu0  ;;  %5282 = vmatpush3.xpose.msra.mxu0 %v520_v11  ;;  %v5979_v31 = vpop.f32.mrf.mxu1 }
 0x182   :  { %v5965_v34 = vadd.f32 %v535_v33, %v205_v24  ;;  %5293 = vmatprep.subr.mxu0 %v526_v30 }
 0x183   :  { %v5967_v35 = vpop.f32.mrf.mxu0 }
 0x184   :  { %5284 = vmatmul.mubr.f32.vlgmr.msra.gmra.mxu0 %v473_v13 }
 0x185   :  { %v625_v42 = vpop.f32.mrf.mxu0  ;;  %5294 = vmatpush3.msra.mxu0 %v526_v30 }
 0x186   :  { %v5975_v43 = vadd.f32 %v5972_v39, %v625_v42  ;;  %5295 = vmatprep.subr.mxu0 %v522_v38 }
 0x187   :  { %5296 = vmatpush3.msra.mxu0 %v522_v38  ;;  %v5981_v47 = vpop.f32.mrf.mxu0 }
 0x189   :  { %v5985_v58 = vpop.f32.mrf.mxu0 }
 0x234   :  { %v5257_v44 = vpop.f32.mrf.mxu1 }
 0x235   :  { %v791_v46 = vmul.f32 0.30151135, %v5257_v44 }
 0x236   :  { %v706_v49 = vpop.f32.mrf.mxu1 }
 0x237   :  { %v790_v50 = vmul.f32 0.30151135, %v706_v49  ;;  %v798_v56 = vsel %vm794_vm2, %v791_v46, -inf }
 0x238   :  { %799 = vmax.xlane.f32.xlu1 %v798_v56 }
 0x239   :  { %v795_v57 = vsel %vm794_vm2, %v790_v50, -inf }
 0x23a   :  { %796 = vmax.xlane.f32.xlu0 %v795_v57 }
 0x23c   :  { %v5264_v59 = vpop.f32.mrf.mxu0 }
 0x23d   :  { %v793_v1 = vmul.f32 0.30151135, %v5264_v59 }
 0x23e   :  { %v781_v61 = vpop.f32.mrf.mxu0 }
 0x23f   :  { %v792_v62 = vmul.f32 0.30151135, %v781_v61  ;;  %v804_v5 = vsel %vm794_vm2, %v793_v1, -inf }
 0x241   :  { %v801_v4 = vsel %vm794_vm2, %v792_v62, -inf }
 0x242   :  { %802 = vmax.xlane.f32.xlu1 %v801_v4 }
 0x246   :  { %805 = vmax.xlane.f32.xlu1 %v804_v5 }
 0x2c1   :  { %v800_v7 = vpop.xlane.xlu1 %799 }
 0x2c2   :  { %v808_v9 = vsub.f32 %v791_v46, %v800_v7  ;;  %v5285_v46 = vpop.f32.mrf.mxu0 }
 0x2c3   :  { %v797_v16 = vpop.xlane.xlu0 %796  ;;  %v1170_v61 = vmul.f32 0.30151135, %v5285_v46 }
 0x2c4   :  { %v813_v17 = vmul.f32 1.442695, %v808_v9  ;;  %v807_v18 = vsub.f32 %v790_v50, %v797_v16  ;;  %v1085_v49 = vpop.f32.mrf.mxu0 }
 0x2c5   :  { %v1169_v56 = vmul.f32 0.30151135, %v1085_v49  ;;  %v1176_v4 = vsel %vm794_vm2, %v1170_v61, -inf }
 0x2c6   :  { %5606 = vpow2.f32 %v813_v17  ;;  %v811_v11 = vmul.f32 1.442695, %v807_v18 }
 0x2c8   :  { %5608 = vpow2.f32 %v811_v11 }
 0x2cb   :  { %v803_v24 = vpop.xlane.xlu1 %802 }
 0x2cc   :  { %v809_v26 = vsub.f32 %v792_v62, %v803_v24 }
 0x2ce   :  { %v815_v27 = vmul.f32 1.442695, %v809_v26 }
 0x2cf   :  { %v806_v21 = vpop.xlane.xlu1 %805 }
 0x2d0   :  { %5610 = vpow2.f32 %v815_v27  ;;  %v810_v30 = vsub.f32 %v793_v1, %v806_v21  ;;  %v1173_v1 = vsel %vm794_vm2, %v1169_v56, -inf }
 0x2d2   :  { %v817_v33 = vmul.f32 1.442695, %v810_v30 }
 0x2d3   :  { %v5607_v13 = vpop.eup %5606 }
 0x2d4   :  { %5612 = vpow2.f32 %v817_v33  ;;  %v822_v38 = vsel %vm794_vm2, %v5607_v13, 0.0 }
 0x2d5   :  { %v5609_v42 = vpop.eup %5608  ;;  %823 = vadd.xlane.f32.xlu1 %v822_v38 }
 0x2d6   :  { %v819_v44 = vsel %vm794_vm2, %v5609_v42, 0.0 }
 0x2d7   :  { %820 = vadd.xlane.f32.xlu0 %v819_v44 }
 0x2dd   :  { %v5611_v50 = vpop.eup %5610 }
 0x2de   :  { %v825_v57 = vsel %vm794_vm2, %v5611_v50, 0.0 }
 0x2df   :  { %826 = vadd.xlane.f32.xlu0 %v825_v57 }
 0x2e1   :  { %v5613_v59 = vpop.eup %5612 }
 0x2e2   :  { %v828_v62 = vsel %vm794_vm2, %v5613_v59, 0.0 }
 0x2e3   :  { %829 = vadd.xlane.f32.xlu1 %v828_v62  ;;  %1174 = vmax.xlane.f32.xlu0 %v1173_v1 }
 0x2e7   :  { %1177 = vmax.xlane.f32.xlu1 %v1176_v4  ;;  %v5438_v4 = vld [vmem:[%s6640_s4 + $0x78] sm:$0xff]  }
 0x2e8   :  { %5307 = vmatprep.subr.bf16.mxu0 %v5438_v4 }
 0x35e   :  { %v824_v5 = vpop.xlane.xlu1 %823 }
 0x35f   :  { %5614 = vrcp.f32 %v824_v5 }
 0x360   :  { %v821_v7 = vpop.xlane.xlu0 %820 }
 0x361   :  { %5616 = vrcp.f32 %v821_v7 }
 0x368   :  { %v827_v9 = vpop.xlane.xlu0 %826 }
 0x369   :  { %5618 = vrcp.f32 %v827_v9 }
 0x36c   :  { %v830_v16 = vpop.xlane.xlu1 %829  ;;  %v5615_v17 = vpop.eup %5614 }
 0x36d   :  { %5620 = vrcp.f32 %v830_v16  ;;  %v836_v24 = vmul.f32 %v5615_v17, %v5607_v13 }
 0x36e   :  { %v5617_v18 = vpop.eup %5616 }
 0x36f   :  { %v835_v11 = vmul.f32 %v5617_v18, %v5609_v42 }
 0x371   :  { %5269 = vmatprep.mubr.msk.f32.mxu1 %vm794_vm2, %v835_v11 }
 0x372   :  { %5270 = vmatmul.mubr.msk.f32.vlgmr.msra.gmra.mxu1 %vm794_vm2, %v836_v24 }
 0x373   :  { %5273 = vmatpush3.msra.mxu1 %v5931_v63 }
 0x374   :  { %5274 = vmatprep.subr.mxu1 %v5902_v36 }
 0x375   :  { %5275 = vmatpush3.msra.mxu1 %v5902_v36  ;;  %v1178_v36 = vpop.xlane.xlu1 %1177 }
 0x376   :  { %v5619_v26 = vpop.eup %5618  ;;  %5286 = vmatprep.subr.mxu1 %v5961_v32  ;;  %v1186_v33 = vsub.f32 %v1170_v61, %v1178_v36 }
 0x377   :  { %v837_v27 = vmul.f32 %v5619_v26, %v5611_v50 }
 0x378   :  { %v1191_v38 = vmul.f32 1.442695, %v1186_v33 }
 0x379   :  { %5276 = vmatprep.mubr.msk.f32.mxu1 %vm794_vm2, %v837_v27 }
 0x37a   :  { %v5621_v21 = vpop.eup %5620  ;;  %5622 = vpow2.f32 %v1191_v38  ;;  %v5439_v38 = vld [vmem:[%s6640_s4 + $0x70] sm:$0xff]  }
 0x37b   :  { %v838_v30 = vmul.f32 %v5621_v21, %v5613_v59 }
 0x37d   :  { %5277 = vmatmul.mubr.msk.f32.vlgmr.msra.gmra.mxu1 %vm794_vm2, %v838_v30 }
 0x37e   :  { %5287 = vmatpush3.xpose.msra.mxu1 %v5961_v32  ;;  %5290 = vmatprep.mubr.f32.mxu1 %v5908_v40  ;;  %v1175_v32 = vpop.xlane.xlu0 %1174 }
 0x37f   :  { %5288 = vmatprep.subr.mxu1 %v5954_v25  ;;  %v1185_v13 = vsub.f32 %v1169_v56, %v1175_v32 }
 0x381   :  { %v1189_v42 = vmul.f32 1.442695, %v1185_v13 }
 0x382   :  { %5289 = vmatpush3.xpose.msra.mxu1 %v5954_v25 }
 0x383   :  { %5300 = vmatprep.subr.mxu1 %v5965_v34  ;;  %5624 = vpow2.f32 %v1189_v42  ;;  %v5440_v42 = vld [vmem:[%s6640_s4 + $0x68] sm:$0xff]  }
 0x385   :  { %5291 = vmatmul.mubr.f32.vlgmr.msra.gmra.mxu1 %v5922_v52 }
 0x386   :  { %5301 = vmatpush3.msra.mxu1 %v5965_v34 }
 0x387   :  { %5302 = vmatprep.subr.mxu1 %v5956_v29  ;;  %v5623_v59 = vpop.eup %5622 }
 0x388   :  { %5303 = vmatpush3.msra.mxu1 %v5956_v29  ;;  %v1200_v62 = vsel %vm794_vm2, %v5623_v59, 0.0 }
 0x390   :  { %v5625_v61 = vpop.eup %5624 }
 0x391   :  { %v1197_v1 = vsel %vm794_vm2, %v5625_v61, 0.0 }
 0x432   :  { %v6012_v63 = vpop.f32.mrf.mxu1 }
 0x434   :  { %v6014_v40 = vpop.f32.mrf.mxu1 }
 0x435   :  { %v1001_v25 = vpack.c.bf16 %v6012_v63, %v6014_v40  ;;  %v5451_v63 = vld [vmem:[%s6640_s4 + $0x10] sm:$0xff]   ;;  %v5452_v40 = vld [vmem:[%s6640_s4 + $0x8] sm:$0xff]  }
 0x43d   :  { %v6018_v52 = vpop.f32.mrf.mxu1 }
 0x43f   :  { %v6020_v34 = vpop.f32.mrf.mxu1 }
 0x440   :  { %v1002_v29 = vpack.c.bf16 %v6018_v52, %v6020_v34 }
 0x445   :  { %v5292_v44 = vpop.f32.mrf.mxu1 }
 0x446   :  { %v1172_v46 = vmul.f32 0.30151135, %v5292_v44  ;;  %v5441_v44 = vld [vmem:[%s6640_s4 + $0x60] sm:$0xff]  }
 0x447   :  { %v1160_v49 = vpop.f32.mrf.mxu1 }
 0x448   :  { %v1171_v50 = vmul.f32 0.30151135, %v1160_v49  ;;  %v1182_v57 = vsel %vm794_vm2, %v1172_v46, -inf  ;;  %v5443_v49 = vld [vmem:[%s6640_s4 + $0x50] sm:$0xff]  }
 0x449   :  { %1183 = vmax.xlane.f32.xlu1 %v1182_v57  ;;  %v5445_v57 = vld [vmem:[%s6640_s4 + $0x40] sm:$0xff]  }
 0x44a   :  { %v1179_v56 = vsel %vm794_vm2, %v1171_v50, -inf }
 0x44b   :  { %1180 = vmax.xlane.f32.xlu0 %v1179_v56  ;;  %v579_v56 = vadd.f32 %v5945_v10, %v5926_v53  ;;  %v5448_v10 = vld [vmem:[%s6640_s4 + $0x28] sm:$0xff]  }
 0x44d   :  { %1201 = vadd.xlane.f32.xlu1 %v1200_v62 }
 0x44f   :  { %1198 = vadd.xlane.f32.xlu0 %v1197_v1 }
 0x4d2   :  { %v1184_v5 = vpop.xlane.xlu1 %1183 }
 0x4d3   :  { %v1188_v7 = vsub.f32 %v1172_v46, %v1184_v5  ;;  %v5442_v46 = vld [vmem:[%s6640_s4 + $0x58] sm:$0xff]  }
 0x4d4   :  { %v1181_v9 = vpop.xlane.xlu0 %1180 }
 0x4d5   :  { %v1195_v16 = vmul.f32 1.442695, %v1188_v7  ;;  %v1187_v17 = vsub.f32 %v1171_v50, %v1181_v9  ;;  %v5444_v50 = vld [vmem:[%s6640_s4 + $0x48] sm:$0xff]   ;;  %v5447_v9 = vld [vmem:[%s6640_s4 + $0x30] sm:$0xff]  }
 0x4d6   :  { %v1202_v18 = vpop.xlane.xlu1 %1201 }
 0x4d7   :  { %5626 = vpow2.f32 %v1195_v16  ;;  %v1193_v11 = vmul.f32 1.442695, %v1187_v17  ;;  %v5449_v16 = vld [vmem:[%s6640_s4 + $0x20] sm:$0xff]   ;;  %v5450_v17 = vld [vmem:[%s6640_s4 + $0x18] sm:$0xff]  }
 0x4d8   :  { %5628 = vrcp.f32 %v1202_v18  ;;  %v1199_v24 = vpop.xlane.xlu0 %1198  ;;  %v589_v18 = vadd.f32 %v5979_v31, %v5926_v53  ;;  %v587_v53 = vadd.f32 %v5977_v28, %v5915_v45 }
 0x4d9   :  { %5630 = vpow2.f32 %v1193_v11  ;;  %v583_v11 = vadd.f32 %v5950_v20, %v5915_v45  ;;  %v634_v20 = vadd.f32 %v5967_v35, %v5972_v39  ;;  %v629_v45 = vadd.f32 %v5972_v39, %v5985_v58 }
 0x4da   :  { %5632 = vrcp.f32 %v1199_v24  ;;  %v637_v24 = vadd.f32 %v5981_v47, %v5972_v39 }
 0x4e4   :  { %v5627_v26 = vpop.eup %5626 }
 0x4e5   :  { %v5629_v27 = vpop.eup %5628  ;;  %v1206_v21 = vsel %vm794_vm2, %v5627_v26, 0.0 }
 0x4e6   :  { %v5631_v30 = vpop.eup %5630  ;;  %1207 = vadd.xlane.f32.xlu1 %v1206_v21  ;;  %v1214_v13 = vmul.f32 %v5629_v27, %v5623_v59  ;;  %v5446_v59 = vld [vmem:[%s6640_s4 + $0x38] sm:$0xff]  }
 0x4e7   :  { %v5633_v36 = vpop.eup %5632  ;;  %v1203_v32 = vsel %vm794_vm2, %v5631_v30, 0.0  ;;  %5327 = vmatprep.subr.bf16.mxu1 %v5446_v59 }
 0x4e8   :  { %1204 = vadd.xlane.f32.xlu0 %v1203_v32  ;;  %v1213_v33 = vmul.f32 %v5633_v36, %v5625_v61 }
 0x4ea   :  { %5297 = vmatprep.mubr.msk.f32.mxu0 %vm794_vm2, %v1213_v33 }
 0x4eb   :  { %5298 = vmatmul.mubr.msk.f32.vlgmr.msra.gmra.mxu0 %vm794_vm2, %v1214_v13 }
 0x4ec   :  { %5308 = vmatpush3.bf16.msra.mxu0 %v5438_v4 }
 0x4ed   :  { %5309 = vmatprep.subr.bf16.mxu0 %v5439_v38 }
 0x4f0   :  { %5310 = vmatpush3.bf16.msra.mxu0 %v5439_v38 }
 0x4f1   :  { %5311 = vmatprep.subr.bf16.mxu0 %v5440_v42 }
 0x4f4   :  { %5312 = vmatpush3.bf16.msra.mxu0 %v5440_v42 }
 0x4f5   :  { %5313 = vmatprep.subr.bf16.mxu0 %v5441_v44 }
 0x4f8   :  { %5314 = vmatpush3.bf16.msra.mxu0 %v5441_v44 }
 0x4f9   :  { %5315 = vmatprep.subr.bf16.mxu0 %v5442_v46 }
 0x4fc   :  { %5316 = vmatpush3.bf16.msra.mxu0 %v5442_v46 }
 0x4fd   :  { %5317 = vmatprep.subr.bf16.mxu0 %v5443_v49 }
 0x500   :  { %5318 = vmatpush3.bf16.msra.mxu0 %v5443_v49 }
 0x501   :  { %5319 = vmatprep.subr.bf16.mxu0 %v5444_v50 }
 0x504   :  { %5320 = vmatpush3.bf16.msra.mxu0 %v5444_v50 }
 0x505   :  { %5321 = vmatprep.subr.bf16.mxu0 %v5445_v57 }
 0x508   :  { %5322 = vmatpush3.bf16.msra.mxu0 %v5445_v57 }
 0x509   :  { %5347 = vmatprep.subr.mxu0 %v579_v56 }
 0x56f   :  { %v1208_v61 = vpop.xlane.xlu1 %1207 }
 0x570   :  { %5634 = vrcp.f32 %v1208_v61 }
 0x571   :  { %v1205_v62 = vpop.xlane.xlu0 %1204 }
 0x572   :  { %5636 = vrcp.f32 %v1205_v62 }
 0x57d   :  { %v5635_v1 = vpop.eup %5634 }
 0x57e   :  { %v1216_v7 = vmul.f32 %v5635_v1, %v5627_v26 }
 0x57f   :  { %v5637_v4 = vpop.eup %5636 }
 0x580   :  { %v1215_v5 = vmul.f32 %v5637_v4, %v5631_v30 }
 0x582   :  { %5304 = vmatprep.mubr.msk.f32.mxu1 %vm794_vm2, %v1215_v5 }
 0x583   :  { %5305 = vmatmul.mubr.msk.f32.vlgmr.msra.gmra.mxu1 %vm794_vm2, %v1216_v7 }
 0x584   :  { %5328 = vmatpush3.bf16.msra.mxu1 %v5446_v59  ;;  %5343 = vmatprep.mubr.bf16.mxu1 %v1001_v25  ;;  %v5453_v25 = vld [vmem:[%s6640_s4] sm:$0xff]  }
 0x585   :  { %5329 = vmatprep.subr.bf16.mxu1 %v5447_v9 }
 0x588   :  { %5330 = vmatpush3.bf16.msra.mxu1 %v5447_v9 }
 0x589   :  { %5331 = vmatprep.subr.bf16.mxu1 %v5448_v10 }
 0x58c   :  { %5332 = vmatpush3.bf16.msra.mxu1 %v5448_v10 }
 0x58d   :  { %5333 = vmatprep.subr.bf16.mxu1 %v5449_v16 }
 0x590   :  { %5334 = vmatpush3.bf16.msra.mxu1 %v5449_v16 }
 0x591   :  { %5335 = vmatprep.subr.bf16.mxu1 %v5450_v17 }
 0x594   :  { %5336 = vmatpush3.bf16.msra.mxu1 %v5450_v17 }
 0x595   :  { %5337 = vmatprep.subr.bf16.mxu1 %v5451_v63 }
 0x598   :  { %5338 = vmatpush3.bf16.msra.mxu1 %v5451_v63 }
 0x599   :  { %5339 = vmatprep.subr.bf16.mxu1 %v5452_v40 }
 0x59c   :  { %5340 = vmatpush3.bf16.msra.mxu1 %v5452_v40 }
 0x59d   :  { %5341 = vmatprep.subr.bf16.mxu1 %v5453_v25 }
 0x5a0   :  { %5342 = vmatpush3.bf16.msra.mxu1 %v5453_v25 }
 0x5a1   :  { %5354 = vmatprep.subr.mxu1 %v589_v18 }
 0x5a3   :  { %5344 = vmatmul.mubr.bf16.vlgmr.msra.gmra.mxu1 %v1002_v29 }
 0x5a4   :  { %5355 = vmatpush3.xpose.msra.mxu1 %v589_v18  ;;  %5358 = vmatprep.mubr.f32.mxu1 %v583_v11 }
 0x5a5   :  { %5356 = vmatprep.subr.mxu1 %v5959_v14 }
 0x5a8   :  { %5357 = vmatpush3.xpose.msra.mxu1 %v5959_v14 }
 0x5a9   :  { %5368 = vmatprep.subr.mxu1 %v637_v24 }
 0x5ab   :  { %v5299_v31 = vpop.f32.mrf.mxu0  ;;  %5359 = vmatmul.mubr.f32.vlgmr.msra.gmra.mxu1 %v587_v53 }
 0x5ac   :  { %5369 = vmatpush3.msra.mxu1 %v637_v24  ;;  %v5454_v24 = vld [vmem:[%s6640_s4 + $0xb8] sm:$0xff]  }
 0x5ad   :  { %v1289_v52 = vpop.f32.mrf.mxu0  ;;  %5370 = vmatprep.subr.mxu1 %v634_v20 }
 0x5ae   :  { %v1379_v34 = vpack.c.bf16 %v5299_v31, %v1289_v52  ;;  %5371 = vmatpush3.msra.mxu1 %v634_v20 }
 0x5b0   :  { %5323 = vmatprep.mubr.bf16.mxu0 %v1379_v34 }
 0x643   :  { %v5306_v29 = vpop.f32.mrf.mxu1 }
 0x645   :  { %v1370_v26 = vpop.f32.mrf.mxu1 }
 0x646   :  { %v1380_v47 = vpack.c.bf16 %v5306_v29, %v1370_v26 }
 0x648   :  { %5324 = vmatmul.mubr.bf16.vlgmr.msra.gmra.mxu0 %v1380_v47 }
 0x649   :  { %5348 = vmatpush3.xpose.msra.mxu0 %v579_v56  ;;  %5351 = vmatprep.mubr.f32.mxu0 %v5929_v60 }
 0x64a   :  { %5349 = vmatprep.subr.mxu0 %v5936_v3 }
 0x64d   :  { %5350 = vmatpush3.xpose.msra.mxu0 %v5936_v3 }
 0x64e   :  { %5361 = vmatprep.subr.mxu0 %v629_v45 }
 0x650   :  { %5352 = vmatmul.mubr.f32.vlgmr.msra.gmra.mxu0 %v5942_v8 }
 0x651   :  { %5362 = vmatpush3.msra.mxu0 %v629_v45  ;;  %v5455_v45 = vld [vmem:[%s6640_s4 + $0xb0] sm:$0xff]  }
 0x652   :  { %5363 = vmatprep.subr.mxu0 %v5975_v43 }
 0x653   :  { %5364 = vmatpush3.msra.mxu0 %v5975_v43 }
 0x654   :  { %5375 = vmatprep.subr.bf16.mxu0 %v5454_v24 }
 0x663   :  { %v6110_v14 = vpop.f32.mrf.mxu1 }
 0x665   :  { %v6112_v35 = vpop.f32.mrf.mxu1 }
 0x667   :  { %v6114_v60 = vpop.f32.mrf.mxu1 }
 0x669   :  { %v6118_v27 = vpop.f32.mrf.mxu1 }
 0x66b   :  { %v5360_v8 = vpop.f32.mrf.mxu1 }
 0x66c   :  { %v1745_v32 = vmul.f32 0.30151135, %v5360_v8 }
 0x66d   :  { %v1733_v43 = vpop.f32.mrf.mxu1 }
 0x66e   :  { %v1744_v38 = vmul.f32 0.30151135, %v1733_v43  ;;  %v1755_v44 = vsel %vm794_vm2, %v1745_v32, -inf }
 0x670   :  { %v1752_v46 = vsel %vm794_vm2, %v1744_v38, -inf }
 0x708   :  { %v6116_v28 = vpop.f32.mrf.mxu0 }
 0x70a   :  { %v6120_v39 = vpop.f32.mrf.mxu0 }
 0x70c   :  { %v6122_v3 = vpop.f32.mrf.mxu0 }
 0x70e   :  { %v6124_v58 = vpop.f32.mrf.mxu0 }
 0x710   :  { %v5353_v21 = vpop.f32.mrf.mxu0 }
 0x711   :  { %v1743_v30 = vmul.f32 0.30151135, %v5353_v21 }
 0x712   :  { %v1658_v36 = vpop.f32.mrf.mxu0 }
 0x713   :  { %v1742_v33 = vmul.f32 0.30151135, %v1658_v36  ;;  %v1749_v13 = vsel %vm794_vm2, %v1743_v30, -inf  ;;  %v5456_v36 = vld [vmem:[%s6640_s4 + $0xa8] sm:$0xff]  }
 0x714   :  { %1750 = vmax.xlane.f32.xlu1 %v1749_v13  ;;  %v5459_v13 = vld [vmem:[%s6640_s4 + $0x90] sm:$0xff]  }
 0x715   :  { %v1746_v42 = vsel %vm794_vm2, %v1742_v33, -inf }
 0x716   :  { %1747 = vmax.xlane.f32.xlu0 %v1746_v42  ;;  %v5461_v42 = vld [vmem:[%s6640_s4 + $0x80] sm:$0xff]  }
 0x718   :  { %1756 = vmax.xlane.f32.xlu1 %v1755_v44 }
 0x71a   :  { %1753 = vmax.xlane.f32.xlu0 %v1752_v46 }
 0x79d   :  { %v1751_v49 = vpop.xlane.xlu1 %1750 }
 0x79e   :  { %v1759_v50 = vsub.f32 %v1743_v30, %v1751_v49 }
 0x79f   :  { %v1748_v57 = vpop.xlane.xlu0 %1747 }
 0x7a0   :  { %v1764_v59 = vmul.f32 1.442695, %v1759_v50  ;;  %v1758_v56 = vsub.f32 %v1742_v33, %v1748_v57  ;;  %v5458_v33 = vld [vmem:[%s6640_s4 + $0x98] sm:$0xff]  }
 0x7a1   :  { %v1757_v61 = vpop.xlane.xlu1 %1756 }
 0x7a2   :  { %5638 = vpow2.f32 %v1764_v59  ;;  %v1762_v62 = vmul.f32 1.442695, %v1758_v56  ;;  %v1761_v1 = vsub.f32 %v1745_v32, %v1757_v61  ;;  %v5457_v32 = vld [vmem:[%s6640_s4 + $0xa0] sm:$0xff]   ;;  %v1586_v61 = vadd.f32 %v6110_v14, %v6116_v28 }
 0x7a3   :  { %v1754_v4 = vpop.xlane.xlu0 %1753  ;;  %v6167_v56 = vld [vmem:[%s6644_s8] sm:$0xff] }
 0x7a4   :  { %5640 = vpow2.f32 %v1762_v62  ;;  %v1768_v5 = vmul.f32 1.442695, %v1761_v1  ;;  %v1760_v7 = vsub.f32 %v1744_v38, %v1754_v4  ;;  %v5460_v38 = vld [vmem:[%s6640_s4 + $0x88] sm:$0xff]   ;;  %v1578_v1 = vadd.f32 %v6112_v35, %v6120_v39 }
 0x7a6   :  { %5642 = vpow2.f32 %v1768_v5  ;;  %v1766_v9 = vmul.f32 1.442695, %v1760_v7  ;;  %v2075_v5 = vrot.slane %v6167_v56, %v5868_v12 }
 0x7a8   :  { %5644 = vpow2.f32 %v1766_v9  ;;  %v1589_v9 = vadd.f32 %v6114_v60, %v6122_v3 }
 0x7af   :  { %v5639_v10 = vpop.eup %5638 }
 0x7b0   :  { %v1773_v16 = vsel %vm794_vm2, %v5639_v10, 0.0 }
 0x7b1   :  { %v5641_v17 = vpop.eup %5640  ;;  %1774 = vadd.xlane.f32.xlu1 %v1773_v16 }
 0x7b2   :  { %v1770_v63 = vsel %vm794_vm2, %v5641_v17, 0.0 }
 0x7b3   :  { %v5643_v40 = vpop.eup %5642  ;;  %1771 = vadd.xlane.f32.xlu0 %v1770_v63 }
 0x7b4   :  { %v1779_v25 = vsel %vm794_vm2, %v5643_v40, 0.0 }
 0x7b5   :  { %v5645_v18 = vpop.eup %5644  ;;  %1780 = vadd.xlane.f32.xlu1 %v1779_v25 }
 0x7b6   :  { %v1776_v11 = vsel %vm794_vm2, %v5645_v18, 0.0 }
 0x7b7   :  { %1777 = vadd.xlane.f32.xlu0 %v1776_v11 }
 0x83a   :  { %v1775_v53 = vpop.xlane.xlu1 %1774 }
 0x83b   :  { %5646 = vrcp.f32 %v1775_v53 }
 0x83c   :  { %v1772_v20 = vpop.xlane.xlu0 %1771 }
 0x83d   :  { %5648 = vrcp.f32 %v1772_v20 }
 0x83e   :  { %v1781_v31 = vpop.xlane.xlu1 %1780 }
 0x83f   :  { %5650 = vrcp.f32 %v1781_v31 }
 0x840   :  { %v1778_v52 = vpop.xlane.xlu0 %1777 }
 0x841   :  { %5652 = vrcp.f32 %v1778_v52 }
 0x848   :  { %v5647_v34 = vpop.eup %5646 }
 0x849   :  { %v1787_v47 = vmul.f32 %v5647_v34, %v5639_v10 }
 0x84a   :  { %v5649_v29 = vpop.eup %5648 }
 0x84b   :  { %v1786_v26 = vmul.f32 %v5649_v29, %v5641_v17  ;;  %v1581_v17 = vadd.f32 %v6118_v27, %v6124_v58 }
 0x84c   :  { %v5651_v8 = vpop.eup %5650 }
 0x84d   :  { %5365 = vmatprep.mubr.msk.f32.mxu0 %vm794_vm2, %v1786_v26  ;;  %v1789_v43 = vmul.f32 %v5651_v8, %v5643_v40 }
 0x84e   :  { %v5653_v21 = vpop.eup %5652  ;;  %5366 = vmatmul.mubr.msk.f32.vlgmr.msra.gmra.mxu0 %vm794_vm2, %v1787_v47 }
 0x84f   :  { %v1788_v30 = vmul.f32 %v5653_v21, %v5645_v18  ;;  %5376 = vmatpush3.bf16.msra.mxu0 %v5454_v24 }
 0x850   :  { %5377 = vmatprep.subr.bf16.mxu0 %v5455_v45 }
 0x851   :  { %5372 = vmatprep.mubr.msk.f32.mxu1 %vm794_vm2, %v1788_v30 }
 0x852   :  { %5373 = vmatmul.mubr.msk.f32.vlgmr.msra.gmra.mxu1 %vm794_vm2, %v1789_v43 }
 0x853   :  { %5378 = vmatpush3.bf16.msra.mxu0 %v5455_v45  ;;  %2565 = vmatprep.mubr.bf16.mxu1 %v5721_v0 }
 0x854   :  { %5379 = vmatprep.subr.bf16.mxu0 %v5456_v36 }
 0x857   :  { %5380 = vmatpush3.bf16.msra.mxu0 %v5456_v36 }
 0x858   :  { %5381 = vmatprep.subr.bf16.mxu0 %v5457_v32 }
 0x85b   :  { %5382 = vmatpush3.bf16.msra.mxu0 %v5457_v32 }
 0x85c   :  { %5383 = vmatprep.subr.bf16.mxu0 %v5458_v33 }
 0x85f   :  { %5384 = vmatpush3.bf16.msra.mxu0 %v5458_v33 }
 0x860   :  { %5385 = vmatprep.subr.bf16.mxu0 %v5459_v13 }
 0x863   :  { %5386 = vmatpush3.bf16.msra.mxu0 %v5459_v13 }
 0x864   :  { %5387 = vmatprep.subr.bf16.mxu0 %v5460_v38 }
 0x867   :  { %5388 = vmatpush3.bf16.msra.mxu0 %v5460_v38  ;;  %v2187_v38 = vld [vmem:[%s6641_s5 + $0x100] sm:$0x11] }
 0x868   :  { %5389 = vmatprep.subr.bf16.mxu0 %v5461_v42 }
 0x86b   :  { %5390 = vmatpush3.bf16.msra.mxu0 %v5461_v42  ;;  %v2189_v42 = vld [vmem:[%s6641_s5 + $0x110] sm:$0x11] }
 0x90e   :  { %v5367_v44 = vpop.f32.mrf.mxu0 }
 0x910   :  { %v1862_v46 = vpop.f32.mrf.mxu0 }
 0x911   :  { %v1952_v49 = vpack.c.bf16 %v5367_v44, %v1862_v46  ;;  %v4770_v44 = vcombine.high %v2187_v38, %v2187_v38  ;;  %v4774_v46 = vcombine.high %v2189_v42, %v2189_v42 }
 0x912   :  { %v5374_v50 = vpop.f32.mrf.mxu1 }
 0x913   :  { %5391 = vmatprep.mubr.bf16.mxu0 %v1952_v49  ;;  %v4769_v49 = vcombine.low %v2187_v38, %v2187_v38 }
 0x914   :  { %v1943_v57 = vpop.f32.mrf.mxu1 }
 0x915   :  { %v1953_v59 = vpack.c.bf16 %v5374_v50, %v1943_v57  ;;  %v4773_v50 = vcombine.low %v2189_v42, %v2189_v42  ;;  %v2489_v57 = vand.u32 %v4770_v44, %v5808_v15 }
 0x917   :  { %5392 = vmatmul.mubr.bf16.vlgmr.msra.gmra.mxu0 %v1953_v59  ;;  %v2501_v59 = vand.u32 %v4774_v46, %v5808_v15  ;;  %2543 = vmatprep.subr.bf16.mxu1 %v2489_v57 }
 0x918   :  { %2671 = vmatprep.mubr.bf16.mxu0 %v5721_v0 }
 0x919   :  { %2649 = vmatprep.subr.bf16.mxu0 %v2501_v59  ;;  %v2172_v59 = vld [vmem:[%s6641_s5 + $0x88] sm:$0xff] }
 0x9d7   :  { %v5393_v62 = vpop.f32.mrf.mxu0 }
 0x9d8   :  { %v2070_v4 = vadd.f32 %v5393_v62, %v1586_v61  ;;  %v2486_v61 = vand.u32 %v4769_v49, %v5808_v15  ;;  %v2498_v62 = vand.u32 %v4773_v50, %v5808_v15 }
 0x9d9   :  { %v2053_v7 = vpop.f32.mrf.mxu0 }
 0x9da   :  { %v2068_v10 = vadd.f32 %v2053_v7, %v1578_v1  ;;  %v2078_v63 = vadd.f32 %v2075_v5, %v2070_v4  ;;  %2544 = vmatpush1.bf16.msra.mxu1 %v2486_v61  ;;  %2650 = vmatpush1.bf16.msra.mxu0 %v2498_v62  ;;  %v2171_v1 = vld [vmem:[%s6641_s5 + $0x80] sm:$0xff] }
 0x9db   :  { %v5394_v16 = vpop.f32.mrf.mxu0  ;;  %v2179_v4 = vld [vmem:[%s6641_s5 + $0xc0] sm:$0xff] }
 0x9dc   :  { %v2076_v40 = vadd.f32 %v2075_v5, %v2068_v10  ;;  %v2071_v14 = vadd.f32 %v5394_v16, %v1589_v9  ;;  %v2082_v24 = vadd.f32 %v2078_v63, %v5838_v55  ;;  %v4754_v7 = vcombine.high %v2171_v1, %v2179_v4  ;;  %v2181_v9 = vld [vmem:[%s6641_s5 + $0xd0] sm:$0xff]  ;;  %v2155_v63 = vld [vmem:[%s6641_s5] sm:$0xff] }
 0x9dd   :  { %v2056_v28 = vpop.f32.mrf.mxu0  ;;  %v4753_v10 = vcombine.low %v2171_v1, %v2179_v4  ;;  %v2175_v1 = vld [vmem:[%s6641_s5 + $0xa0] sm:$0xff] }
 0x9de   :  { %v2069_v25 = vadd.f32 %v2056_v28, %v1581_v17  ;;  %v2080_v35 = vadd.f32 %v2076_v40, %v5834_v51  ;;  %v2079_v39 = vadd.f32 %v2075_v5, %v2071_v14  ;;  %v2090_v27 = vsel %vm342_vm1, %v2082_v24, 0.0  ;;  %2545 = vmatprep.subr.bf16.mxu1 %v4754_v7  ;;  %v2163_v40 = vld [vmem:[%s6641_s5 + $0x40] sm:$0xff]  ;;  %v2157_v14 = vld [vmem:[%s6641_s5 + $0x10] sm:$0xff] }
 0x9df   :  { %2546 = vmatpush1.bf16.msra.mxu1 %v4753_v10  ;;  %v4738_v28 = vcombine.high %v2155_v63, %v2163_v40  ;;  %v2183_v4 = vld [vmem:[%s6641_s5 + $0xe0] sm:$0xff] }
 0x9e0   :  { %v2077_v18 = vadd.f32 %v2075_v5, %v2069_v25  ;;  %v2084_v11 = vsel %vm342_vm1, %v2080_v35, 0.0  ;;  %v2083_v58 = vadd.f32 %v2079_v39, %v5848_v2  ;;  %v2173_v5 = vld [vmem:[%s6641_s5 + $0x90] sm:$0xff] }
 0x9e1   :  { %2085 = vadd.xlane.f32.xlu0 %v2084_v11  ;;  %v4757_v16 = vcombine.low %v2173_v5, %v2181_v9  ;;  %v4758_v17 = vcombine.high %v2173_v5, %v2181_v9  ;;  %v2165_v25 = vld [vmem:[%s6641_s5 + $0x50] sm:$0xff]  ;;  %2547 = vmatprep.subr.bf16.mxu1 %v4738_v28  ;;  %v2188_v11 = vld [vmem:[%s6641_s5 + $0x108] sm:$0x11]  ;;  %v2190_v28 = vld [vmem:[%s6641_s5 + $0x118] sm:$0x11] }
 0x9e2   :  { %v2081_v60 = vadd.f32 %v2077_v18, %v5836_v54  ;;  %v2093_v53 = vsel %vm342_vm1, %v2083_v58, 0.0  ;;  %v4741_v39 = vcombine.low %v2157_v14, %v2165_v25  ;;  %v4742_v18 = vcombine.high %v2157_v14, %v2165_v25  ;;  %v2156_v9 = vld [vmem:[%s6641_s5 + $0x8] sm:$0xff]  ;;  %v2193_v25 = vld [vmem:[%s6641_s5 + $0x130] sm:$0x11] }
 0x9e3   :  { %2651 = vmatprep.subr.bf16.mxu0 %v4758_v17  ;;  %v4771_v46 = vcombine.low %v2188_v11, %v2188_v11  ;;  %v2164_v17 = vld [vmem:[%s6641_s5 + $0x48] sm:$0xff] }
 0x9e4   :  { %v2087_v3 = vsel %vm342_vm1, %v2081_v60, 0.0  ;;  %2652 = vmatpush1.bf16.msra.mxu0 %v4757_v16  ;;  %v4762_v16 = vcombine.high %v2175_v1, %v2183_v4 }
 0x9e5   :  { %2088 = vadd.xlane.f32.xlu1 %v2087_v3  ;;  %2091 = vadd.xlane.f32.xlu0 %v2090_v27  ;;  %v2492_v5 = vand.u32 %v4771_v46, %v5808_v15 }
 0x9e6   :  { %2653 = vmatprep.subr.bf16.mxu0 %v4742_v18 }
 0x9e8   :  { %2654 = vmatpush1.bf16.msra.mxu0 %v4741_v39  ;;  %v4761_v39 = vcombine.low %v2175_v1, %v2183_v4  ;;  %v2176_v4 = vld [vmem:[%s6641_s5 + $0xa8] sm:$0xff] }
 0x9e9   :  { %2094 = vadd.xlane.f32.xlu1 %v2093_v53 }
 0xa6a   :  { %v2086_v51 = vpop.xlane.xlu0 %2085 }
 0xa6b   :  { %v2097_v20 = vmul.f32 0.030303031, %v2086_v51 }
 0xa6d   :  { %v6187_v31 = vsub.f32 %v2080_v35, %v2097_v20  ;;  %v4737_v35 = vcombine.low %v2155_v63, %v2163_v40  ;;  %v2159_v63 = vld [vmem:[%s6641_s5 + $0x20] sm:$0xff] }
 0xa6e   :  { %v2089_v52 = vpop.xlane.xlu1 %2088  ;;  %v2092_v55 = vpop.xlane.xlu0 %2091  ;;  %v2167_v40 = vld [vmem:[%s6641_s5 + $0x60] sm:$0xff] }
 0xa6f   :  { %v2098_v34 = vmul.f32 0.030303031, %v2089_v52  ;;  %v2099_v29 = vmul.f32 0.030303031, %v2092_v55  ;;  %v2105_v54 = vmul.f32 %v6187_v31, %v6187_v31  ;;  %2548 = vmatpush1.bf16.msra.mxu1 %v4737_v35 }
 0xa71   :  { %v6191_v26 = vsub.f32 %v2081_v60, %v2098_v34  ;;  %v6193_v47 = vsub.f32 %v2082_v24, %v2099_v29  ;;  %v2109_v2 = vsel %vm342_vm1, %v2105_v54, 0.0  ;;  %v2191_v24 = vld [vmem:[%s6641_s5 + $0x120] sm:$0x11]  ;;  %v4772_v60 = vcombine.high %v2188_v11, %v2188_v11 }
 0xa72   :  { %v2095_v45 = vpop.xlane.xlu1 %2094  ;;  %2110 = vadd.xlane.f32.xlu0 %v2109_v2  ;;  %v4778_v3 = vcombine.high %v2191_v24, %v2191_v24  ;;  %v4777_v49 = vcombine.low %v2191_v24, %v2191_v24  ;;  %v4740_v11 = vcombine.high %v2156_v9, %v2164_v17  ;;  %v4746_v24 = vcombine.high %v2159_v63, %v2167_v40 }
 0xa73   :  { %v2100_v8 = vmul.f32 0.030303031, %v2095_v45  ;;  %v2106_v21 = vmul.f32 %v6191_v26, %v6191_v26  ;;  %v2107_v30 = vmul.f32 %v6193_v47, %v6193_v47  ;;  %v2495_v27 = vand.u32 %v4772_v60, %v5808_v15 }
 0xa74   :  { %v2510_v7 = vand.u32 %v4777_v49, %v5808_v15  ;;  %v4776_v60 = vcombine.high %v2190_v28, %v2190_v28 }
 0xa75   :  { %v6200_v43 = vsub.f32 %v2083_v58, %v2100_v8  ;;  %v2112_v36 = vsel %vm342_vm1, %v2106_v21, 0.0  ;;  %v2115_v32 = vsel %vm342_vm1, %v2107_v30, 0.0  ;;  %v2513_v58 = vand.u32 %v4778_v3, %v5808_v15  ;;  %2596 = vmatprep.subr.bf16.mxu1 %v2495_v27 }
 0xa76   :  { %2113 = vadd.xlane.f32.xlu1 %v2112_v36  ;;  %2116 = vadd.xlane.f32.xlu0 %v2115_v32  ;;  %v2140_v36 = vrot.slane %v6167_v56, %v5881_v19  ;;  %v4782_v3 = vcombine.high %v2193_v25, %v2193_v25 }
 0xa77   :  { %v2108_v33 = vmul.f32 %v6200_v43, %v6200_v43  ;;  %2755 = vmatprep.subr.bf16.mxu0 %v2513_v58  ;;  %v4739_v58 = vcombine.low %v2156_v9, %v2164_v17  ;;  %v2160_v9 = vld [vmem:[%s6641_s5 + $0x28] sm:$0xff] }
 0xa78   :  { %v5479_v17 = vld [vmem:[#allocation4 + $0x38] sm:$0xff]  }
 0xa79   :  { %v2118_v13 = vsel %vm342_vm1, %v2108_v33, 0.0 }
 0xa7a   :  { %2119 = vadd.xlane.f32.xlu1 %v2118_v13  ;;  %v2148_v13 = vrot.slane %v6167_v56, %v5886_v22 }
 0xafb   :  { %v2111_v53 = vpop.xlane.xlu0 %2110 }
 0xafc   :  { %v2121_v51 = vmul.f32 0.030303031, %v2111_v53  ;;  %v4745_v53 = vcombine.low %v2159_v63, %v2167_v40  ;;  %v5480_v63 = vld [vmem:[#allocation4 + $0x70] sm:$0xff]  }
 0xafe   :  { %v2125_v20 = vadd.f32 1e-05, %v2121_v51 }
 0xaff   :  { %v2114_v52 = vpop.xlane.xlu1 %2113  ;;  %v2117_v55 = vpop.xlane.xlu0 %2116 }
 0xb00   :  { %5654 = vrsqrt.f32 %v2125_v20  ;;  %v2122_v34 = vmul.f32 0.030303031, %v2114_v52  ;;  %v2123_v29 = vmul.f32 0.030303031, %v2117_v55  ;;  %v2507_v20 = vand.u32 %v4776_v60, %v5808_v15  ;;  %v5484_v60 = vld [vmem:[#allocation4 + $0x60] sm:$0xff]  }
 0xb01   :  { %v2525_v52 = vand.u32 %v4782_v3, %v5808_v15  ;;  %v4775_v55 = vcombine.low %v2190_v28, %v2190_v28 }
 0xb02   :  { %v2126_v54 = vadd.f32 1e-05, %v2122_v34  ;;  %v2127_v2 = vadd.f32 1e-05, %v2123_v29  ;;  %v4781_v34 = vcombine.low %v2193_v25, %v2193_v25  ;;  %v2174_v29 = vld [vmem:[%s6641_s5 + $0x98] sm:$0xff]  ;;  %v5481_v25 = vld [vmem:[#allocation4 + $0x30] sm:$0xff]  }
 0xb03   :  { %v2120_v45 = vpop.xlane.xlu1 %2119 }
 0xb04   :  { %5656 = vrsqrt.f32 %v2126_v54  ;;  %v2124_v8 = vmul.f32 0.030303031, %v2120_v45  ;;  %v2182_v54 = vld [vmem:[%s6641_s5 + $0xd8] sm:$0xff]  ;;  %v2185_v45 = vld [vmem:[%s6641_s5 + $0xf0] sm:$0xff] }
 0xb05   :  { %5658 = vrsqrt.f32 %v2127_v2  ;;  %v2177_v2 = vld [vmem:[%s6641_s5 + $0xb0] sm:$0xff] }
 0xb06   :  { %v2128_v21 = vadd.f32 1e-05, %v2124_v8  ;;  %v2504_v8 = vand.u32 %v4775_v55, %v5808_v15  ;;  %v4765_v46 = vcombine.low %v2177_v2, %v2185_v45 }
 0xb08   :  { %5660 = vrsqrt.f32 %v2128_v21  ;;  %v2522_v21 = vand.u32 %v4781_v34, %v5808_v15 }
 0xb0d   :  { %v5655_v30 = vpop.eup %5654 }
 0xb0e   :  { %v2133_v32 = vmul.f32 %v5655_v30, %v6187_v31  ;;  %v2158_v30 = vld [vmem:[%s6641_s5 + $0x18] sm:$0xff] }
 0xb10   :  { %v2141_v38 = vmul.f32 %v2140_v36, %v2133_v32  ;;  %v4766_v32 = vcombine.high %v2177_v2, %v2185_v45  ;;  %v5488_v2 = vld [vmem:[#allocation4 + $0x18] sm:$0xff]  }
 0xb11   :  { %v5657_v33 = vpop.eup %5656 }
 0xb12   :  { %v2134_v42 = vmul.f32 %v5657_v33, %v6191_v26  ;;  %v5659_v44 = vpop.eup %5658  ;;  %v6258_v61 = vadd.f32 %v2148_v13, %v2141_v38  ;;  %v2180_v26 = vld [vmem:[%s6641_s5 + $0xc8] sm:$0xff]  ;;  %v2166_v33 = vld [vmem:[%s6641_s5 + $0x58] sm:$0xff]  ;;  %v2169_v38 = vld [vmem:[%s6641_s5 + $0x70] sm:$0xff] }
 0xb13   :  { %v2135_v31 = vmul.f32 %v5659_v44, %v6193_v47  ;;  %v4756_v10 = vcombine.high %v2172_v59, %v2180_v26  ;;  %v4755_v35 = vcombine.low %v2172_v59, %v2180_v26  ;;  %v4759_v44 = vcombine.low %v2174_v29, %v2182_v54  ;;  %v5478_v26 = vld [vmem:[#allocation4 + $0x78] sm:$0xff]  }
 0xb14   :  { %v2142_v50 = vmul.f32 %v2140_v36, %v2134_v42  ;;  %6656 = vst [vmem:[#allocation11_spill] sm:$0xff] %v6258_v61  ;;  %v2192_v42 = vld [vmem:[%s6641_s5 + $0x128] sm:$0x11]  ;;  %v4744_v49 = vcombine.high %v2158_v30, %v2166_v33  ;;  %v4743_v59 = vcombine.low %v2158_v30, %v2166_v33 }
 0xb15   :  { %v5661_v57 = vpop.eup %5660  ;;  %v2143_v14 = vmul.f32 %v2140_v36, %v2135_v31  ;;  %v4779_v1 = vcombine.low %v2192_v42, %v2192_v42  ;;  %v5489_v30 = vld [vmem:[#allocation4 + $0xb8] sm:$0xff]   ;;  %v5492_v33 = vld [vmem:[#allocation4 + $0x10] sm:$0xff]  }
 0xb16   :  { %v6260_v62 = vadd.f32 %v2148_v13, %v2142_v50  ;;  %v2136_v56 = vmul.f32 %v5661_v57, %v6200_v43  ;;  %v4780_v57 = vcombine.high %v2192_v42, %v2192_v42  ;;  %v5495_v42 = vld [vmem:[#allocation4 + $0xe8] sm:$0xff]  }
 0xb17   :  { %v6305_v27 = vadd.f32 %v2148_v13, %v2143_v14 }
 0xb18   :  { %6657 = vst [vmem:[#allocation12_spill] sm:$0xff] %v6260_v62  ;;  %v6277_v47 = vpack.c.bf16 %v6260_v62, %v6258_v61  ;;  %v2144_v43 = vmul.f32 %v2140_v36, %v2136_v56  ;;  %v4760_v36 = vcombine.high %v2174_v29, %v2182_v54  ;;  %v2519_v56 = vand.u32 %v4780_v57, %v5808_v15  ;;  %v2162_v29 = vld [vmem:[%s6641_s5 + $0x38] sm:$0xff]  ;;  %v5502_v57 = vld [vmem:[#allocation4 + $0xd8] sm:$0xff]  }
 0xb19   :  { %6659 = vst [vmem:[#allocation14_spill] sm:$0xff] %v6305_v27  ;;  %v2170_v54 = vld [vmem:[%s6641_s5 + $0x78] sm:$0xff] }
 0xb1a   :  { %4785 = vmatmul.mubr.msk.bf16.vlgmr.msra.gmra.mxu1 %vm342_vm1, %v6277_v47  ;;  %4789 = vmatmul.mubr.msk.bf16.vlgmr.msra.gmra.mxu0 %vm342_vm1, %v6277_v47  ;;  %v6301_v18 = vadd.f32 %v2148_v13, %v2144_v43  ;;  %v2161_v13 = vld [vmem:[%s6641_s5 + $0x30] sm:$0xff] }
 0xb1b   :  { %2597 = vmatpush1.bf16.msra.mxu1 %v2492_v5  ;;  %2756 = vmatpush1.bf16.msra.mxu0 %v2510_v7  ;;  %v4750_v50 = vcombine.high %v2161_v13, %v2169_v38  ;;  %v4749_v31 = vcombine.low %v2161_v13, %v2169_v38  ;;  %v2184_v5 = vld [vmem:[%s6641_s5 + $0xe8] sm:$0xff]  ;;  %v2516_v7 = vand.u32 %v4779_v1, %v5808_v15  ;;  %v5494_v38 = vld [vmem:[#allocation4 + $0x48] sm:$0xff]  }
 0xb1c   :  { %6658 = vst [vmem:[#allocation13_spill] sm:$0xff] %v6301_v18  ;;  %2575 = vmatprep.mubr.bf16.mxu1 %v5721_v0  ;;  %2681 = vmatprep.mubr.bf16.mxu0 %v5721_v0  ;;  %v6309_v51 = vpack.c.bf16 %v6301_v18, %v6305_v27  ;;  %v4764_v43 = vcombine.high %v2176_v4, %v2184_v5  ;;  %v5493_v13 = vld [vmem:[#allocation4 + $0xb0] sm:$0xff]   ;;  %v5512_v1 = vld [vmem:[#allocation4 + $0x88] sm:$0xff]  }
 0xb1d   :  { %2598 = vmatprep.subr.bf16.mxu1 %v4756_v10  ;;  %2757 = vmatprep.subr.bf16.mxu0 %v4762_v16  ;;  %v2168_v10 = vld [vmem:[%s6641_s5 + $0x68] sm:$0xff]  ;;  %v2194_v16 = vld [vmem:[%s6641_s5 + $0x138] sm:$0x11]  ;;  %v4763_v40 = vcombine.low %v2176_v4, %v2184_v5 }
 0xb1e   :  { %v4748_v14 = vcombine.high %v2160_v9, %v2168_v10  ;;  %v4784_v28 = vcombine.high %v2194_v16, %v2194_v16  ;;  %v4783_v3 = vcombine.low %v2194_v16, %v2194_v16  ;;  %v5514_v4 = vld [vmem:[#allocation4 + $0xc0] sm:$0xff]  }
 0xb1f   :  { %2599 = vmatpush1.bf16.msra.mxu1 %v4755_v35  ;;  %2758 = vmatpush1.bf16.msra.mxu0 %v4761_v39  ;;  %v4747_v35 = vcombine.low %v2160_v9, %v2168_v10  ;;  %v5516_v5 = vld [vmem:[#allocation4 + $0x80] sm:$0xff]  }
 0xb20   :  { %2600 = vmatprep.subr.bf16.mxu1 %v4740_v11  ;;  %2759 = vmatprep.subr.bf16.mxu0 %v4746_v24  ;;  %v2531_v39 = vand.u32 %v4784_v28, %v5808_v15  ;;  %v5482_v11 = vld [vmem:[#allocation4 + $0x68] sm:$0xff]   ;;  %v2528_v55 = vand.u32 %v4783_v3, %v5808_v15  ;;  %v4752_v15 = vcombine.high %v2162_v29, %v2170_v54 }
 0xb21   :  { %v5483_v24 = vld [vmem:[#allocation4 + $0x28] sm:$0xff]  }
 0xb22   :  { %4786 = vmatmul.mubr.msk.bf16.gmra.mxu1 %vm342_vm1, %v6309_v51  ;;  %4790 = vmatmul.mubr.msk.bf16.gmra.mxu0 %vm342_vm1, %v6309_v51 }
 0xb23   :  { %2601 = vmatpush1.bf16.msra.mxu1 %v4739_v58  ;;  %2760 = vmatpush1.bf16.msra.mxu0 %v4745_v53  ;;  %v2178_v58 = vld [vmem:[%s6641_s5 + $0xb8] sm:$0xff] }
 0xb24   :  { %2618 = vmatprep.mubr.bf16.mxu1 %v5721_v0  ;;  %2777 = vmatprep.mubr.bf16.mxu0 %v5721_v0  ;;  %v2186_v53 = vld [vmem:[%s6641_s5 + $0xf8] sm:$0xff] }
 0xb25   :  { %2702 = vmatprep.subr.bf16.mxu1 %v2507_v20  ;;  %2861 = vmatprep.subr.bf16.mxu0 %v2525_v52  ;;  %v5485_v20 = vld [vmem:[#allocation4 + $0x20] sm:$0xff]   ;;  %v5486_v52 = vld [vmem:[#allocation4 + $0x58] sm:$0xff]   ;;  %v4768_v34 = vcombine.high %v2178_v58, %v2186_v53  ;;  %v4767_v45 = vcombine.low %v2178_v58, %v2186_v53 }
 0xb2a   :  { %4787 = vmatmul.mubr.msk.bf16.vlgmr.msra.gmra.mxu1 %vm342_vm1, %v6277_v47  ;;  %4793 = vmatmul.mubr.msk.bf16.vlgmr.msra.gmra.mxu0 %vm342_vm1, %v6277_v47 }
 0xb2b   :  { %2703 = vmatpush1.bf16.msra.mxu1 %v2504_v8  ;;  %2862 = vmatpush1.bf16.msra.mxu0 %v2522_v21  ;;  %v4751_v8 = vcombine.low %v2162_v29, %v2170_v54  ;;  %v5487_v21 = vld [vmem:[#allocation4 + $0xf8] sm:$0xff]  }
 0xb2c   :  { %2628 = vmatprep.mubr.bf16.mxu1 %v5721_v0  ;;  %2787 = vmatprep.mubr.bf16.mxu0 %v5721_v0  ;;  %v5505_v54 = vld [vmem:[#allocation4 + $0x138] sm:$0xff]  }
 0xb2d   :  { %2704 = vmatprep.subr.bf16.mxu1 %v4760_v36  ;;  %2863 = vmatprep.subr.bf16.mxu0 %v4766_v32  ;;  %v5490_v36 = vld [vmem:[#allocation4 + $0x50] sm:$0xff]  }
 0xb2e   :  { %v5491_v32 = vld [vmem:[#allocation4 + $0xf0] sm:$0xff]  }
 0xb2f   :  { %2705 = vmatpush1.bf16.msra.mxu1 %v4759_v44  ;;  %2864 = vmatpush1.bf16.msra.mxu0 %v4765_v46  ;;  %v5496_v44 = vld [vmem:[#allocation4 + $0x8] sm:$0xff]  }
 0xb30   :  { %2706 = vmatprep.subr.bf16.mxu1 %v4744_v49  ;;  %2865 = vmatprep.subr.bf16.mxu0 %v4750_v50  ;;  %v5497_v46 = vld [vmem:[#allocation4 + $0xa8] sm:$0xff]   ;;  %v5500_v49 = vld [vmem:[#allocation4] sm:$0xff]  }
 0xb31   :  { %v5501_v50 = vld [vmem:[#allocation4 + $0xa0] sm:$0xff]  }
 0xb32   :  { %4788 = vmatmul.mubr.msk.bf16.gmra.mxu1 %vm342_vm1, %v6309_v51  ;;  %4794 = vmatmul.mubr.msk.bf16.gmra.mxu0 %vm342_vm1, %v6309_v51 }
 0xb33   :  { %2707 = vmatpush1.bf16.msra.mxu1 %v4743_v59  ;;  %2866 = vmatpush1.bf16.msra.mxu0 %v4749_v31  ;;  %v5503_v59 = vld [vmem:[#allocation4 + $0x178] sm:$0xff]  }
 0xb34   :  { %2724 = vmatprep.mubr.bf16.mxu1 %v5721_v0  ;;  %2883 = vmatprep.mubr.bf16.mxu0 %v5721_v0  ;;  %v5504_v31 = vld [vmem:[#allocation4 + $0x98] sm:$0xff]  }
 0xb35   :  { %2808 = vmatprep.subr.bf16.mxu1 %v2519_v56  ;;  %5017 = vmatprep.subr.bf16.mxu0 %v5478_v26  ;;  %v5506_v56 = vld [vmem:[#allocation4 + $0xd0] sm:$0xff]  }
 0xb36   :  { %v5508_v26 = vld [vmem:[#allocation4 + $0x90] sm:$0xff]  }
 0xb3a   :  { %4791 = vmatmul.mubr.msk.bf16.vlgmr.msra.gmra.mxu1 %vm342_vm1, %v6277_v47  ;;  %4797 = vmatmul.mubr.msk.bf16.vlgmr.msra.gmra.mxu0 %vm342_vm1, %v6277_v47 }
 0xb3b   :  { %2809 = vmatpush1.bf16.msra.mxu1 %v2516_v7  ;;  %2734 = vmatprep.mubr.bf16.mxu1 %v5721_v0  ;;  %v5519_v7 = vld [vmem:[#allocation4 + $0x1f8] sm:$0xff]  }
 0xb3c   :  { %2893 = vmatprep.mubr.bf16.mxu0 %v5721_v0  ;;  %2810 = vmatprep.subr.bf16.mxu1 %v4764_v43  ;;  %v6416_v43 = vld [vmem:[%s6642_s6] sm:$0xff] }
 0xb3d   :  { %5018 = vmatpush3.bf16.msra.mxu0 %v5479_v17  ;;  %v2206_v16 = vrot.slane %v6416_v43, %v5881_v19  ;;  %v2202_v17 = vrot.slane %v6416_v43, %v5868_v12 }
 0xb3e   :  { %5019 = vmatprep.subr.bf16.mxu0 %v5480_v63 }
 0xb3f   :  { %2811 = vmatpush1.bf16.msra.mxu1 %v4763_v40 }
 0xb40   :  { %2812 = vmatprep.subr.bf16.mxu1 %v4748_v14 }
 0xb41   :  { %5020 = vmatpush3.bf16.msra.mxu0 %v5481_v25 }
 0xb42   :  { %4792 = vmatmul.mubr.msk.bf16.gmra.mxu1 %vm342_vm1, %v6309_v51  ;;  %4798 = vmatmul.mubr.msk.bf16.gmra.mxu0 %vm342_vm1, %v6309_v51 }
 0xb43   :  { %2813 = vmatpush1.bf16.msra.mxu1 %v4747_v35  ;;  %2830 = vmatprep.mubr.bf16.mxu1 %v5721_v0 }
 0xb44   :  { %2914 = vmatprep.subr.bf16.mxu1 %v2531_v39  ;;  %5021 = vmatprep.subr.bf16.mxu0 %v5482_v11 }
 0xb45   :  { %5022 = vmatpush3.bf16.msra.mxu0 %v5483_v24 }
 0xb46   :  { %5023 = vmatprep.subr.bf16.mxu0 %v5484_v60 }
 0xb49   :  { %5024 = vmatpush3.bf16.msra.mxu0 %v5485_v20 }
 0xb4a   :  { %4795 = vmatmul.mubr.msk.bf16.vlgmr.msra.gmra.mxu1 %vm342_vm1, %v6277_v47  ;;  %5025 = vmatprep.subr.bf16.mxu0 %v5486_v52 }
 0xb4b   :  { %2915 = vmatpush1.bf16.msra.mxu1 %v2528_v55  ;;  %2840 = vmatprep.mubr.bf16.mxu1 %v5721_v0 }
 0xb4c   :  { %2916 = vmatprep.subr.bf16.mxu1 %v4768_v34  ;;  %v6428_v34 = vrot.slane %v6416_v43, %v5939_v6 }
 0xb4d   :  { %5026 = vmatpush3.bf16.msra.mxu0 %v5488_v2 }
 0xb4e   :  { %5027 = vmatprep.subr.bf16.mxu0 %v5490_v36 }
 0xb4f   :  { %2917 = vmatpush1.bf16.msra.mxu1 %v4767_v45 }
 0xb50   :  { %2918 = vmatprep.subr.bf16.mxu1 %v4752_v15  ;;  %v5507_v15 = vld [vmem:[#allocation4 + $0x170] sm:$0xff]  }
 0xb51   :  { %5028 = vmatpush3.bf16.msra.mxu0 %v5492_v33 }
 0xb52   :  { %4796 = vmatmul.mubr.msk.bf16.gmra.mxu1 %vm342_vm1, %v6309_v51  ;;  %5029 = vmatprep.subr.bf16.mxu0 %v5494_v38 }
 0xb53   :  { %2919 = vmatpush1.bf16.msra.mxu1 %v4751_v8  ;;  %2936 = vmatprep.mubr.bf16.mxu1 %v5721_v0 }
 0xb54   :  { %5045 = vmatprep.subr.bf16.mxu1 %v5487_v21 }
 0xb55   :  { %5030 = vmatpush3.bf16.msra.mxu0 %v5496_v44 }
 0xb5a   :  { %4799 = vmatmul.mubr.msk.bf16.vlgmr.msra.gmra.mxu1 %vm342_vm1, %v6277_v47  ;;  %v5499_v47 = vld [vmem:[#allocation4 + $0xe0] sm:$0xff]  }
 0xb5b   :  { %2946 = vmatprep.mubr.bf16.mxu1 %v5721_v0  ;;  %5046 = vmatpush3.bf16.msra.mxu1 %v5489_v30  ;;  %v5498_v0 = vld [vmem:[#allocation4 + $0x40] sm:$0xff]  }
 0xb5c   :  { %5047 = vmatprep.subr.bf16.mxu1 %v5491_v32  ;;  %5031 = vmatprep.subr.bf16.mxu0 %v5498_v0  ;;  %v5511_v0 = vld [vmem:[#allocation4 + $0x168] sm:$0xff]  }
 0xb5d   :  { %5032 = vmatpush3.bf16.msra.mxu0 %v5500_v49 }
 0xb5e   :  { %5073 = vmatprep.subr.bf16.mxu0 %v5503_v59 }
 0xb5f   :  { %5048 = vmatpush3.bf16.msra.mxu1 %v5493_v13 }
 0xb60   :  { %5049 = vmatprep.subr.bf16.mxu1 %v5495_v42  ;;  %v5509_v42 = vld [vmem:[#allocation4 + $0x130] sm:$0xff]  }
 0xb62   :  { %4800 = vmatmul.mubr.msk.bf16.gmra.mxu1 %vm342_vm1, %v6309_v51  ;;  %v5510_v51 = vld [vmem:[#allocation4 + $0xc8] sm:$0xff]  }
 0xb63   :  { %5050 = vmatpush3.bf16.msra.mxu1 %v5497_v46 }
 0xb64   :  { %5051 = vmatprep.subr.bf16.mxu1 %v5499_v47 }
 0xb67   :  { %5052 = vmatpush3.bf16.msra.mxu1 %v5501_v50 }
 0xb68   :  { %5053 = vmatprep.subr.bf16.mxu1 %v5502_v57  ;;  %v2214_v57 = vrot.slane %v6416_v43, %v5889_v23 }
 0xb6b   :  { %5054 = vmatpush3.bf16.msra.mxu1 %v5504_v31 }
 0xb6c   :  { %5055 = vmatprep.subr.bf16.mxu1 %v5506_v56  ;;  %v2210_v56 = vrot.slane %v6416_v43, %v5886_v22 }
 0xb6f   :  { %5056 = vmatpush3.bf16.msra.mxu1 %v5508_v26 }
 0xb70   :  { %5057 = vmatprep.subr.bf16.mxu1 %v5510_v51 }
 0xb73   :  { %5058 = vmatpush3.bf16.msra.mxu1 %v5512_v1 }
 0xb74   :  { %5059 = vmatprep.subr.bf16.mxu1 %v5514_v4  ;;  %v5513_v4 = vld [vmem:[#allocation4 + $0x128] sm:$0xff]  }
 0xb77   :  { %5060 = vmatpush3.bf16.msra.mxu1 %v5516_v5 }
 0xb78   :  { %5101 = vmatprep.subr.bf16.mxu1 %v5519_v7 }
 0xbda   :  { %v2567_v9 = vpop.f32.mrf.mxu1  ;;  %v6418_v10 = vpop.f32.mrf.mxu0 }
 0xbdb   :  { %v2568_v35 = vadd.f32 %v2567_v9, %v2202_v17  ;;  %v5515_v9 = vld [vmem:[#allocation4 + $0x160] sm:$0xff]  }
 0xbdc   :  { %v2569_v63 = vpop.f32.mrf.mxu1  ;;  %v2675_v40 = vpop.f32.mrf.mxu0 }
 0xbdd   :  { %v2570_v28 = vadd.f32 %v2569_v63, %v2206_v16  ;;  %v2957_v20 = vmax.f32 %v2568_v35, 0.0  ;;  %v2676_v13 = vadd.f32 %v2675_v40, %v6428_v34  ;;  %v5517_v35 = vld [vmem:[#allocation4 + $0x120] sm:$0xff]  }
 0xbde   :  { %v2571_v14 = vpop.f32.mrf.mxu1  ;;  %v6424_v39 = vpop.f32.mrf.mxu0 }
 0xbdf   :  { %v2572_v25 = vadd.f32 %v2571_v14, %v2202_v17  ;;  %v2958_v58 = vmax.f32 %v2570_v28, 0.0  ;;  %v2962_v51 = vmax.f32 %v2676_v13, 0.0 }
 0xbe0   :  { %v2573_v11 = vpop.f32.mrf.mxu1  ;;  %v2679_v52 = vpop.f32.mrf.mxu0 }
 0xbe1   :  { %v2574_v24 = vadd.f32 %v2573_v11, %v2206_v16  ;;  %v2973_v60 = vmax.f32 %v2572_v25, 0.0  ;;  %v2680_v8 = vadd.f32 %v2679_v52, %v6428_v34 }
 0xbe2   :  { %v2577_v3 = vpop.f32.mrf.mxu1  ;;  %v6431_v32 = vpop.f32.mrf.mxu0 }
 0xbe3   :  { %v2974_v53 = vmax.f32 %v2574_v24, 0.0  ;;  %v3021_v2 = vpack.c.bf16 %v2973_v60, %v2957_v20  ;;  %v2578_v36 = vadd.f32 %v2577_v3, %v2202_v17  ;;  %v2978_v47 = vmax.f32 %v2680_v8, 0.0  ;;  %v5518_v60 = vld [vmem:[#allocation4 + $0x158] sm:$0xff]   ;;  %v5523_v8 = vld [vmem:[#allocation4 + $0x1f0] sm:$0xff]  }
 0xbe4   :  { %v2579_v55 = vpop.f32.mrf.mxu1  ;;  %v6436_v31 = vpop.f32.mrf.mxu0 }
 0xbe5   :  { %v3022_v29 = vpack.c.bf16 %v2974_v53, %v2958_v58  ;;  %v2580_v21 = vadd.f32 %v2579_v55, %v2206_v16  ;;  %v2989_v59 = vmax.f32 %v2578_v36, 0.0 }
 0xbe6   :  { %v2581_v45 = vpop.f32.mrf.mxu1  ;;  %v6440_v40 = vpop.f32.mrf.mxu0 }
 0xbe7   :  { %v2582_v30 = vadd.f32 %v2581_v45, %v2202_v17  ;;  %4109 = vmatprep.mubr.bf16.mxu0 %v3022_v29  ;;  %v2990_v49 = vmax.f32 %v2580_v21, 0.0  ;;  %v5520_v29 = vld [vmem:[#allocation4 + $0x118] sm:$0xff]  }
 0xbe8   :  { %v2583_v33 = vpop.f32.mrf.mxu1  ;;  %4110 = vmatmul.mubr.bf16.vlgmr.msra.gmra.mxu0 %v3021_v2  ;;  %v2689_v53 = vpop.f32.mrf.mxu0 }
 0xbe9   :  { %v2584_v38 = vadd.f32 %v2583_v33, %v2206_v16  ;;  %5074 = vmatpush3.bf16.msra.mxu0 %v5505_v54  ;;  %v3005_v44 = vmax.f32 %v2582_v30, 0.0  ;;  %v3026_v16 = vpack.c.bf16 %v2978_v47, %v2962_v51  ;;  %v5521_v54 = vld [vmem:[#allocation4 + $0x1b8] sm:$0xff]   ;;  %v5526_v47 = vld [vmem:[#allocation4 + $0x148] sm:$0xff]  }
 0xbea   :  { %v2620_v46 = vpop.f32.mrf.mxu1  ;;  %5075 = vmatprep.subr.bf16.mxu0 %v5507_v15  ;;  %v5522_v15 = vld [vmem:[#allocation4 + $0x150] sm:$0xff]   ;;  %v6442_v36 = vpop.f32.mrf.mxu0 }
 0xbeb   :  { %v3006_v50 = vmax.f32 %v2584_v38, 0.0  ;;  %v3037_v5 = vpack.c.bf16 %v3005_v44, %v2989_v59  ;;  %v2621_v14 = vadd.f32 %v2620_v46, %v2210_v56  ;;  %v6448_v59 = vrot.slane %v6416_v43, %v5911_v41 }
 0xbec   :  { %v2622_v26 = vpop.f32.mrf.mxu1 }
 0xbed   :  { %v3038_v1 = vpack.c.bf16 %v3006_v50, %v2990_v49  ;;  %5076 = vmatpush3.bf16.msra.mxu0 %v5509_v42  ;;  %v2623_v17 = vadd.f32 %v2622_v26, %v2214_v57  ;;  %v2959_v20 = vmax.f32 %v2621_v14, 0.0  ;;  %v5524_v42 = vld [vmem:[#allocation4 + $0x110] sm:$0xff]   ;;  %v2781_v26 = vpop.f32.mrf.mxu0  ;;  %v2690_v14 = vadd.f32 %v2689_v53, %v6428_v34 }
 0xbee   :  { %v2624_v7 = vpop.f32.mrf.mxu1  ;;  %5077 = vmatprep.subr.bf16.mxu0 %v5511_v0  ;;  %v5525_v0 = vld [vmem:[#allocation4 + $0x1b0] sm:$0xff]  }
 0xbef   :  { %v2625_v63 = vadd.f32 %v2624_v7, %v2210_v56  ;;  %4117 = vmatprep.mubr.bf16.mxu0 %v3038_v1  ;;  %v2960_v3 = vmax.f32 %v2623_v17, 0.0  ;;  %v5529_v17 = vld [vmem:[#allocation4 + $0x1a8] sm:$0xff]  }
 0xbf0   :  { %v2626_v28 = vpop.f32.mrf.mxu1  ;;  %4118 = vmatmul.mubr.bf16.gmra.mxu0 %v3037_v5  ;;  %v5528_v5 = vld [vmem:[#allocation4 + $0x108] sm:$0xff]  }
 0xbf1   :  { %v2627_v25 = vadd.f32 %v2626_v28, %v2214_v57  ;;  %5078 = vmatpush3.bf16.msra.mxu0 %v5513_v4  ;;  %4207 = vmatprep.mubr.bf16.mxu0 %v3026_v16  ;;  %v2975_v11 = vmax.f32 %v2625_v63, 0.0  ;;  %v5530_v63 = vld [vmem:[#allocation4 + $0x140] sm:$0xff]  }
 0xbf2   :  { %v2630_v24 = vpop.f32.mrf.mxu1  ;;  %5079 = vmatprep.subr.bf16.mxu0 %v5515_v9 }
 0xbf3   :  { %v2976_v58 = vmax.f32 %v2627_v25, 0.0  ;;  %v3023_v2 = vpack.c.bf16 %v2975_v11, %v2959_v20  ;;  %v2631_v33 = vadd.f32 %v2630_v24, %v2210_v56  ;;  %v5531_v25 = vld [vmem:[#allocation4 + $0x1e0] sm:$0xff]   ;;  %v6458_v11 = vpop.f32.mrf.mxu0 }
 0xbf4   :  { %v2632_v52 = vpop.f32.mrf.mxu1  ;;  %v5533_v20 = vld [vmem:[#allocation4 + $0x1a0] sm:$0xff]  }
 0xbf5   :  { %v3024_v55 = vpack.c.bf16 %v2976_v58, %v2960_v3  ;;  %5080 = vmatpush3.bf16.msra.mxu0 %v5517_v35  ;;  %v2633_v21 = vadd.f32 %v2632_v52, %v2214_v57  ;;  %v2991_v51 = vmax.f32 %v2631_v33, 0.0  ;;  %v5532_v3 = vld [vmem:[#allocation4 + $0x100] sm:$0xff]   ;;  %v5535_v52 = vld [vmem:[#allocation4 + $0x278] sm:$0xff]  }
 0xbf6   :  { %v2634_v45 = vpop.f32.mrf.mxu1  ;;  %5081 = vmatprep.subr.bf16.mxu0 %v5518_v60 }
 0xbf7   :  { %v2635_v30 = vadd.f32 %v2634_v45, %v2210_v56  ;;  %4158 = vmatprep.mubr.bf16.mxu1 %v3024_v55  ;;  %v2992_v49 = vmax.f32 %v2633_v21, 0.0  ;;  %v5527_v56 = vld [vmem:[#allocation4 + $0x1e8] sm:$0xff]   ;;  %v3010_v55 = vmax.f32 %v2690_v14, 0.0 }
 0xbf8   :  { %v2636_v13 = vpop.f32.mrf.mxu1  ;;  %4159 = vmatmul.mubr.bf16.vlgmr.msra.gmra.mxu1 %v3023_v2 }
 0xbf9   :  { %v2637_v38 = vadd.f32 %v2636_v13, %v2214_v57  ;;  %5082 = vmatpush3.bf16.msra.mxu0 %v5520_v29  ;;  %5102 = vmatpush3.bf16.msra.mxu1 %v5521_v54  ;;  %v3007_v44 = vmax.f32 %v2635_v30, 0.0  ;;  %v2218_v57 = vrot.slane %v6416_v43, %v5918_v48  ;;  %v5534_v54 = vld [vmem:[#allocation4 + $0x1d8] sm:$0xff]  }
 0xbfa   :  { %v6444_v46 = vpop.f32.mrf.mxu1  ;;  %5083 = vmatprep.subr.bf16.mxu0 %v5522_v15  ;;  %5103 = vmatprep.subr.bf16.mxu1 %v5523_v8  ;;  %v5537_v30 = vld [vmem:[#allocation4 + $0x238] sm:$0xff]  }
 0xbfb   :  { %v3008_v50 = vmax.f32 %v2637_v38, 0.0  ;;  %v2678_v7 = vadd.f32 %v6424_v39, %v2218_v57  ;;  %v3039_v9 = vpack.c.bf16 %v3007_v44, %v2991_v51  ;;  %v2674_v35 = vadd.f32 %v6418_v10, %v2218_v57  ;;  %v5539_v44 = vld [vmem:[#allocation4 + $0x270] sm:$0xff]  }
 0xbfc   :  { %v2728_v1 = vpop.f32.mrf.mxu1  ;;  %v2686_v39 = vadd.f32 %v6436_v31, %v6428_v34  ;;  %v6468_v34 = vld [vmem:[%s6642_s6 + $0x8] sm:$0xff]  ;;  %v2785_v31 = vpop.f32.mrf.mxu0  ;;  %v2688_v13 = vadd.f32 %v6440_v40, %v2218_v57 }
 0xbfd   :  { %v3040_v4 = vpack.c.bf16 %v3008_v50, %v2992_v49  ;;  %5084 = vmatpush3.bf16.msra.mxu0 %v5524_v42  ;;  %5104 = vmatpush3.bf16.msra.mxu1 %v5525_v0  ;;  %v2729_v28 = vadd.f32 %v2728_v1, %v6448_v59  ;;  %v2977_v58 = vmax.f32 %v2678_v7, 0.0  ;;  %v2961_v2 = vmax.f32 %v2674_v35, 0.0  ;;  %v5536_v42 = vld [vmem:[#allocation4 + $0x198] sm:$0xff]   ;;  %v5538_v49 = vld [vmem:[#allocation4 + $0x1d0] sm:$0xff]   ;;  %v5543_v7 = vld [vmem:[#allocation4 + $0x268] sm:$0xff]  }
 0xbfe   :  { %v6453_v16 = vpop.f32.mrf.mxu1  ;;  %5085 = vmatprep.subr.bf16.mxu0 %v5526_v47  ;;  %5105 = vmatprep.subr.bf16.mxu1 %v5527_v56  ;;  %v2994_v15 = vmax.f32 %v2686_v39, 0.0  ;;  %v6472_v8 = vrot.slane %v6468_v34, %v5881_v19  ;;  %v2684_v19 = vadd.f32 %v6431_v32, %v2218_v57  ;;  %v6479_v50 = vpop.f32.mrf.mxu0  ;;  %v5541_v51 = vld [vmem:[#allocation4 + $0x230] sm:$0xff]   ;;  %v3009_v1 = vmax.f32 %v2688_v13, 0.0  ;;  %v5544_v35 = vld [vmem:[#allocation4 + $0x188] sm:$0xff]  }
 0xbff   :  { %4166 = vmatprep.mubr.bf16.mxu1 %v3040_v4  ;;  %v2964_v10 = vmax.f32 %v2729_v28, 0.0  ;;  %v3025_v33 = vpack.c.bf16 %v2977_v58, %v2961_v2  ;;  %v5545_v28 = vld [vmem:[#allocation4 + $0x228] sm:$0xff]   ;;  %v5551_v2 = vld [vmem:[#allocation4 + $0x2f8] sm:$0xff]   ;;  %v6498_v13 = vrot.slane %v6468_v34, %v5889_v23 }
 0xc00   :  { %v2732_v24 = vpop.f32.mrf.mxu1  ;;  %4167 = vmatmul.mubr.bf16.gmra.mxu1 %v3039_v9  ;;  %v3042_v0 = vpack.c.bf16 %v3010_v55, %v2994_v15  ;;  %v2786_v47 = vadd.f32 %v2785_v31, %v6472_v8  ;;  %v2782_v40 = vadd.f32 %v2781_v26, %v6472_v8  ;;  %v2993_v32 = vmax.f32 %v2684_v19, 0.0  ;;  %v6484_v57 = vpop.f32.mrf.mxu0  ;;  %v5549_v55 = vld [vmem:[#allocation4 + $0x220] sm:$0xff]  }
 0xc01   :  { %v2733_v60 = vadd.f32 %v2732_v24, %v6448_v59  ;;  %5086 = vmatpush3.bf16.msra.mxu0 %v5528_v5  ;;  %5106 = vmatpush3.bf16.msra.mxu1 %v5529_v17  ;;  %v5540_v5 = vld [vmem:[#allocation4 + $0x190] sm:$0xff]   ;;  %v5542_v17 = vld [vmem:[#allocation4 + $0x1c8] sm:$0xff]   ;;  %v2226_v26 = vrot.slane %v6416_v43, %v5905_v37  ;;  %v5547_v24 = vld [vmem:[#allocation4 + $0x260] sm:$0xff]  }
 0xc02   :  { %v6463_v53 = vpop.f32.mrf.mxu1  ;;  %5087 = vmatprep.subr.bf16.mxu0 %v5530_v63  ;;  %5107 = vmatprep.subr.bf16.mxu1 %v5531_v25  ;;  %v2982_v9 = vmax.f32 %v2786_v47, 0.0  ;;  %v2966_v63 = vmax.f32 %v2782_v40, 0.0  ;;  %v3041_v25 = vpack.c.bf16 %v3009_v1, %v2993_v32  ;;  %v6489_v58 = vpop.f32.mrf.mxu0 }
 0xc03   :  { %v2980_v29 = vmax.f32 %v2733_v60, 0.0  ;;  %v2731_v60 = vadd.f32 %v6453_v16, %v2226_v26  ;;  %v2727_v43 = vadd.f32 %v6444_v46, %v2226_v26  ;;  %v5550_v16 = vld [vmem:[#allocation4 + $0x258] sm:$0xff]  }
 0xc04   :  { %v2738_v45 = vpop.f32.mrf.mxu1  ;;  %v3030_v39 = vpack.c.bf16 %v2982_v9, %v2966_v63  ;;  %v2795_v31 = vpop.f32.mrf.mxu0  ;;  %v5552_v46 = vld [vmem:[#allocation4 + $0x218] sm:$0xff]   ;;  %v5559_v9 = vld [vmem:[#allocation4 + $0x2e8] sm:$0xff]  }
 0xc05   :  { %v3028_v21 = vpack.c.bf16 %v2980_v29, %v2964_v10  ;;  %5088 = vmatpush3.bf16.msra.mxu0 %v5532_v3  ;;  %5108 = vmatpush3.bf16.msra.mxu1 %v5533_v20  ;;  %v5546_v3 = vld [vmem:[#allocation4 + $0x1c0] sm:$0xff]   ;;  %v2739_v10 = vadd.f32 %v2738_v45, %v6448_v59 }
 0xc06   :  { %v6475_v38 = vpop.f32.mrf.mxu1  ;;  %5129 = vmatprep.subr.bf16.mxu0 %v5535_v52  ;;  %5109 = vmatprep.subr.bf16.mxu1 %v5534_v54  ;;  %v5548_v29 = vld [vmem:[#allocation4 + $0x180] sm:$0xff]   ;;  %v2979_v54 = vmax.f32 %v2731_v60, 0.0  ;;  %v6501_v47 = vpop.f32.mrf.mxu0 }
 0xc07   :  { %4256 = vmatprep.mubr.bf16.mxu1 %v3028_v21  ;;  %v2963_v21 = vmax.f32 %v2727_v43, 0.0  ;;  %v5562_v60 = vld [vmem:[#allocation4 + $0x240] sm:$0xff]  }
 0xc08   :  { %4208 = vmatmul.mubr.bf16.vlgmr.msra.gmra.mxu0 %v3025_v33  ;;  %v2742_v56 = vpop.f32.mrf.mxu1  ;;  %v2996_v33 = vmax.f32 %v2739_v10, 0.0  ;;  %v2887_v32 = vpop.f32.mrf.mxu0 }
 0xc09   :  { %4215 = vmatprep.mubr.bf16.mxu0 %v3042_v0  ;;  %5130 = vmatpush3.bf16.msra.mxu0 %v5537_v30  ;;  %v2743_v20 = vadd.f32 %v2742_v56, %v6448_v59  ;;  %v5553_v59 = vld [vmem:[#allocation4 + $0x2b8] sm:$0xff]   ;;  %v3027_v45 = vpack.c.bf16 %v2979_v54, %v2963_v21  ;;  %v5555_v0 = vld [vmem:[#allocation4 + $0x2f0] sm:$0xff]   ;;  %v2737_v56 = vadd.f32 %v6463_v53, %v2226_v26 }
 0xc0a   :  { %5110 = vmatpush3.bf16.msra.mxu1 %v5536_v42  ;;  %v6482_v4 = vpop.f32.mrf.mxu1  ;;  %5131 = vmatprep.subr.bf16.mxu0 %v5539_v44  ;;  %v2741_v42 = vadd.f32 %v6475_v38, %v2226_v26  ;;  %v5554_v44 = vld [vmem:[#allocation4 + $0x250] sm:$0xff]   ;;  %v5567_v54 = vld [vmem:[#allocation4 + $0x378] sm:$0xff]  }
 0xc0b   :  { %5111 = vmatprep.subr.bf16.mxu1 %v5538_v49  ;;  %v3012_v15 = vmax.f32 %v2743_v20, 0.0  ;;  %v5557_v38 = vld [vmem:[#allocation4 + $0x2b0] sm:$0xff]   ;;  %v2995_v63 = vmax.f32 %v2737_v56, 0.0  ;;  %v6515_v20 = vpop.f32.mrf.mxu0 }
 0xc0c   :  { %v2834_v14 = vpop.f32.mrf.mxu1 }
 0xc0d   :  { %5132 = vmatpush3.bf16.msra.mxu0 %v5541_v51  ;;  %v3044_v49 = vpack.c.bf16 %v3012_v15, %v2996_v33  ;;  %v5556_v51 = vld [vmem:[#allocation4 + $0x210] sm:$0xff]   ;;  %v2835_v1 = vadd.f32 %v2834_v14, %v6498_v13  ;;  %v2891_v15 = vpop.f32.mrf.mxu0 }
 0xc0e   :  { %5112 = vmatpush3.bf16.msra.mxu1 %v5540_v5  ;;  %5133 = vmatprep.subr.bf16.mxu0 %v5543_v7  ;;  %v6493_v52 = vpop.f32.mrf.mxu1  ;;  %v5558_v5 = vld [vmem:[#allocation4 + $0x248] sm:$0xff]   ;;  %v3011_v7 = vmax.f32 %v2741_v42, 0.0 }
 0xc0f   :  { %5113 = vmatprep.subr.bf16.mxu1 %v5542_v17  ;;  %v2234_v17 = vrot.slane %v6468_v34, %v5868_v12 }
 0xc10   :  { %4216 = vmatmul.mubr.bf16.gmra.mxu0 %v3041_v25  ;;  %v2838_v30 = vpop.f32.mrf.mxu1  ;;  %v2968_v25 = vmax.f32 %v2835_v1, 0.0  ;;  %v5572_v1 = vld [vmem:[#allocation4 + $0x290] sm:$0xff]  }
 0xc11   :  { %5134 = vmatpush3.bf16.msra.mxu0 %v5545_v28  ;;  %4305 = vmatprep.mubr.bf16.mxu0 %v3030_v39  ;;  %v2839_v19 = vadd.f32 %v2838_v30, %v6498_v13  ;;  %v5560_v28 = vld [vmem:[#allocation4 + $0x208] sm:$0xff]   ;;  %v2784_v14 = vadd.f32 %v6458_v11, %v2234_v17  ;;  %v3043_v39 = vpack.c.bf16 %v3011_v7, %v2995_v63  ;;  %v5564_v11 = vld [vmem:[#allocation4 + $0x200] sm:$0xff]   ;;  %v5569_v30 = vld [vmem:[#allocation4 + $0x338] sm:$0xff]  }
 0xc12   :  { %5114 = vmatpush3.bf16.msra.mxu1 %v5544_v35  ;;  %5135 = vmatprep.subr.bf16.mxu0 %v5547_v24  ;;  %v6505_v40 = vpop.f32.mrf.mxu1  ;;  %v5561_v35 = vld [vmem:[#allocation4 + $0x2a8] sm:$0xff]   ;;  %v2796_v24 = vadd.f32 %v2795_v31, %v6472_v8  ;;  %v2780_v12 = vadd.f32 %v6442_v36, %v2234_v17  ;;  %v5566_v36 = vld [vmem:[#allocation4 + $0x2d8] sm:$0xff]   ;;  %v2794_v33 = vadd.f32 %v6489_v58, %v2234_v17 }
 0xc13   :  { %5115 = vmatprep.subr.bf16.mxu1 %v5546_v3  ;;  %v2984_v53 = vmax.f32 %v2839_v19, 0.0  ;;  %v5563_v3 = vld [vmem:[#allocation4 + $0x2e0] sm:$0xff]   ;;  %v5574_v7 = vld [vmem:[#allocation4 + $0x2c8] sm:$0xff]  }
 0xc14   :  { %v6510_v26 = vpop.f32.mrf.mxu1  ;;  %v2965_v31 = vmax.f32 %v2780_v12, 0.0  ;;  %v3013_v58 = vmax.f32 %v2794_v33, 0.0  ;;  %v5581_v12 = vld [vmem:[#allocation4 + $0x320] sm:$0xff]  }
 0xc15   :  { %5136 = vmatpush3.bf16.msra.mxu0 %v5549_v55  ;;  %v3032_v43 = vpack.c.bf16 %v2984_v53, %v2968_v25  ;;  %v2792_v55 = vadd.f32 %v6484_v57, %v6472_v8  ;;  %v6523_v8 = vrot.slane %v6468_v34, %v5939_v6 }
 0xc16   :  { %5116 = vmatpush3.bf16.msra.mxu1 %v5548_v29  ;;  %5137 = vmatprep.subr.bf16.mxu0 %v5550_v16  ;;  %v6519_v10 = vpop.f32.mrf.mxu1  ;;  %v2981_v29 = vmax.f32 %v2784_v14, 0.0  ;;  %v5565_v16 = vld [vmem:[#allocation4 + $0x2a0] sm:$0xff]  }
 0xc17   :  { %5157 = vmatprep.subr.bf16.mxu1 %v5551_v2  ;;  %v3014_v2 = vmax.f32 %v2796_v24, 0.0  ;;  %v2998_v21 = vmax.f32 %v2792_v55, 0.0  ;;  %v2888_v19 = vadd.f32 %v2887_v32, %v6523_v8  ;;  %v5577_v32 = vld [vmem:[#allocation4 + $0x328] sm:$0xff]   ;;  %v5579_v14 = vld [vmem:[#allocation4 + $0x360] sm:$0xff]   ;;  %v5582_v55 = vld [vmem:[#allocation4 + $0x358] sm:$0xff]  }
 0xc18   :  { %v2848_v57 = vpop.f32.mrf.mxu1  ;;  %v5578_v24 = vld [vmem:[#allocation4 + $0x2c0] sm:$0xff]  }
 0xc19   :  { %4257 = vmatmul.mubr.bf16.vlgmr.msra.gmra.mxu1 %v3027_v45  ;;  %5138 = vmatpush3.bf16.msra.mxu0 %v5552_v46  ;;  %v3029_v46 = vpack.c.bf16 %v2981_v29, %v2965_v31  ;;  %v5571_v45 = vld [vmem:[#allocation4 + $0x370] sm:$0xff]   ;;  %v3046_v42 = vpack.c.bf16 %v3014_v2, %v2998_v21  ;;  %v2970_v53 = vmax.f32 %v2888_v19, 0.0  ;;  %v5583_v29 = vld [vmem:[#allocation4 + $0x3f8] sm:$0xff]   ;;  %v2250_v19 = vrot.slane %v6468_v34, %v5918_v48 }
 0xc1a   :  { %4264 = vmatprep.mubr.bf16.mxu1 %v3044_v49  ;;  %5158 = vmatpush3.bf16.msra.mxu1 %v5553_v59  ;;  %v5568_v59 = vld [vmem:[#allocation4 + $0x298] sm:$0xff]   ;;  %v2790_v49 = vadd.f32 %v6479_v50, %v2234_v17  ;;  %v6529_v56 = vpop.f32.mrf.mxu1  ;;  %v2242_v50 = vrot.slane %v6468_v34, %v5886_v22 }
 0xc1b   :  { %5139 = vmatprep.subr.bf16.mxu0 %v5554_v44  ;;  %5159 = vmatprep.subr.bf16.mxu1 %v5555_v0  ;;  %v2892_v44 = vadd.f32 %v2891_v15, %v6523_v8  ;;  %v5570_v0 = vld [vmem:[#allocation4 + $0x2d0] sm:$0xff]   ;;  %v6544_v15 = vrot.slane %v6468_v34, %v5911_v41 }
 0xc1c   :  { %v2940_v17 = vpop.f32.mrf.mxu1  ;;  %v2833_v22 = vadd.f32 %v6482_v4, %v2242_v50  ;;  %v5584_v4 = vld [vmem:[#allocation4 + $0x318] sm:$0xff]   ;;  %v2847_v21 = vadd.f32 %v6519_v10, %v2242_v50  ;;  %v5591_v10 = vld [vmem:[#allocation4 + $0x3e8] sm:$0xff]  }
 0xc1d   :  { %5140 = vmatpush3.bf16.msra.mxu0 %v5556_v51  ;;  %v5573_v51 = vld [vmem:[#allocation4 + $0x330] sm:$0xff]   ;;  %v2941_v41 = vadd.f32 %v2940_v17, %v6544_v15  ;;  %v5595_v17 = vld [vmem:[#allocation4 + $0x3e0] sm:$0xff]  }
 0xc1e   :  { %5160 = vmatpush3.bf16.msra.mxu1 %v5557_v38  ;;  %5141 = vmatprep.subr.bf16.mxu0 %v5558_v5  ;;  %v5575_v38 = vld [vmem:[#allocation4 + $0x368] sm:$0xff]   ;;  %v2986_v5 = vmax.f32 %v2892_v44, 0.0  ;;  %v2967_v2 = vmax.f32 %v2833_v22, 0.0  ;;  %v5589_v44 = vld [vmem:[#allocation4 + $0x3b0] sm:$0xff]  }
 0xc1f   :  { %5161 = vmatprep.subr.bf16.mxu1 %v5559_v9  ;;  %v2997_v9 = vmax.f32 %v2790_v49, 0.0  ;;  %v3015_v49 = vmax.f32 %v2847_v21, 0.0  ;;  %v5603_v21 = vld [vmem:[#allocation4 + $0x388] sm:$0xff]  }
 0xc20   :  { %v3034_v25 = vpack.c.bf16 %v2986_v5, %v2970_v53  ;;  %v2972_v5 = vmax.f32 %v2941_v41, 0.0 }
 0xc21   :  { %4265 = vmatmul.mubr.bf16.gmra.mxu1 %v3043_v39  ;;  %5142 = vmatpush3.bf16.msra.mxu0 %v5560_v28  ;;  %v3045_v63 = vpack.c.bf16 %v3013_v58, %v2997_v9  ;;  %v5576_v28 = vld [vmem:[#allocation4 + $0x288] sm:$0xff]   ;;  %v6534_v39 = vpop.f32.mrf.mxu0 }
 0xc22   :  { %5162 = vmatpush3.bf16.msra.mxu1 %v5561_v35  ;;  %4354 = vmatprep.mubr.bf16.mxu1 %v3032_v43  ;;  %v2837_v35 = vadd.f32 %v6493_v52, %v2242_v50  ;;  %v2845_v43 = vadd.f32 %v6510_v26, %v6498_v13  ;;  %v5580_v52 = vld [vmem:[#allocation4 + $0x280] sm:$0xff]  }
 0xc23   :  { %5143 = vmatprep.subr.bf16.mxu0 %v5562_v60  ;;  %5163 = vmatprep.subr.bf16.mxu1 %v5563_v3  ;;  %v2849_v60 = vadd.f32 %v2848_v57, %v6498_v13  ;;  %v6538_v3 = vpop.f32.mrf.mxu1  ;;  %v5585_v13 = vld [vmem:[#allocation4 + $0x3b8] sm:$0xff]   ;;  %v5586_v57 = vld [vmem:[#allocation4 + $0x350] sm:$0xff]  }
 0xc24   :  { %v3000_v31 = vmax.f32 %v2845_v43, 0.0 }
 0xc25   :  { %5144 = vmatpush3.bf16.msra.mxu0 %v5564_v11  ;;  %v2983_v11 = vmax.f32 %v2837_v35, 0.0  ;;  %v5597_v35 = vld [vmem:[#allocation4 + $0x3a0] sm:$0xff]  }
 0xc26   :  { %5164 = vmatpush3.bf16.msra.mxu1 %v5565_v16  ;;  %5185 = vmatprep.subr.bf16.mxu0 %v5567_v54  ;;  %v2897_v16 = vpop.f32.mrf.mxu0  ;;  %v3016_v54 = vmax.f32 %v2849_v60, 0.0  ;;  %v5598_v60 = vld [vmem:[#allocation4 + $0x3d8] sm:$0xff]  }
 0xc27   :  { %5165 = vmatprep.subr.bf16.mxu1 %v5566_v36  ;;  %v2944_v36 = vpop.f32.mrf.mxu1  ;;  %v3031_v26 = vpack.c.bf16 %v2983_v11, %v2967_v2  ;;  %v5600_v11 = vld [vmem:[#allocation4 + $0x3d0] sm:$0xff]  }
 0xc28   :  { %4306 = vmatmul.mubr.bf16.vlgmr.msra.gmra.mxu0 %v3029_v46  ;;  %v2899_v46 = vpop.f32.mrf.mxu0  ;;  %v3048_v33 = vpack.c.bf16 %v3016_v54, %v3000_v31  ;;  %v5601_v2 = vld [vmem:[#allocation4 + $0x390] sm:$0xff]   ;;  %v2258_v31 = vrot.slane %v6468_v34, %v5905_v37 }
 0xc29   :  { %4313 = vmatprep.mubr.bf16.mxu0 %v3046_v42  ;;  %5186 = vmatpush3.bf16.msra.mxu0 %v5569_v30  ;;  %v5587_v30 = vld [vmem:[#allocation4 + $0x3f0] sm:$0xff]  }
 0xc2a   :  { %5166 = vmatpush3.bf16.msra.mxu1 %v5568_v59  ;;  %5187 = vmatprep.subr.bf16.mxu0 %v5571_v45  ;;  %v2945_v59 = vadd.f32 %v2944_v36, %v6544_v15  ;;  %v2843_v45 = vadd.f32 %v6505_v40, %v2242_v50  ;;  %v5588_v42 = vld [vmem:[#allocation4 + $0x310] sm:$0xff]   ;;  %v5592_v40 = vld [vmem:[#allocation4 + $0x308] sm:$0xff]   ;;  %v5594_v50 = vld [vmem:[#allocation4 + $0x340] sm:$0xff]  }
 0xc2b   :  { %5167 = vmatprep.subr.bf16.mxu1 %v5570_v0  ;;  %v5590_v0 = vld [vmem:[#allocation4 + $0x348] sm:$0xff]  }
 0xc2c   :  { %v2988_v58 = vmax.f32 %v2945_v59, 0.0  ;;  %v5602_v36 = vld [vmem:[#allocation4 + $0x3c8] sm:$0xff]   ;;  %v5605_v59 = vld [vmem:[#allocation4 + $0x380] sm:$0xff]  }
 0xc2d   :  { %5188 = vmatpush3.bf16.msra.mxu0 %v5573_v51  ;;  %v2901_v51 = vpop.f32.mrf.mxu0 }
 0xc2e   :  { %5168 = vmatpush3.bf16.msra.mxu1 %v5572_v1  ;;  %5189 = vmatprep.subr.bf16.mxu0 %v5575_v38  ;;  %v2999_v1 = vmax.f32 %v2843_v45, 0.0  ;;  %v2890_v38 = vadd.f32 %v6515_v20, %v2250_v19  ;;  %v2902_v9 = vadd.f32 %v2901_v51, %v6523_v8 }
 0xc2f   :  { %5169 = vmatprep.subr.bf16.mxu1 %v5574_v7  ;;  %v5593_v7 = vld [vmem:[#allocation4 + $0x3a8] sm:$0xff]  }
 0xc30   :  { %4314 = vmatmul.mubr.bf16.gmra.mxu0 %v3045_v63  ;;  %v3047_v53 = vpack.c.bf16 %v3015_v49, %v2999_v1  ;;  %v3036_v63 = vpack.c.bf16 %v2988_v58, %v2972_v5  ;;  %v2985_v20 = vmax.f32 %v2890_v38, 0.0 }
 0xc31   :  { %5190 = vmatpush3.bf16.msra.mxu0 %v5577_v32  ;;  %4403 = vmatprep.mubr.bf16.mxu0 %v3034_v25  ;;  %v2886_v32 = vadd.f32 %v6501_v47, %v2250_v19  ;;  %v5596_v25 = vld [vmem:[#allocation4 + $0x300] sm:$0xff]  }
 0xc32   :  { %5170 = vmatpush3.bf16.msra.mxu1 %v5576_v28  ;;  %5191 = vmatprep.subr.bf16.mxu0 %v5579_v14  ;;  %v2898_v28 = vadd.f32 %v2897_v16, %v6523_v8  ;;  %v2948_v14 = vpop.f32.mrf.mxu1  ;;  %v5599_v8 = vld [vmem:[#allocation4 + $0x398] sm:$0xff]  }
 0xc33   :  { %5171 = vmatprep.subr.bf16.mxu1 %v5578_v24  ;;  %v3018_v24 = vmax.f32 %v2902_v9, 0.0  ;;  %v2969_v22 = vmax.f32 %v2886_v32, 0.0 }
 0xc34   :  { %v2950_v43 = vpop.f32.mrf.mxu1 }
 0xc35   :  { %5192 = vmatpush3.bf16.msra.mxu0 %v5581_v12  ;;  %v3002_v12 = vmax.f32 %v2898_v28, 0.0  ;;  %v3033_v47 = vpack.c.bf16 %v2985_v20, %v2969_v22 }
 0xc36   :  { %5172 = vmatpush3.bf16.msra.mxu1 %v5580_v52  ;;  %5193 = vmatprep.subr.bf16.mxu0 %v5582_v55  ;;  %v2900_v52 = vadd.f32 %v2899_v46, %v2250_v19  ;;  %v2952_v16 = vpop.f32.mrf.mxu1  ;;  %v2939_v46 = vadd.f32 %v6529_v56, %v2258_v31 }
 0xc37   :  { %5213 = vmatprep.subr.bf16.mxu1 %v5583_v29  ;;  %v3050_v55 = vpack.c.bf16 %v3018_v24, %v3002_v12  ;;  %v2896_v29 = vadd.f32 %v6534_v39, %v2250_v19  ;;  %v5604_v39 = vld [vmem:[#allocation4 + $0x3c0] sm:$0xff]  }
 0xc38   :  { %v3017_v54 = vmax.f32 %v2900_v52, 0.0  ;;  %v2971_v34 = vmax.f32 %v2939_v46, 0.0 }
 0xc39   :  { %4355 = vmatmul.mubr.bf16.vlgmr.msra.gmra.mxu1 %v3031_v26  ;;  %5194 = vmatpush3.bf16.msra.mxu0 %v5584_v4  ;;  %v3001_v4 = vmax.f32 %v2896_v29, 0.0 }
 0xc3a   :  { %4362 = vmatprep.mubr.bf16.mxu1 %v3048_v33  ;;  %5214 = vmatpush3.bf16.msra.mxu1 %v5585_v13  ;;  %v2954_v13 = vpop.f32.mrf.mxu1  ;;  %v2951_v33 = vadd.f32 %v2950_v43, %v6544_v15 }
 0xc3b   :  { %5195 = vmatprep.subr.bf16.mxu0 %v5586_v57  ;;  %5215 = vmatprep.subr.bf16.mxu1 %v5587_v30  ;;  %v3049_v26 = vpack.c.bf16 %v3017_v54, %v3001_v4  ;;  %v2943_v57 = vadd.f32 %v6538_v3, %v2258_v31  ;;  %v2955_v30 = vadd.f32 %v2954_v13, %v6544_v15 }
 0xc3d   :  { %5196 = vmatpush3.bf16.msra.mxu0 %v5588_v42  ;;  %v2987_v45 = vmax.f32 %v2943_v57, 0.0  ;;  %v3020_v37 = vmax.f32 %v2955_v30, 0.0  ;;  %v3004_v42 = vmax.f32 %v2951_v33, 0.0 }
 0xc3e   :  { %5216 = vmatpush3.bf16.msra.mxu1 %v5589_v44  ;;  %5197 = vmatprep.subr.bf16.mxu0 %v5590_v0  ;;  %v2953_v44 = vadd.f32 %v2952_v16, %v2258_v31  ;;  %v2949_v0 = vadd.f32 %v2948_v14, %v2258_v31 }
 0xc3f   :  { %5217 = vmatprep.subr.bf16.mxu1 %v5591_v10  ;;  %v3035_v41 = vpack.c.bf16 %v2987_v45, %v2971_v34  ;;  %v3052_v3 = vpack.c.bf16 %v3020_v37, %v3004_v42 }
 0xc40   :  { %v3019_v49 = vmax.f32 %v2953_v44, 0.0  ;;  %v3003_v10 = vmax.f32 %v2949_v0, 0.0 }
 0xc41   :  { %4363 = vmatmul.mubr.bf16.gmra.mxu1 %v3047_v53  ;;  %5198 = vmatpush3.bf16.msra.mxu0 %v5592_v40 }
 0xc42   :  { %5218 = vmatpush3.bf16.msra.mxu1 %v5593_v7  ;;  %4452 = vmatprep.mubr.bf16.mxu1 %v3036_v63  ;;  %v3051_v19 = vpack.c.bf16 %v3019_v49, %v3003_v10 }
 0xc43   :  { %5199 = vmatprep.subr.bf16.mxu0 %v5594_v50  ;;  %5219 = vmatprep.subr.bf16.mxu1 %v5595_v17 }
 0xc45   :  { %5200 = vmatpush3.bf16.msra.mxu0 %v5596_v25 }
 0xc46   :  { %5220 = vmatpush3.bf16.msra.mxu1 %v5597_v35 }
 0xc47   :  { %5221 = vmatprep.subr.bf16.mxu1 %v5598_v60 }
 0xc48   :  { %4404 = vmatmul.mubr.bf16.vlgmr.msra.gmra.mxu0 %v3033_v47 }
 0xc49   :  { %4411 = vmatprep.mubr.bf16.mxu0 %v3050_v55 }
 0xc4a   :  { %5222 = vmatpush3.bf16.msra.mxu1 %v5599_v8 }
 0xc4b   :  { %5223 = vmatprep.subr.bf16.mxu1 %v5600_v11 }
 0xc4e   :  { %5224 = vmatpush3.bf16.msra.mxu1 %v5601_v2 }
 0xc4f   :  { %5225 = vmatprep.subr.bf16.mxu1 %v5602_v36 }
 0xc50   :  { %4412 = vmatmul.mubr.bf16.gmra.mxu0 %v3049_v26 }
 0xc52   :  { %5226 = vmatpush3.bf16.msra.mxu1 %v5603_v21 }
 0xc53   :  { %5227 = vmatprep.subr.bf16.mxu1 %v5604_v39 }
 0xc56   :  { %5228 = vmatpush3.bf16.msra.mxu1 %v5605_v59 }
 0xc59   :  { %4453 = vmatmul.mubr.bf16.vlgmr.msra.gmra.mxu1 %v3035_v41 }
 0xc5a   :  { %4460 = vmatprep.mubr.bf16.mxu1 %v3052_v3 }
 0xc61   :  { %4461 = vmatmul.mubr.bf16.gmra.mxu1 %v3051_v19 }
 0xca8   :  { %v5033_v56 = vpop.f32.mrf.mxu0 }
 0xcaa   :  { %v5034_v15 = vpop.f32.mrf.mxu0 }
 0xcab   :  { %v5035_v41 = vadd.f32 %v5034_v15, %v5033_v56 }
 0xcac   :  { %v5036_v51 = vpop.f32.mrf.mxu0 }
 0xcae   :  { %v5037_v58 = vpop.f32.mrf.mxu0 }
 0xcaf   :  { %v5038_v6 = vadd.f32 %v5037_v58, %v5036_v51 }
 0xcb0   :  { %v6563_v1 = vpop.f32.mrf.mxu0 }
 0xcb2   :  { %v5040_v38 = vpop.f32.mrf.mxu0 }
 0xcb4   :  { %v6565_v7 = vpop.f32.mrf.mxu0 }
 0xcb5   :  { %6660 = vst [vmem:[#allocation15_spill] sm:$0xff] %v6565_v7 }
 0xcb6   :  { %v6567_v53 = vpop.f32.mrf.mxu0 }
 0xcb7   :  { %6661 = vst [vmem:[#allocation16_spill] sm:$0xff] %v6567_v53 }
 0xcb8   :  { %v5061_v40 = vpop.f32.mrf.mxu1 }
 0xcba   :  { %v5062_v5 = vpop.f32.mrf.mxu1 }
 0xcbb   :  { %v5063_v34 = vadd.f32 %v5062_v5, %v5061_v40  ;;  %v5041_v40 = vadd.f32 %v5040_v38, %v6563_v1 }
 0xcbc   :  { %v5064_v9 = vpop.f32.mrf.mxu1 }
 0xcbd   :  { %v4161_v0 = vadd.f32 %v5063_v34, %v5035_v41 }
 0xcbe   :  { %v5065_v50 = vpop.f32.mrf.mxu1 }
 0xcbf   :  { %v5066_v49 = vadd.f32 %v5065_v50, %v5064_v9 }
 0xcc0   :  { %v5067_v32 = vpop.f32.mrf.mxu1 }
 0xcc2   :  { %v5068_v28 = vpop.f32.mrf.mxu1 }
 0xcc3   :  { %v5069_v62 = vadd.f32 %v5068_v28, %v5067_v32 }
 0xcc4   :  { %v5070_v25 = vpop.f32.mrf.mxu1 }
 0xcc5   :  { %v4169_v50 = vadd.f32 %v5069_v62, %v5041_v40 }
 0xcc6   :  { %v5071_v35 = vpop.f32.mrf.mxu1 }
 0xcc8   :  { %v5089_v17 = vpop.f32.mrf.mxu0 }
 0xcca   :  { %v5090_v63 = vpop.f32.mrf.mxu0 }
 0xccb   :  { %v5091_v44 = vadd.f32 %v5090_v63, %v5089_v17 }
 0xccc   :  { %v5092_v14 = vpop.f32.mrf.mxu0 }
 0xccd   :  { %v4210_v48 = vadd.f32 %v5091_v44, %v4161_v0 }
 0xcce   :  { %v5093_v20 = vpop.f32.mrf.mxu0 }
 0xccf   :  { %v5094_v18 = vadd.f32 %v5093_v20, %v5092_v14 }
 0xcd0   :  { %v5095_v24 = vpop.f32.mrf.mxu0 }
 0xcd2   :  { %v5096_v22 = vpop.f32.mrf.mxu0 }
 0xcd3   :  { %v5097_v5 = vadd.f32 %v5096_v22, %v5095_v24 }
 0xcd4   :  { %v5098_v43 = vpop.f32.mrf.mxu0 }
 0xcd6   :  { %v5099_v52 = vpop.f32.mrf.mxu0 }
 0xcd7   :  { %v5100_v62 = vadd.f32 %v5099_v52, %v5098_v43 }
 0xcd9   :  { %v5117_v60 = vpop.f32.mrf.mxu1 }
 0xcdb   :  { %v5118_v12 = vpop.f32.mrf.mxu1 }
 0xcdc   :  { %v5119_v10 = vadd.f32 %v5118_v12, %v5117_v60  ;;  %v5072_v60 = vadd.f32 %v5071_v35, %v5070_v25 }
 0xcdd   :  { %v5120_v47 = vpop.f32.mrf.mxu1 }
 0xcde   :  { %v4259_v53 = vadd.f32 %v5119_v10, %v4210_v48  ;;  %v6575_v48 = vld [vmem:[%s6644_s8] sm:$0xff] }
 0xcdf   :  { %v5121_v8 = vpop.f32.mrf.mxu1 }
 0xce0   :  { %v5122_v7 = vadd.f32 %v5121_v8, %v5120_v47 }
 0xce1   :  { %v5123_v11 = vpop.f32.mrf.mxu1 }
 0xce3   :  { %v5124_v16 = vpop.f32.mrf.mxu1 }
 0xce4   :  { %v5125_v51 = vadd.f32 %v5124_v16, %v5123_v11 }
 0xce5   :  { %v5126_v2 = vpop.f32.mrf.mxu1 }
 0xce7   :  { %v5127_v4 = vpop.f32.mrf.mxu1 }
 0xce8   :  { %v5145_v55 = vpop.f32.mrf.mxu0  ;;  %v5128_v8 = vadd.f32 %v5127_v4, %v5126_v2  ;;  %v6667_v4 = vld [vmem:[#allocation11_spill] sm:$0xff] }
 0xcea   :  { %v5146_v29 = vpop.f32.mrf.mxu0 }
 0xceb   :  { %v5147_v27 = vadd.f32 %v5146_v29, %v5145_v55 }
 0xcec   :  { %v5148_v54 = vpop.f32.mrf.mxu0 }
 0xced   :  { %v4308_v17 = vadd.f32 %v5147_v27, %v4259_v53  ;;  %v6665_v27 = vld [vmem:[#allocation16_spill] sm:$0xff]  ;;  %v4218_v53 = vadd.f32 %v5097_v5, %v4169_v50 }
 0xcee   :  { %v5149_v36 = vpop.f32.mrf.mxu0  ;;  %v6668_v5 = vld [vmem:[#allocation12_spill] sm:$0xff] }
 0xcef   :  { %v5150_v63 = vadd.f32 %v5149_v36, %v5148_v54  ;;  %v4267_v47 = vadd.f32 %v5125_v51, %v4218_v53 }
 0xcf0   :  { %v5151_v31 = vpop.f32.mrf.mxu0 }
 0xcf2   :  { %v5152_v26 = vpop.f32.mrf.mxu0 }
 0xcf3   :  { %v5153_v25 = vadd.f32 %v5152_v26, %v5151_v31 }
 0xcf4   :  { %v6569_v57 = vpop.f32.mrf.mxu0 }
 0xcf5   :  { %6662 = vst [vmem:[#allocation17_spill] sm:$0xff] %v6569_v57  ;;  %v4164_v57 = vadd.f32 %v5066_v49, %v5038_v6  ;;  %v6663_v6 = vld [vmem:[#allocation8_spill] sm:$0xff] }
 0xcf6   :  { %v5155_v30 = vpop.f32.mrf.mxu0  ;;  %v4472_v1 = vrot.slane %v6575_v48, %v6663_v6 }
 0xcf7   :  { %v4213_v15 = vadd.f32 %v5094_v18, %v4164_v57  ;;  %v6664_v18 = vld [vmem:[#allocation15_spill] sm:$0xff] }
 0xcf8   :  { %v5044_v38 = vadd.f32 %v6665_v27, %v6664_v18 }
 0xcf9   :  { %v5173_v13 = vpop.f32.mrf.mxu1  ;;  %v4262_v20 = vadd.f32 %v5122_v7, %v4213_v15 }
 0xcfa   :  { %v4172_v12 = vadd.f32 %v5072_v60, %v5044_v38  ;;  %v6669_v60 = vld [vmem:[#allocation14_spill] sm:$0xff] }
 0xcfb   :  { %v5174_v21 = vpop.f32.mrf.mxu1  ;;  %v4311_v24 = vadd.f32 %v5150_v63, %v4262_v20  ;;  %v6670_v20 = vld [vmem:[#allocation13_spill] sm:$0xff] }
 0xcfc   :  { %v5175_v23 = vadd.f32 %v5174_v21, %v5173_v13  ;;  %v4221_v36 = vadd.f32 %v5100_v62, %v4172_v12  ;;  %v4316_v13 = vadd.f32 %v5153_v25, %v4267_v47  ;;  %v6666_v21 = vld [vmem:[#allocation17_spill] sm:$0xff] }
 0xcfd   :  { %v5176_v39 = vpop.f32.mrf.mxu1  ;;  %v5156_v57 = vadd.f32 %v5155_v30, %v6666_v21 }
 0xcfe   :  { %v4357_v32 = vadd.f32 %v5175_v23, %v4308_v17 }
 0xcff   :  { %v5177_v46 = vpop.f32.mrf.mxu1 }
 0xd00   :  { %v5178_v28 = vadd.f32 %v5177_v46, %v5176_v39  ;;  %v4270_v46 = vadd.f32 %v5128_v8, %v4221_v36 }
 0xd01   :  { %v5179_v45 = vpop.f32.mrf.mxu1 }
 0xd02   :  { %v4360_v16 = vadd.f32 %v5178_v28, %v4311_v24 }
 0xd03   :  { %v5180_v42 = vpop.f32.mrf.mxu1 }
 0xd04   :  { %v5181_v55 = vadd.f32 %v5180_v42, %v5179_v45  ;;  %v4319_v42 = vadd.f32 %v5156_v57, %v4270_v46 }
 0xd05   :  { %v5182_v19 = vpop.f32.mrf.mxu1 }
 0xd07   :  { %v5183_v56 = vpop.f32.mrf.mxu1 }
 0xd08   :  { %v5201_v33 = vpop.f32.mrf.mxu0  ;;  %v5184_v34 = vadd.f32 %v5183_v56, %v5182_v19 }
 0xd0a   :  { %v5202_v59 = vpop.f32.mrf.mxu0  ;;  %v4368_v10 = vadd.f32 %v5184_v34, %v4319_v42 }
 0xd0b   :  { %v5203_v9 = vadd.f32 %v5202_v59, %v5201_v33  ;;  %v4365_v33 = vadd.f32 %v5181_v55, %v4316_v13 }
 0xd0c   :  { %v5204_v37 = vpop.f32.mrf.mxu0 }
 0xd0d   :  { %v4406_v22 = vadd.f32 %v5203_v9, %v4357_v32 }
 0xd0e   :  { %v5205_v3 = vpop.f32.mrf.mxu0 }
 0xd0f   :  { %v5206_v7 = vadd.f32 %v5205_v3, %v5204_v37 }
 0xd10   :  { %v5207_v61 = vpop.f32.mrf.mxu0 }
 0xd11   :  { %v4409_v52 = vadd.f32 %v5206_v7, %v4360_v16 }
 0xd12   :  { %v5208_v58 = vpop.f32.mrf.mxu0 }
 0xd13   :  { %v5209_v39 = vadd.f32 %v5208_v58, %v5207_v61 }
 0xd14   :  { %v5210_v11 = vpop.f32.mrf.mxu0 }
 0xd15   :  { %v4414_v41 = vadd.f32 %v5209_v39, %v4365_v33 }
 0xd16   :  { %v5211_v59 = vpop.f32.mrf.mxu0 }
 0xd17   :  { %v5212_v3 = vadd.f32 %v5211_v59, %v5210_v11  ;;  %v6671_v59 = vld [vmem:[#allocation9_spill] sm:$0xff] }
 0xd19   :  { %v5229_v14 = vpop.f32.mrf.mxu1  ;;  %v4417_v63 = vadd.f32 %v5212_v3, %v4368_v10 }
 0xd1b   :  { %v5230_v35 = vpop.f32.mrf.mxu1 }
 0xd1c   :  { %v5231_v23 = vadd.f32 %v5230_v35, %v5229_v14 }
 0xd1d   :  { %v5232_v29 = vpop.f32.mrf.mxu1 }
 0xd1e   :  { %v4455_v54 = vadd.f32 %v5231_v23, %v4406_v22 }
 0xd1f   :  { %v5233_v43 = vpop.f32.mrf.mxu1 }
 0xd20   :  { %v5234_v31 = vadd.f32 %v5233_v43, %v5232_v29  ;;  %v4473_v26 = vadd.f32 %v4472_v1, %v4455_v54 }
 0xd21   :  { %v5235_v37 = vpop.f32.mrf.mxu1 }
 0xd22   :  { %v4458_v2 = vadd.f32 %v5234_v31, %v4409_v52  ;;  %v4477_v45 = vadd.f32 %v4473_v26, %v6667_v4  ;;  %v6672_v4 = vld [vmem:[#allocation10_spill] sm:$0xff] }
 0xd23   :  { %v5236_v44 = vpop.f32.mrf.mxu1 }
 0xd24   :  { %v5237_v0 = vadd.f32 %v5236_v44, %v5235_v37  ;;  %v4481_v30 = vsel %vm342_vm1, %v4477_v45, 0.0  ;;  %v4474_v61 = vadd.f32 %v4472_v1, %v4458_v2  ;;  %v4536_v37 = vrot.slane %v6575_v48, %v6671_v59 }
 0xd25   :  { %v5238_v49 = vpop.f32.mrf.mxu1  ;;  %4482 = vadd.xlane.f32.xlu0 %v4481_v30 }
 0xd26   :  { %v4463_v40 = vadd.f32 %v5237_v0, %v4414_v41  ;;  %v4478_v15 = vadd.f32 %v4474_v61, %v6668_v5 }
 0xd27   :  { %v5239_v17 = vpop.f32.mrf.mxu1 }
 0xd28   :  { %v5240_v19 = vadd.f32 %v5239_v17, %v5238_v49  ;;  %v4484_v56 = vsel %vm342_vm1, %v4478_v15, 0.0  ;;  %v4475_v9 = vadd.f32 %v4472_v1, %v4463_v40 }
 0xd29   :  { %4485 = vadd.xlane.f32.xlu0 %v4484_v56 }
 0xd2a   :  { %v4466_v50 = vadd.f32 %v5240_v19, %v4417_v63  ;;  %v4479_v51 = vadd.f32 %v4475_v9, %v6669_v60 }
 0xd2c   :  { %v4487_v58 = vsel %vm342_vm1, %v4479_v51, 0.0  ;;  %v4476_v14 = vadd.f32 %v4472_v1, %v4466_v50 }
 0xd2d   :  { %4488 = vadd.xlane.f32.xlu1 %v4487_v58 }
 0xd2e   :  { %v4480_v32 = vadd.f32 %v4476_v14, %v6670_v20 }
 0xd30   :  { %v4490_v28 = vsel %vm342_vm1, %v4480_v32, 0.0 }
 0xd31   :  { %4491 = vadd.xlane.f32.xlu1 %v4490_v28 }
 0xdae   :  { %v4483_v6 = vpop.xlane.xlu0 %4482 }
 0xdaf   :  { %v4493_v18 = vmul.f32 0.030303031, %v4483_v6 }
 0xdb1   :  { %v4497_v27 = vsub.f32 %v4477_v45, %v4493_v18  ;;  %v4544_v45 = vrot.slane %v6575_v48, %v6672_v4 }
 0xdb2   :  { %v4486_v38 = vpop.xlane.xlu0 %4485 }
 0xdb3   :  { %v4494_v53 = vmul.f32 0.030303031, %v4486_v38  ;;  %v4501_v62 = vmul.f32 %v4497_v27, %v4497_v27 }
 0xdb5   :  { %v4498_v25 = vsub.f32 %v4478_v15, %v4494_v53  ;;  %v4505_v35 = vsel %vm342_vm1, %v4501_v62, 0.0 }
 0xdb6   :  { %4506 = vadd.xlane.f32.xlu0 %v4505_v35  ;;  %v4489_v24 = vpop.xlane.xlu1 %4488 }
 0xdb7   :  { %v4495_v22 = vmul.f32 0.030303031, %v4489_v24  ;;  %v4502_v7 = vmul.f32 %v4498_v25, %v4498_v25 }
 0xdb9   :  { %v4499_v1 = vsub.f32 %v4479_v51, %v4495_v22  ;;  %v4508_v23 = vsel %vm342_vm1, %v4502_v7, 0.0 }
 0xdba   :  { %4509 = vadd.xlane.f32.xlu0 %v4508_v23  ;;  %v4492_v12 = vpop.xlane.xlu1 %4491 }
 0xdbb   :  { %v4496_v47 = vmul.f32 0.030303031, %v4492_v12  ;;  %v4503_v8 = vmul.f32 %v4499_v1, %v4499_v1 }
 0xdbd   :  { %v4500_v55 = vsub.f32 %v4480_v32, %v4496_v47  ;;  %v4511_v11 = vsel %vm342_vm1, %v4503_v8, 0.0 }
 0xdbe   :  { %4512 = vadd.xlane.f32.xlu1 %v4511_v11 }
 0xdbf   :  { %v4504_v29 = vmul.f32 %v4500_v55, %v4500_v55 }
 0xdc1   :  { %v4514_v16 = vsel %vm342_vm1, %v4504_v29, 0.0 }
 0xdc2   :  { %4515 = vadd.xlane.f32.xlu1 %v4514_v16 }
 0xe3f   :  { %v4507_v54 = vpop.xlane.xlu0 %4506 }
 0xe40   :  { %v4517_v36 = vmul.f32 0.030303031, %v4507_v54 }
 0xe42   :  { %v4521_v13 = vadd.f32 1e-05, %v4517_v36 }
 0xe43   :  { %v4510_v21 = vpop.xlane.xlu0 %4509 }
 0xe44   :  { %5662 = vrsqrt.f32 %v4521_v13  ;;  %v4518_v57 = vmul.f32 0.030303031, %v4510_v21 }
 0xe46   :  { %v4522_v39 = vadd.f32 1e-05, %v4518_v57 }
 0xe47   :  { %v4513_v43 = vpop.xlane.xlu1 %4512 }
 0xe48   :  { %5664 = vrsqrt.f32 %v4522_v39  ;;  %v4519_v52 = vmul.f32 0.030303031, %v4513_v43 }
 0xe4a   :  { %v4523_v31 = vadd.f32 1e-05, %v4519_v52 }
 0xe4b   :  { %v4516_v26 = vpop.xlane.xlu1 %4515 }
 0xe4c   :  { %5666 = vrsqrt.f32 %v4523_v31  ;;  %v4520_v46 = vmul.f32 0.030303031, %v4516_v26 }
 0xe4e   :  { %v4524_v33 = vadd.f32 1e-05, %v4520_v46 }
 0xe50   :  { %5668 = vrsqrt.f32 %v4524_v33 }
 0xe51   :  { %v5663_v34 = vpop.eup %5662 }
 0xe52   :  { %v4529_v2 = vmul.f32 %v5663_v34, %v4497_v27 }
 0xe54   :  { %v4537_v42 = vmul.f32 %v4536_v37, %v4529_v2 }
 0xe55   :  { %v5665_v41 = vpop.eup %5664 }
 0xe56   :  { %v4545_v44 = vadd.f32 %v4544_v45, %v4537_v42  ;;  %v4530_v3 = vmul.f32 %v5665_v41, %v4498_v25 }
 0xe58   :  { %4549 = vxpose.xlu0.b32.start [1/2] (short) (narrow) %v4545_v44, 40  ;;  %v4538_v0 = vmul.f32 %v4536_v37, %v4530_v3 }
 0xe59   :  { %v5667_v30 = vpop.eup %5666 }
 0xe5a   :  { %v4546_v61 = vadd.f32 %v4544_v45, %v4538_v0  ;;  %v4531_v49 = vmul.f32 %v5667_v30, %v4499_v1 }
 0xe5c   :  { %4550 = vxpose.xlu0.b32.end [2/2] (short) (narrow) %v4546_v61, 40  ;;  %v4539_v10 = vmul.f32 %v4536_v37, %v4531_v49 }
 0xe5d   :  { %v5669_v40 = vpop.eup %5668 }
 0xe5e   :  { %v4547_v5 = vadd.f32 %v4544_v45, %v4539_v10  ;;  %v4532_v15 = vmul.f32 %v5669_v40, %v4500_v55 }
 0xe60   :  { %4587 = vxpose.xlu1.b32.start [1/2] (short) (narrow) %v4547_v5, 40  ;;  %v4540_v17 = vmul.f32 %v4536_v37, %v4532_v15 }
 0xe62   :  { %v4548_v63 = vadd.f32 %v4544_v45, %v4540_v17 }
 0xe64   :  { %4588 = vxpose.xlu1.b32.end [2/2] (short) (narrow) %v4548_v63, 40 }
 0xed4   :  { %v4565_v19 = vpop.trf.xlu0 }
 0xed5   :  { %4581 = vst.msk [vmem:[%s6645_s9] sm:$0xff] %vm794_vm2, %v4565_v19 }
 0xed8   :  { %v4566_v48 = vpop.trf.xlu0 }
 0xed9   :  { %4582 = vst.msk [vmem:[%s6645_s9 + $0x8] sm:$0xff] %vm794_vm2, %v4566_v48 }
 0xedc   :  { %v4603_v56 = vpop.trf.xlu1  ;;  %v4567_v9 = vpop.trf.xlu0 }
 0xedd   :  { %4929 = vst.msk [vmem:[%s6645_s9 + $0x28] sm:$0xff] %vm794_vm2, %v4603_v56  ;;  %4583 = vst.msk [vmem:[%s6645_s9 + $0x10] sm:$0xff] %vm794_vm2, %v4567_v9 }
 0xee0   :  { %v4604_v50 = vpop.trf.xlu1  ;;  %v4568_v60 = vpop.trf.xlu0 }
 0xee1   :  { %4930 = vst.msk [vmem:[%s6645_s9 + $0x30] sm:$0xff] %vm794_vm2, %v4604_v50  ;;  %4584 = vst.msk [vmem:[%s6645_s9 + $0x18] sm:$0xff] %vm794_vm2, %v4568_v60 }
 0xee4   :  { %v4605_v51 = vpop.trf.xlu1  ;;  %v4569_v58 = vpop.trf.xlu0 }
 0xee5   :  { %4931 = vst.msk [vmem:[%s6645_s9 + $0x38] sm:$0xff] %vm794_vm2, %v4605_v51 }
 0xee6   :  { %4586 = vst.msk [vmem:[%s6645_s9 + $0x20] sm:$0x1] %vm4585_vm3, %v4569_v58 }
 0xee8   :  { %v4606_v14 = vpop.trf.xlu1 }
 0xee9   :  { %4932 = vst.msk [vmem:[%s6645_s9 + $0x40] sm:$0xff] %vm794_vm2, %v4606_v14 }
 0xeec   :  { %v4607_v20 = vpop.trf.xlu1 }
 0xeed   :  { %4933 = vst.msk [vmem:[%s6645_s9 + $0x48] sm:$0x1] %vm4585_vm3, %v4607_v20 }
 0xeee   :  { %4629 = vsyncpa [#allocation3], 1 }
 0xeef   :  { %4630 = vsyncpa [#allocation5], 1 }

</bundles_post_ra>
